<compile_context>
chip_gen: v5e
topology: v5e:2x2
jax: 0.10.0
libtpu: 0.0.40
codegen_flags: <defaults>
</compile_context>

<pallas_src>
import jax
import jax.numpy as jnp
import numpy as np
from jax.experimental import pallas as pl
from jax.experimental.pallas import tpu as pltpu


def _round_up(x, m):
    return (x + m - 1) // m * m


def _pick_tile_h(H, W, need_even, target_rows):
    """Largest divisor of H (even if required) with TH*W <= target_rows (>= 1 row)."""
    th = max(1, min(H, max(1, target_rows // max(W, 1))))
    if need_even:
        th = max(th, 2)
    while th > 1 and (H % th != 0 or (need_even and th % 2 != 0)):
        th -= 1
    if need_even and th % 2 != 0:
        th = 2
    return th


def _vmem_limit_bytes():
    """Chip-aware scoped-VMEM limit: ~48 MiB on v7x (64 MiB phys), 96 MiB on v5e/v6e."""
    try:
        cap = int(pltpu.get_tpu_info().vmem_capacity_bytes)
    except Exception:
        cap = 64 * 1024 * 1024
    return int(min(96 * 1024 * 1024, max(cap - 16 * 1024 * 1024, 32 * 1024 * 1024)))


# --------------------- pass 1: conv (+ReLU) with fused partial BN stats ---------------------

def _make_conv_kernel(*, K, TH, W, Cin, KKC, KKCp, Cp, act, use_im2col):
    """Grid = (N, row_tiles).  x_ref is one (TH+K-1)-row halo window of one sample."""
    inv_cnt = np.float32(1.0 / (TH * W))

    def epilogue(acc, out_ref, stat_ref):
        if act:
            acc = jnp.maximum(acc, 0.0)
        vb = acc.astype(jnp.bfloat16)            # the values pass 2 will actually normalize
        out_ref[...] = vb.reshape(TH, W, Cp)
        v = vb.astype(jnp.float32)
        s = jnp.sum(v, axis=0, keepdims=True)                       # (1, Cp) per-tile sum
        d = v - s * inv_cnt                                         # centered within tile
        m2 = jnp.sum(d * d, axis=0, keepdims=True)                  # (1, Cp) per-tile M2
        stat_ref[...] = jnp.concatenate([s, m2], axis=0)            # single full-block store

    if use_im2col:
        def kernel(x_ref, w_ref, out_ref, stat_ref, patch_ref):
            # x_ref:     (TH+K-1, Wp, Cin)  bf16   halo window
            # w_ref:     (KKCp, Cp)         bf16   im2col weights (rows/cols zero padded)
            # patch_ref: (TH*W, KKCp)       bf16   im2col scratch (lane-dense)
            xw = x_ref[...]
            if KKCp > KKC:
                # scratch VMEM is uninitialized: zero the pad columns (NaN * 0 == NaN).
                patch_ref[:, KKC:] = jnp.zeros((TH * W, KKCp - KKC), jnp.bfloat16)
            for dy in range(K):
                for dx in range(K):
                    t = dy * K + dx
                    patch_ref[:, t * Cin:(t + 1) * Cin] = (
                        xw[dy:dy + TH, dx:dx + W, :].reshape(TH * W, Cin))
            acc = jnp.dot(patch_ref[...], w_ref[...],
                          preferred_element_type=jnp.float32)       # (TH*W, Cp) f32
            epilogue(acc, out_ref, stat_ref)
    else:
        # Deep-input path: the per-tap contraction is already full depth, skip im2col.
        def kernel(x_ref, w_ref, out_ref, stat_ref):
            xw = x_ref[...]
            acc = jnp.zeros((TH * W, Cp), jnp.float32)
            for dy in range(K):
                for dx in range(K):
                    tap = xw[dy:dy + TH, dx:dx + W, :].reshape(TH * W, Cin)
                    acc = acc + jnp.dot(tap, w_ref[dy * K + dx],
                                        preferred_element_type=jnp.float32)
            epilogue(acc, out_ref, stat_ref)

    return kernel


# -------- pass 2: (pool) + BN affine (+mask folded) + residual, lane-dense, bf16 I/O --------

def _make_post_kernel(*, TH2, W, Cp, pool, residual):
    THo, Wo = (TH2 // 2, W // 2) if pool else (TH2, W)

    def kernel(*refs):
        i = 0
        conv_ref = refs[i]; i += 1         # (TH2, W, Cp)  bf16
        a_ref = refs[i]; i += 1            # (1, Cp) f32   scale = gamma*rsqrt(var+eps)*mask
        b_ref = refs[i]; i += 1            # (1, Cp) f32   shift = (beta - mean*scale)*mask
        res_ref = None
        if residual:
            res_ref = refs[i]; i += 1      # (TH2, W, Cp)  bf16
        out_ref = refs[i]                  # (THo, Wo, Cp) bf16

        y = conv_ref[...].astype(jnp.float32)                        # (TH2, W, Cp)
        if pool:
            # AvgPool2d(2,2) commutes with the per-channel BN affine + mask, so pool the
            # raw conv values first.  Rows: leading-axis reshape + VPU add.  Columns: tiny
            # (Wo, W) batched matmul on the otherwise-idle MXU (no quadratic pool matrix).
            y4 = y.reshape(THo, 2, W, Cp)
            yr = y4[:, 0] + y4[:, 1]                                  # (THo, W, Cp)
            q = jax.lax.broadcasted_iota(jnp.int32, (Wo, W), 0)
            k = jax.lax.broadcasted_iota(jnp.int32, (Wo, W), 1)
            pw = jnp.where((k == 2 * q) | (k == 2 * q + 1),
                           jnp.float32(0.25), jnp.float32(0.0))       # (Wo, W)
            y = jnp.einsum('bqk,bkd->bqd',
                           jnp.broadcast_to(pw, (THo, Wo, W)), yr,
                           preferred_element_type=jnp.float32)        # (THo, Wo, Cp)
        y = y * a_ref[...] + b_ref[...]                               # BN affine (+ mask)
        if residual:                                                  # residual => pool=False
            y = y + res_ref[...].astype(jnp.float32)
        out_ref[...] = y.astype(out_ref.dtype)

    return kernel


# ----------------------------------------- wrapper ------------------------------------------

def conv_block_rn(x_nchw, weight_oihw, gamma, beta, *, act=False, pool=False,
                  residual=False, mask=None, stride=1, padding=1):
    """Pallas TPU implementation of ConvBlockRN.forward (training-mode BatchNorm)."""
    assert stride == 1  # TODO(synk): strided conv not implemented in the kernel.
    N, Cin, H, W = x_nchw.shape
    Cout, Cin_w, K, K2 = weight_oihw.shape
    assert Cin_w == Cin and K == K2
    Hp, Wp = H + 2 * padding, W + 2 * padding
    assert Hp - K + 1 == H and Wp - K + 1 == W, "kernel assumes a 'same' convolution"
    if residual:
        assert Cout == Cin and not pool, "residual requires Cout == Cin and pool=False"
    if pool:
        assert H % 2 == 0 and W % 2 == 0

    Cp = _round_up(Cout, 128)                    # lane-dense channel axis (compute side)
    KKC = K * K * Cin
    use_im2col = Cin < 128                       # deep inputs: direct taps, no patch scratch
    KKCp = _round_up(KKC, 128) if use_im2col else KKC

    TH = _pick_tile_h(H, W, False, target_rows=512)      # pass-1 MXU rows per tile
    RT = H // TH
    TH2 = _pick_tile_h(H, W, pool, target_rows=1024)     # pass-2 streaming rows per tile
    RT2 = H // TH2
    TH2o, W_o = (TH2 // 2, W // 2) if pool else (TH2, W)
    H_o = H // 2 if pool else H
    vmem_limit = _vmem_limit_bytes()

    # ---- layout glue: NCHW -> NHWC, spatial pad, non-overlapping (TH+K-1)-row halo windows
    #      (so pass 1 never keeps a whole padded sample resident / double-buffered in VMEM).
    x_nhwc = jnp.transpose(x_nchw, (0, 2, 3, 1)).astype(jnp.float32)
    x_pad = jnp.pad(
        x_nhwc, ((0, 0), (padding, padding), (padding, padding), (0, 0))
    ).astype(jnp.bfloat16)
    row_idx = jnp.arange(RT)[:, None] * TH + jnp.arange(TH + K - 1)[None, :]
    x_tiles = x_pad[:, row_idx]                          # (N, RT, TH+K-1, Wp, Cin)

    w_kkio = jnp.transpose(weight_oihw, (2, 3, 1, 0))    # (K, K, Cin, Cout)
    if use_im2col:
        w_p = jnp.pad(w_kkio.reshape(KKC, Cout),
                      ((0, KKCp - KKC), (0, Cp - Cout))).astype(jnp.bfloat16)
        w_spec = pl.BlockSpec((KKCp, Cp), lambda n, rt: (0, 0))
        scratch = [pltpu.VMEM((TH * W, KKCp), jnp.bfloat16)]
    else:
        w_p = jnp.pad(w_kkio.reshape(K * K, Cin, Cout),
                      ((0, 0), (0, 0), (0, Cp - Cout))).astype(jnp.bfloat16)
        w_spec = pl.BlockSpec((K * K, Cin, Cp), lambda n, rt: (0, 0, 0))
        scratch = []

    # ---- pass 1: tiled conv (+ReLU) with fused per-tile (sum, centered M2) BN stats ----
    conv_out, stats = pl.pallas_call(
        _make_conv_kernel(K=K, TH=TH, W=W, Cin=Cin, KKC=KKC, KKCp=KKCp, Cp=Cp,
                          act=act, use_im2col=use_im2col),
        grid=(N, RT),
        in_specs=[
            pl.BlockSpec((None, None, TH + K - 1, Wp, Cin),
                         lambda n, rt: (n, rt, 0, 0, 0)),
            w_spec,
        ],
        out_specs=[
            pl.BlockSpec((None, TH, W, Cp), lambda n, rt: (n, rt, 0, 0)),
            pl.BlockSpec((None, None, 2, Cp), lambda n, rt: (n, rt, 0, 0)),
        ],
        out_shape=[
            jax.ShapeDtypeStruct((N, H, W, Cp), jnp.bfloat16),
            jax.ShapeDtypeStruct((N, RT, 2, Cp), jnp.float32),
        ],
        scratch_shapes=scratch,
        compiler_params=pltpu.CompilerParams(
            dimension_semantics=("parallel", "parallel"),
            vmem_limit_bytes=vmem_limit),
    )(x_tiles, w_p)

    # ---- BN finalize: Chan/Welford combine of per-tile (sum, M2) -> global scale/shift ----
    eps = 1e-5
    cnt = float(TH * W)
    total = float(N * H * W)
    sums = stats[:, :, 0, :]                              # (N, RT, Cp)
    m2s = stats[:, :, 1, :]                               # (N, RT, Cp)
    mean = jnp.sum(sums, axis=(0, 1)) / total
    m2 = jnp.sum(m2s, axis=(0, 1)) + cnt * jnp.sum((sums / cnt - mean) ** 2, axis=(0, 1))
    var = m2 / total                                      # biased variance (training-mode BN)
    inv = jax.lax.rsqrt(var + eps)
    gamma_p = jnp.pad(gamma.astype(jnp.float32), (0, Cp - Cout))
    beta_p = jnp.pad(beta.astype(jnp.float32), (0, Cp - Cout))
    scale = gamma_p * inv
    shift = beta_p - mean * scale
    if mask is not None:                                  # per-channel mask folds into affine
        mask_p = jnp.pad(mask.astype(jnp.float32), (0, Cp - Cout))
        scale = scale * mask_p
        shift = shift * mask_p
    scale = scale.reshape(1, Cp)
    shift = shift.reshape(1, Cp)

    # ---- pass 2: (pool) + normalize + residual; memory bound -> bf16 in/out, f32 math ----
    inputs = [conv_out, scale, shift]
    in_specs = [
        pl.BlockSpec((None, TH2, W, Cp), lambda n, rt: (n, rt, 0, 0)),
        pl.BlockSpec((1, Cp), lambda n, rt: (0, 0)),
        pl.BlockSpec((1, Cp), lambda n, rt: (0, 0)),
    ]
    if residual:
        # TODO(synk): Cp lane padding inflates this stream for Cout << 128; an un-padded
        #             (W-folded) HBM layout needs an in-kernel sublane<->lane relayout.
        x_res = jnp.pad(x_nhwc, ((0, 0), (0, 0), (0, 0), (0, Cp - Cin))).astype(jnp.bfloat16)
        inputs.append(x_res)
        in_specs.append(pl.BlockSpec((None, TH2, W, Cp), lambda n, rt: (n, rt, 0, 0)))

    out_p = pl.pallas_call(
        _make_post_kernel(TH2=TH2, W=W, Cp=Cp, pool=pool, residual=residual),
        grid=(N, RT2),
        in_specs=in_specs,
        out_specs=pl.BlockSpec((None, TH2o, W_o, Cp), lambda n, rt: (n, rt, 0, 0)),
        out_shape=jax.ShapeDtypeStruct((N, H_o, W_o, Cp), jnp.bfloat16),
        compiler_params=pltpu.CompilerParams(
            dimension_semantics=("parallel", "parallel"),
            vmem_limit_bytes=vmem_limit),
    )(*inputs)

    return jnp.transpose(out_p[..., :Cout], (0, 3, 1, 2)).astype(jnp.float32)


# ------------------------------------------ test --------------------------------------------

def reference_forward(x, w, gamma, beta, *, act, pool, residual, mask):
    """Pure-JAX f32 reference matching PyTorch ConvBlockRN.forward (training-mode BN)."""
    out = jax.lax.conv_general_dilated(
        x, w, window_strides=(1, 1), padding=[(1, 1), (1, 1)],
        dimension_numbers=("NCHW", "OIHW", "NCHW"))
    if act:
        out = jnp.maximum(out, 0.0)
    mean = out.mean(axis=(0, 2, 3), keepdims=True)
    var = ((out - mean) ** 2).mean(axis=(0, 2, 3), keepdims=True)
    out = (out - mean) * jax.lax.rsqrt(var + 1e-5)
    out = out * gamma.reshape(1, -1, 1, 1) + beta.reshape(1, -1, 1, 1)
    if pool:
        n, c, h, wd = out.shape
        out = out.reshape(n, c, h // 2, 2, wd // 2, 2).mean(axis=(3, 5))
    if mask is not None:
        out = out * mask.reshape(1, -1, 1, 1)
    if residual:
        out = out + x
    return out


if __name__ == "__main__":
    key = jax.random.PRNGKey(0)
    k_x, k_w, k_g, k_b, k_m = jax.random.split(key, 5)

    N, Cin, H, W = 2, 8, 16, 16
    Cout, K = 8, 3

    x = jax.random.normal(k_x, (N, Cin, H, W), dtype=jnp.float32)
    w = jax.random.normal(k_w, (Cout, Cin, K, K), dtype=jnp.float32) \
        * np.float32(1.0 / np.sqrt(Cin * K * K))
    gamma = 1.0 + 0.1 * jax.random.normal(k_g, (Cout,), dtype=jnp.float32)
    beta = 0.1 * jax.random.normal(k_b, (Cout,), dtype=jnp.float32)
    mask = (jax.random.uniform(k_m, (Cout,)) > 0.3).astype(jnp.float32)

    configs = [
        dict(act=True, pool=False, residual=True, mask=mask),    # ResNet-style block
        dict(act=False, pool=True, residual=False, mask=None),   # pooled block
    ]
    for cfg in configs:
        out = jax.block_until_ready(conv_block_rn(x, w, gamma, beta, **cfg))
        ref = reference_forward(x, w, gamma, beta, **cfg)
        # bf16 MXU operands / bf16 conv intermediate / bf16 output vs. an f32 reference.
        np.testing.assert_allclose(np.asarray(out), np.asarray(ref), rtol=5e-2, atol=5e-2)

    print("KERNEL_OK")
</pallas_src>

<mosaic_0001>
module attributes {stable_mosaic.version = 11 : i64} {
  func.func @kernel(%arg0: i32, %arg1: i32, %arg2: memref<1x1x18x18x8xbf16, #tpu.memory_space<vmem>>, %arg3: memref<128x128xbf16, #tpu.memory_space<vmem>>, %arg4: memref<1x16x16x128xbf16, #tpu.memory_space<vmem>>, %arg5: memref<1x1x2x128xf32, #tpu.memory_space<vmem>>, %arg6: memref<256x128xbf16, #tpu.memory_space<vmem>>) attributes {dimension_semantics = [#tpu.dimension_semantics<parallel>, #tpu.dimension_semantics<parallel>], iteration_bounds = array<i64: 2, 1>, scalar_prefetch = 0 : i64, scratch_operands = 1 : i64, tpu.core_type = #tpu.core_type<tc>, window_params = [{transform_indices = @transform_0, window_bounds = array<i64: 1, 1, 18, 18, 8>}, {pipeline_mode = #tpu.pipeline_mode<synchronous>, transform_indices = @transform_1, window_bounds = array<i64: 128, 128>}, {transform_indices = @transform_2, window_bounds = array<i64: 1, 16, 16, 128>}, {transform_indices = @transform_3, window_bounds = array<i64: 1, 1, 2, 128>}]} {
    %c0 = arith.constant 0 : index
    %c0_0 = arith.constant 0 : index
    %c0_1 = arith.constant 0 : index
    %c0_2 = arith.constant 0 : index
    %c0_3 = arith.constant 0 : index
    %0 = vector.load %arg2[%c0, %c0_0, %c0_1, %c0_2, %c0_3] : memref<1x1x18x18x8xbf16, #tpu.memory_space<vmem>>, vector<1x1x18x18x8xbf16>
    %1 = vector.shape_cast %0 : vector<1x1x18x18x8xbf16> to vector<18x18x8xbf16>
    %cst = arith.constant 0.000000e+00 : bf16
    %2 = vector.broadcast %cst : bf16 to vector<256x56xbf16>
    %c0_4 = arith.constant 0 : index
    %c72 = arith.constant 72 : index
    %3 = vector.load %arg6[%c0_4, %c72] : memref<256x128xbf16, #tpu.memory_space<vmem>>, vector<256x56xbf16>
    tpu.vector_store %arg6[%c0_4, %c72], %2 {strides = array<i32>} : memref<256x128xbf16, #tpu.memory_space<vmem>>, vector<256x56xbf16>,
    %4 = vector.extract_strided_slice %1 {offsets = [0, 0, 0], sizes = [16, 16, 8], strides = [1, 1, 1]} : vector<18x18x8xbf16> to vector<16x16x8xbf16>
    %5 = vector.shape_cast %4 : vector<16x16x8xbf16> to vector<256x8xbf16>
    %c0_5 = arith.constant 0 : index
    %c0_6 = arith.constant 0 : index
    %6 = vector.load %arg6[%c0_5, %c0_6] : memref<256x128xbf16, #tpu.memory_space<vmem>>, vector<256x8xbf16>
    tpu.vector_store %arg6[%c0_5, %c0_6], %5 {strides = array<i32>} : memref<256x128xbf16, #tpu.memory_space<vmem>>, vector<256x8xbf16>,
    %7 = vector.extract_strided_slice %1 {offsets = [0, 1, 0], sizes = [16, 16, 8], strides = [1, 1, 1]} : vector<18x18x8xbf16> to vector<16x16x8xbf16>
    %8 = vector.shape_cast %7 : vector<16x16x8xbf16> to vector<256x8xbf16>
    %c0_7 = arith.constant 0 : index
    %c8 = arith.constant 8 : index
    %9 = vector.load %arg6[%c0_7, %c8] : memref<256x128xbf16, #tpu.memory_space<vmem>>, vector<256x8xbf16>
    tpu.vector_store %arg6[%c0_7, %c8], %8 {strides = array<i32>} : memref<256x128xbf16, #tpu.memory_space<vmem>>, vector<256x8xbf16>,
    %10 = vector.extract_strided_slice %1 {offsets = [0, 2, 0], sizes = [16, 16, 8], strides = [1, 1, 1]} : vector<18x18x8xbf16> to vector<16x16x8xbf16>
    %11 = vector.shape_cast %10 : vector<16x16x8xbf16> to vector<256x8xbf16>
    %c0_8 = arith.constant 0 : index
    %c16 = arith.constant 16 : index
    %12 = vector.load %arg6[%c0_8, %c16] : memref<256x128xbf16, #tpu.memory_space<vmem>>, vector<256x8xbf16>
    tpu.vector_store %arg6[%c0_8, %c16], %11 {strides = array<i32>} : memref<256x128xbf16, #tpu.memory_space<vmem>>, vector<256x8xbf16>,
    %13 = vector.extract_strided_slice %1 {offsets = [1, 0, 0], sizes = [16, 16, 8], strides = [1, 1, 1]} : vector<18x18x8xbf16> to vector<16x16x8xbf16>
    %14 = vector.shape_cast %13 : vector<16x16x8xbf16> to vector<256x8xbf16>
    %c0_9 = arith.constant 0 : index
    %c24 = arith.constant 24 : index
    %15 = vector.load %arg6[%c0_9, %c24] : memref<256x128xbf16, #tpu.memory_space<vmem>>, vector<256x8xbf16>
    tpu.vector_store %arg6[%c0_9, %c24], %14 {strides = array<i32>} : memref<256x128xbf16, #tpu.memory_space<vmem>>, vector<256x8xbf16>,
    %16 = vector.extract_strided_slice %1 {offsets = [1, 1, 0], sizes = [16, 16, 8], strides = [1, 1, 1]} : vector<18x18x8xbf16> to vector<16x16x8xbf16>
    %17 = vector.shape_cast %16 : vector<16x16x8xbf16> to vector<256x8xbf16>
    %c0_10 = arith.constant 0 : index
    %c32 = arith.constant 32 : index
    %18 = vector.load %arg6[%c0_10, %c32] : memref<256x128xbf16, #tpu.memory_space<vmem>>, vector<256x8xbf16>
    tpu.vector_store %arg6[%c0_10, %c32], %17 {strides = array<i32>} : memref<256x128xbf16, #tpu.memory_space<vmem>>, vector<256x8xbf16>,
    %19 = vector.extract_strided_slice %1 {offsets = [1, 2, 0], sizes = [16, 16, 8], strides = [1, 1, 1]} : vector<18x18x8xbf16> to vector<16x16x8xbf16>
    %20 = vector.shape_cast %19 : vector<16x16x8xbf16> to vector<256x8xbf16>
    %c0_11 = arith.constant 0 : index
    %c40 = arith.constant 40 : index
    %21 = vector.load %arg6[%c0_11, %c40] : memref<256x128xbf16, #tpu.memory_space<vmem>>, vector<256x8xbf16>
    tpu.vector_store %arg6[%c0_11, %c40], %20 {strides = array<i32>} : memref<256x128xbf16, #tpu.memory_space<vmem>>, vector<256x8xbf16>,
    %22 = vector.extract_strided_slice %1 {offsets = [2, 0, 0], sizes = [16, 16, 8], strides = [1, 1, 1]} : vector<18x18x8xbf16> to vector<16x16x8xbf16>
    %23 = vector.shape_cast %22 : vector<16x16x8xbf16> to vector<256x8xbf16>
    %c0_12 = arith.constant 0 : index
    %c48 = arith.constant 48 : index
    %24 = vector.load %arg6[%c0_12, %c48] : memref<256x128xbf16, #tpu.memory_space<vmem>>, vector<256x8xbf16>
    tpu.vector_store %arg6[%c0_12, %c48], %23 {strides = array<i32>} : memref<256x128xbf16, #tpu.memory_space<vmem>>, vector<256x8xbf16>,
    %25 = vector.extract_strided_slice %1 {offsets = [2, 1, 0], sizes = [16, 16, 8], strides = [1, 1, 1]} : vector<18x18x8xbf16> to vector<16x16x8xbf16>
    %26 = vector.shape_cast %25 : vector<16x16x8xbf16> to vector<256x8xbf16>
    %c0_13 = arith.constant 0 : index
    %c56 = arith.constant 56 : index
    %27 = vector.load %arg6[%c0_13, %c56] : memref<256x128xbf16, #tpu.memory_space<vmem>>, vector<256x8xbf16>
    tpu.vector_store %arg6[%c0_13, %c56], %26 {strides = array<i32>} : memref<256x128xbf16, #tpu.memory_space<vmem>>, vector<256x8xbf16>,
    %28 = vector.extract_strided_slice %1 {offsets = [2, 2, 0], sizes = [16, 16, 8], strides = [1, 1, 1]} : vector<18x18x8xbf16> to vector<16x16x8xbf16>
    %29 = vector.shape_cast %28 : vector<16x16x8xbf16> to vector<256x8xbf16>
    %c0_14 = arith.constant 0 : index
    %c64 = arith.constant 64 : index
    %30 = vector.load %arg6[%c0_14, %c64] : memref<256x128xbf16, #tpu.memory_space<vmem>>, vector<256x8xbf16>
    tpu.vector_store %arg6[%c0_14, %c64], %29 {strides = array<i32>} : memref<256x128xbf16, #tpu.memory_space<vmem>>, vector<256x8xbf16>,
    %c0_15 = arith.constant 0 : index
    %c0_16 = arith.constant 0 : index
    %31 = vector.load %arg6[%c0_15, %c0_16] : memref<256x128xbf16, #tpu.memory_space<vmem>>, vector<256x128xbf16>
    %c0_17 = arith.constant 0 : index
    %c0_18 = arith.constant 0 : index
    %32 = vector.load %arg3[%c0_17, %c0_18] : memref<128x128xbf16, #tpu.memory_space<vmem>>, vector<128x128xbf16>
    %cst_19 = arith.constant dense<0.000000e+00> : vector<256x128xf32>
    %33 = tpu.matmul %31, %32, %cst_19 {dimension_numbers = #tpu.dot_dimension_numbers<[1], [0], [0], [1], [0, 0, 1, 1], [], []>} : vector<256x128xbf16>, vector<128x128xbf16>, vector<256x128xf32> -> vector<256x128xf32>
    %cst_20 = arith.constant 0.000000e+00 : f32
    %34 = vector.broadcast %cst_20 : f32 to vector<256x128xf32>
    %35 = arith.maximumf %33, %34 : vector<256x128xf32>
    %36 = arith.truncf %35 : vector<256x128xf32> to vector<256x128xbf16>
    %37 = vector.shape_cast %36 : vector<256x128xbf16> to vector<16x16x128xbf16>
    %c0_21 = arith.constant 0 : index
    %c0_22 = arith.constant 0 : index
    %c0_23 = arith.constant 0 : index
    %c0_24 = arith.constant 0 : index
    %38 = vector.load %arg4[%c0_21, %c0_22, %c0_23, %c0_24] : memref<1x16x16x128xbf16, #tpu.memory_space<vmem>>, vector<1x16x16x128xbf16>
    %39 = vector.shape_cast %38 : vector<1x16x16x128xbf16> to vector<16x16x128xbf16>
    %40 = vector.shape_cast %37 : vector<16x16x128xbf16> to vector<1x16x16x128xbf16>
    tpu.vector_store %arg4[%c0_21, %c0_22, %c0_23, %c0_24], %40 {strides = array<i32>} : memref<1x16x16x128xbf16, #tpu.memory_space<vmem>>, vector<1x16x16x128xbf16>,
    %41 = arith.extf %36 : vector<256x128xbf16> to vector<256x128xf32>
    %cst_25 = arith.constant dense<0.000000e+00> : vector<128xf32>
    %42 = vector.multi_reduction <add>, %41, %cst_25 [0] : vector<256x128xf32> to vector<128xf32>
    %43 = vector.shape_cast %42 : vector<128xf32> to vector<1x128xf32>
    %cst_26 = arith.constant 3.906250e-03 : f32
    %44 = vector.broadcast %cst_26 : f32 to vector<1x128xf32>
    %45 = arith.mulf %43, %44 : vector<1x128xf32>
    %46 = vector.broadcast %45 : vector<1x128xf32> to vector<256x128xf32>
    %47 = arith.subf %41, %46 : vector<256x128xf32>
    %48 = arith.mulf %47, %47 : vector<256x128xf32>
    %cst_27 = arith.constant dense<0.000000e+00> : vector<128xf32>
    %49 = vector.multi_reduction <add>, %48, %cst_27 [0] : vector<256x128xf32> to vector<128xf32>
    %50 = vector.shape_cast %49 : vector<128xf32> to vector<1x128xf32>
    %51 = tpu.concatenate %43, %50 in 0 : vector<1x128xf32>, vector<1x128xf32> -> vector<2x128xf32>
    %c0_28 = arith.constant 0 : index
    %c0_29 = arith.constant 0 : index
    %c0_30 = arith.constant 0 : index
    %c0_31 = arith.constant 0 : index
    %52 = vector.load %arg5[%c0_28, %c0_29, %c0_30, %c0_31] : memref<1x1x2x128xf32, #tpu.memory_space<vmem>>, vector<1x1x2x128xf32>
    %53 = vector.shape_cast %52 : vector<1x1x2x128xf32> to vector<2x128xf32>
    %54 = vector.shape_cast %51 : vector<2x128xf32> to vector<1x1x2x128xf32>
    tpu.vector_store %arg5[%c0_28, %c0_29, %c0_30, %c0_31], %54 {strides = array<i32>} : memref<1x1x2x128xf32, #tpu.memory_space<vmem>>, vector<1x1x2x128xf32>,
    return
  }
  func.func @transform_0(%arg0: i32, %arg1: i32) -> (i32, i32, i32, i32, i32) {
    %c0_i32 = arith.constant 0 : i32
    %c0_i32_0 = arith.constant 0 : i32
    %c0_i32_1 = arith.constant 0 : i32
    %c0_i32_2 = arith.constant 0 : i32
    return %arg0, %arg1, %c0_i32, %c0_i32_0, %c0_i32_1 : i32, i32, i32, i32, i32
  }
  func.func @transform_1(%arg0: i32, %arg1: i32) -> (i32, i32) {
    %c0_i32 = arith.constant 0 : i32
    %c0_i32_0 = arith.constant 0 : i32
    %c0_i32_1 = arith.constant 0 : i32
    return %c0_i32, %c0_i32_0 : i32, i32
  }
  func.func @transform_2(%arg0: i32, %arg1: i32) -> (i32, i32, i32, i32) {
    %c0_i32 = arith.constant 0 : i32
    %c0_i32_0 = arith.constant 0 : i32
    %c0_i32_1 = arith.constant 0 : i32
    return %arg0, %arg1, %c0_i32, %c0_i32_0 : i32, i32, i32, i32
  }
  func.func @transform_3(%arg0: i32, %arg1: i32) -> (i32, i32, i32, i32) {
    %c0_i32 = arith.constant 0 : i32
    %c0_i32_0 = arith.constant 0 : i32
    %c0_i32_1 = arith.constant 0 : i32
    return %arg0, %arg1, %c0_i32, %c0_i32_0 : i32, i32, i32, i32
  }
}

</mosaic_0001>

<bundles_post_ra>
// kernel: tpu_custom_call.1
= control target key start
LH: loop header
LB: loop body
LE: loop exit
PB: predicated region body
PF: predicated region fallthrough
CT: control target
= control target key end

     0   :  { %9 = vsyncpa [#allocation4], 0  ;;  %s5104_s0 = inlined_call_operand.vmem [shape: bf16[2,1,18,18,8], index: 0, kind: input, shape index: {}]   ;;  %s5105_s1 = inlined_call_operand.vmem [shape: bf16[128,128], index: 1, kind: input, shape index: {}]   ;;  %s5106_s2 = inlined_call_operand.hbm [shape: bf16[2,16,16,128], index: 2, kind: output, shape index: {0}]   ;;  %s5107_s3 = inlined_call_operand.hbm [shape: f32[2,1,2,128], index: 3, kind: output, shape index: {1}]  }
   0x1   :  { %11 = vsyncpa [#allocation4 + $0x1], 0 }
   0x2   :  { %12 = vsyncpa [#allocation6], 0 }
   0x3   :  { %14 = vsyncpa [#allocation6 + $0x1], 0  ;;  %s3176_s12 = smov 0   ;;  %s3178_s13 = smov 0  }
   0x4   :  { %s3180_s14 = smov 0   ;;  %s3182_s15 = smov 0  }
   0x5   :  { %s3184_s16 = smov 0   ;;  %s3186_s17 = smov 0  }
   0x6 LB: > { %s2688_s18 = sadd.s32 4294967295, %s3144_s17   ;;  %s2689_s19 = sadd.s32 4294967294, %s3144_s17   ;;  %s3144_s17 = sphi %s3186_s17, %s20_s17   ;;  %s3140_s16 = sphi %s3184_s16, %s5373_s16   ;;  %s3136_s15 = sphi %s3182_s15, %s5372_s15   ;;  %s3132_s14 = sphi %s3180_s14, %s5371_s14   ;;  %s3128_s13 = sphi %s3178_s13, %s5370_s13   ;;  %s3124_s12 = sphi %s3176_s12, %s5369_s12  }
   0x7   : > { %s32_s20 = sadd.s32 1, %s3140_s16  ;;  %s90_s21 = sadd.s32 1, %s3132_s14 }
   0x8   : > { %p34_p0 = scmp.ge.s32.totalorder %s32_s20, 2  ;;  %p100_p1 = scmp.ne.s32.totalorder %s3132_s14, %s3128_s13 }
   0x9   : > { %p101_p2 = scmp.eq.s32.totalorder %s2688_s18, 1  ;;  %p106_p3 = scmp.ne.s32.totalorder %s3128_s13, %s3124_s12 }
   0xa   : > { %s5375_s20 = smov (%p34_p0, %s32_s20), 0  ;;  %p107_p5 = scmp.eq.s32.totalorder %s2689_s19, 1 }
   0xb   : > { %p3216_p4 = por %p101_p2, %p100_p1  ;;  %s85_s23 = ssub.s32 %s3140_s16, %s5375_s20 }
   0xc   : > { %p2692_p6 = scmp.ge.s32.totalorder %s3144_s17, 1  ;;  %p88_p7 = scmp.eq.s32.totalorder %s85_s23, 0 }
   0xd   : > { %p3223_p8 = por %p107_p5, %p106_p3  ;;  %p168_p9 = scmp.lt.s32.totalorder %s3144_s17, 3 }
   0xe   : > { %s3229_s25 = scalar_select %p88_p7, %s3132_s14, %s90_s21  }
   0xf   : > { %p169_p10 = pnand %p2692_p6, %p168_p9 }
  0x11   : > { %172 = sbr.rel (%p169_p10) target bundleno = 1088 (0x440), region = 28 }
  0x16   : > { %p201_p11 = scmp.lt.s32.totalorder %s3136_s15, 1  ;;  %vm332_vm0 = vsmask.f32 3328  ;;  %vm333_vm1 = vsmask.f32 7440  ;;  %s3146_s4 = smov 8  }
  0x17   : > { %vm3272_vm2 = vmor %vm332_vm0, %vm333_vm1  ;;  %vm896_vm3 = vcmask 1042432   ;;  %vm897_vm4 = vcmask 1046532   ;;  %vm266_vm5 = vcmask 1044032   ;;  %vm299_vm7 = vcmask 60416   ;;  %s3148_s5 = smov 16   ;;  %s3149_s6 = smov 24  }
  0x18   : > { %s202_s26 = scalar_select %p201_p11, %s3136_s15, 1  ;;  %vm3659_vm6 = vmor %vm896_vm3, %vm897_vm4  ;;  %vm815_vm8 = vcmask 126016   ;;  %vm1107_vm9 = vcmask 191616   ;;  %vm1238_vm10 = vcmask 257216   ;;  %vm1391_vm11 = vcmask 322816  }
  0x19   : > { %s3150_s7 = smov 32   ;;  %s3151_s8 = smov 48   ;;  %vm1528_vm12 = vcmask 388416   ;;  %vm1659_vm13 = vcmask 454016   ;;  %vm1812_vm14 = vcmask 519616   ;;  %vm1949_vm15 = vcmask 585216  }
  0x1a   : > { %s2961_s27 = smul.u32 216, %s202_s26  ;;  %s3152_s9 = smov 40  }
  0x1b   : > { %s3153_s10 = smov 56   ;;  %s3154_s11 = smov 64  }
  0x1c   : > { %s3236_s30 = scalar_lea.vmem %s5104_s0, %s2961_s27  ;;  %s4620_s26 = sand.u32 1, %s3128_s13  }
  0x1d   : > { %v3239_v0 = vld [vmem:[%s3236_s30 + $0xc] sm:$0xf]  ;;  %v3242_v1 = vld [vmem:[%s3236_s30 + $0x10] sm:$0xf]  ;;  %v3245_v2 = vld [vmem:[%s3236_s30] sm:$0xf] }
  0x1e   : > { %v360_v3 = vshrl.u32 %v3239_v0, 16  ;;  %v363_v4 = vshll.u32 %v3239_v0, 16  ;;  %v369_v5 = vshll.u32 %v3242_v1, 16  ;;  %v3251_v6 = vld [vmem:[%s3236_s30 + $0x4] sm:$0xf]  ;;  %v336_v7 = vshrl.u32 %v3245_v2, 16 }
  0x1f   : > { %v339_v8 = vshll.u32 %v3245_v2, 16  ;;  %v345_v9 = vshll.u32 %v3251_v6, 16  ;;  %v3257_v10 = vld [vmem:[%s3236_s30 + $0x14] sm:$0x1]  ;;  %v373_v11 = vshrl.u32 %v3242_v1, 16  ;;  %v349_v12 = vshrl.u32 %v3251_v6, 16 }
  0x20   : > { %v362_v13 = vrot.slane %v360_v3, 4  ;;  %v365_v14 = vrot.slane %v363_v4, 5  ;;  %v371_v15 = vrot.slane %v369_v5, 5  ;;  %v338_v16 = vrot.slane %v336_v7, 4  ;;  %v3262_v17 = vld [vmem:[%s3236_s30 + $0x8] sm:$0x1] }
  0x21   : > { %v341_v18 = vrot.slane %v339_v8, 5  ;;  %v347_v19 = vrot.slane %v345_v9, 5  ;;  %v375_v20 = vrot.slane %v373_v11, 4  ;;  %v379_v21 = vshll.u32 %v3257_v10, 16  ;;  %v3266_v22 = vld [vmem:[%s3236_s30 + $0x28] sm:$0xf] }
  0x22   : > { %v366_v23 = vor.u32 %v365_v14, %v362_v13  ;;  %v351_v24 = vrot.slane %v349_v12, 4  ;;  %v355_v25 = vshll.u32 %v3262_v17, 16  ;;  %v417_v26 = vshll.u32 %v3266_v22, 16  ;;  %v3278_v31 = vld [vmem:[%s3236_s30 + $0x24] sm:$0xf]  ;;  %s2693_s27 = sshll.u32 %s4620_s26, 7 }
  0x23   : > { %v342_v28 = vor.u32 %v341_v18, %v338_v16  ;;  %v376_v29 = vor.u32 %v375_v20, %v371_v15  ;;  %v421_v30 = vshrl.u32 %v3266_v22, 16  ;;  %v381_v35 = vrot.slane %v379_v21, 5  ;;  %v3281_v37 = vld [vmem:[%s3236_s30 + $0x18] sm:$0xf]  ;;  %v3292_v42 = vld [vmem:[%s3236_s30 + $0x1c] sm:$0xf] }
  0x24   : > { %v367_v32 = vrot.slane %v366_v23, 4  ;;  %v352_v33 = vor.u32 %v351_v24, %v347_v19  ;;  %v357_v36 = vrot.slane %v355_v25, 5  ;;  %v3287_v39 = vrot.slane %v417_v26, 5  ;;  %v3299_v46 = vld [vmem:[%s3236_s30 + $0x2c] sm:$0x1]  ;;  %s4638_s28 = scalar_lea.vmem [#allocation3], %s2693_s27 }
  0x25   : > { %v343_v34 = vrot.slane %v342_v28, 4  ;;  %v408_v40 = vshrl.u32 %v3278_v31, 16  ;;  %v411_v41 = vshll.u32 %v3278_v31, 16  ;;  %v377_v44 = vrot.slane %v376_v29, 4  ;;  %v3306_v53 = vld [vmem:[%s3236_s30 + $0x3c] sm:$0xf] }
  0x26   : > { %v3285_v38 = vsel %vm3272_vm2, %v367_v32, %v371_v15  ;;  %v353_v45 = vrot.slane %v352_v33, 4  ;;  %v423_v47 = vrot.slane %v421_v30, 4  ;;  %v384_v50 = vshrl.u32 %v3281_v37, 16  ;;  %v3310_v56 = vld [vmem:[%s3236_s30 + $0x34] sm:$0xf]  ;;  %s2554_s29 = sshll.u32 %s4638_s28, 4  ;;  %s2555_s29 = int_to_ptr.vmem [resolvable:$true] %s2554_s29 }
  0x27   : > { %5231 = vst [vmem:[#allocation9_spill] sm:$0xff] %v3285_v38  ;;  %723 = vrot.lane.b32.xlu1 %v3285_v38, %s3146_s4  ;;  %v348_v43 = vsel %vm3272_vm2, %v343_v34, %v347_v19  ;;  %v410_v48 = vrot.slane %v408_v40, 4  ;;  %v413_v49 = vrot.slane %v411_v41, 5  ;;  %v387_v51 = vshll.u32 %v3281_v37, 16  ;;  %v3322_v4 = vld [vmem:[%s3236_s30 + $0x20] sm:$0x1] }
  0x28   : > { %719 = vrot.lane.b32.xlu0 %v348_v43, %s3146_s4  ;;  %v393_v52 = vshll.u32 %v3292_v42, 16  ;;  %v427_v54 = vshll.u32 %v3299_v46, 16  ;;  %v386_v55 = vrot.slane %v384_v50, 4  ;;  %v3314_v57 = vsel %vm3272_vm2, %v377_v44, %v381_v35  ;;  %v3331_v16 = vld [vmem:[%s3236_s30 + $0x4c] sm:$0xf]  ;;  %s3054_s21 = scalar_lea.hbm %s5106_s2, 256 }
  0x29   : > { %5232 = vst [vmem:[#allocation10_spill] sm:$0xff] %v3314_v57  ;;  %v358_v58 = vsel %vm3272_vm2, %v353_v45, %v357_v36  ;;  %v424_v59 = vor.u32 %v423_v47, %v3287_v39  ;;  %v389_v60 = vrot.slane %v387_v51, 5  ;;  %v414_v61 = vor.u32 %v413_v49, %v410_v48  ;;  %v3335_v19 = vld [vmem:[%s3236_s30 + $0x40] sm:$0xf]  ;;  %v3342_v24 = vld [vmem:[%s3236_s30 + $0x38] sm:$0x1] }
  0x2a   : > { %v395_v62 = vrot.slane %v393_v52, 5  ;;  %v456_v63 = vshrl.u32 %v3306_v53, 16  ;;  %v459_v3 = vshll.u32 %v3306_v53, 16  ;;  %v441_v7 = vshll.u32 %v3310_v56, 16  ;;  %v3345_v29 = vld [vmem:[%s3236_s30 + $0x30] sm:$0xf] }
  0x2b   : > { %v390_v5 = vor.u32 %v389_v60, %v386_v55  ;;  %v445_v8 = vshrl.u32 %v3310_v56, 16  ;;  %v397_v9 = vshrl.u32 %v3292_v42, 16  ;;  %v429_v11 = vrot.slane %v427_v54, 5  ;;  %v3352_v33 = vld [vmem:[%s3236_s30 + $0x48] sm:$0xf] }
  0x2c   : > { %v425_v12 = vrot.slane %v424_v59, 4  ;;  %v403_v15 = vshll.u32 %v3322_v4, 16  ;;  %v415_v18 = vrot.slane %v414_v61, 4  ;;  %v458_v20 = vrot.slane %v456_v63, 4  ;;  %v3538_v38 = vld [vmem:[%s3236_s30 + $0xa8] sm:$0xf] }
  0x2d   : > { %v391_v13 = vrot.slane %v390_v5, 4  ;;  %v399_v14 = vrot.slane %v397_v9, 4  ;;  %v461_v21 = vrot.slane %v459_v3, 5  ;;  %v443_v25 = vrot.slane %v441_v7, 5  ;;  %v3381_v7 = vld [vmem:[%s3236_s30 + $0x60] sm:$0xf] }
  0x2e   : > { %v447_v26 = vrot.slane %v445_v8, 4  ;;  %v489_v30 = vshll.u32 %v3331_v16, 16  ;;  %v493_v32 = vshrl.u32 %v3331_v16, 16  ;;  %v3356_v34 = vsel %vm3272_vm2, %v425_v12, %v429_v11  ;;  %v3387_v11 = vld [vmem:[%s3236_s30 + $0x58] sm:$0xf]  ;;  %5255 = vst [vmem:[#allocation33_spill] sm:$0xff] %v3538_v38 }
  0x2f   : > { %725 = vrot.lane.b32.xlu1 %v3314_v57, %s3146_s4  ;;  %v3339_v23 = vsel %vm3272_vm2, %v391_v13, %v395_v62  ;;  %v400_v28 = vor.u32 %v399_v14, %v395_v62  ;;  %5234 = vst [vmem:[#allocation12_spill] sm:$0xff] %v3356_v34  ;;  %v465_v35 = vshll.u32 %v3335_v19, 16  ;;  %v405_v40 = vrot.slane %v403_v15, 5  ;;  %v3391_v14 = vld [vmem:[%s3236_s30 + $0x44] sm:$0x1] }
  0x30   : > { %721 = vrot.lane.b32.xlu0 %v358_v58, %s3146_s4  ;;  %5233 = vst [vmem:[#allocation11_spill] sm:$0xff] %v3339_v23  ;;  %727 = vrot.lane.b32.xlu2 %v3339_v23, %s3146_s4  ;;  %v462_v41 = vor.u32 %v461_v21, %v458_v20  ;;  %v451_v43 = vshll.u32 %v3342_v24, 16  ;;  %v432_v44 = vshrl.u32 %v3345_v29, 16  ;;  %v435_v45 = vshll.u32 %v3345_v29, 16 }
  0x31   : > { %v401_v36 = vrot.slane %v400_v28, 4  ;;  %v3365_v47 = vsel %vm3272_vm2, %v415_v18, %v3287_v39  ;;  %v448_v48 = vor.u32 %v447_v26, %v443_v25  ;;  %v480_v49 = vshrl.u32 %v3352_v33, 16  ;;  %v3376_v39 = vld [vmem:[%s3236_s30 + $0x50] sm:$0x1]  ;;  %v3400_v26 = vld [vmem:[%s3236_s30 + $0x54] sm:$0xf] }
  0x32   : > { %5235 = vst [vmem:[#allocation13_spill] sm:$0xff] %v3365_v47  ;;  %v483_v50 = vshll.u32 %v3352_v33, 16  ;;  %v491_v51 = vrot.slane %v489_v30, 5  ;;  %v495_v52 = vrot.slane %v493_v32, 4  ;;  %v434_v54 = vrot.slane %v432_v44, 4 }
  0x33   : > { %v437_v55 = vrot.slane %v435_v45, 5  ;;  %v3373_v58 = vsel %vm3272_vm2, %v401_v36, %v405_v40  ;;  %v463_v59 = vrot.slane %v462_v41, 4  ;;  %v467_v60 = vrot.slane %v465_v35, 5 }
  0x34   : > { %5236 = vst [vmem:[#allocation14_spill] sm:$0xff] %v3373_v58  ;;  %v449_v62 = vrot.slane %v448_v48, 4  ;;  %v453_v63 = vrot.slane %v451_v43, 5  ;;  %v482_v3 = vrot.slane %v480_v49, 4  ;;  %v485_v5 = vrot.slane %v483_v50, 5 }
  0x35   : > { %v438_v61 = vor.u32 %v437_v55, %v434_v54  ;;  %v496_v8 = vor.u32 %v495_v52, %v491_v51  ;;  %v499_v9 = vshll.u32 %v3376_v39, 16  ;;  %v469_v12 = vshrl.u32 %v3335_v19, 16  ;;  %v3415_v43 = vld [vmem:[%s3236_s30 + $0x64] sm:$0xf]  ;;  %v3422_v52 = vld [vmem:[%s3236_s30 + $0x5c] sm:$0x1] }
  0x36   : > { %v3395_v15 = vsel %vm3272_vm2, %v463_v59, %v467_v60  ;;  %v528_v18 = vshrl.u32 %v3381_v7, 16  ;;  %v531_v20 = vshll.u32 %v3381_v7, 16  ;;  %v3404_v28 = vsel %vm3272_vm2, %v449_v62, %v453_v63  ;;  %v3436_v63 = vld [vmem:[%s3236_s30 + $0x6c] sm:$0xf] }
  0x37   : > { %733 = vrot.lane.b32.xlu1 %v3356_v34, %s3146_s4  ;;  %v439_v13 = vrot.slane %v438_v61, 4  ;;  %5237 = vst [vmem:[#allocation15_spill] sm:$0xff] %v3395_v15  ;;  %v471_v21 = vrot.slane %v469_v12, 4  ;;  %v486_v30 = vor.u32 %v485_v5, %v482_v3  ;;  %v513_v32 = vshll.u32 %v3387_v11, 16  ;;  %v3426_v61 = vld [vmem:[%s3236_s30 + $0x70] sm:$0xf] }
  0x38   : > { %731 = vrot.lane.b32.xlu0 %v3365_v47, %s3146_s4  ;;  %729 = vrot.lane.b32.xlu2 %v3373_v58, %s3146_s4  ;;  %5238 = vst [vmem:[#allocation16_spill] sm:$0xff] %v3404_v28  ;;  %v517_v35 = vshrl.u32 %v3387_v11, 16  ;;  %v497_v36 = vrot.slane %v496_v8, 4  ;;  %v501_v40 = vrot.slane %v499_v9, 5  ;;  %v475_v45 = vshll.u32 %v3391_v14, 16 }
  0x39   : > { %v3412_v41 = vsel %vm3272_vm2, %v439_v13, %v443_v25  ;;  %v472_v44 = vor.u32 %v471_v21, %v467_v60  ;;  %v504_v48 = vshrl.u32 %v3400_v26, 16  ;;  %v530_v49 = vrot.slane %v528_v18, 4  ;;  %5240 = vst [vmem:[#allocation18_spill] sm:$0xff] %v3426_v61  ;;  %v3511_v58 = vld [vmem:[%s3236_s30 + $0x90] sm:$0xf] }
  0x3a   : > { %5239 = vst [vmem:[#allocation17_spill] sm:$0xff] %v3412_v41  ;;  %v533_v50 = vrot.slane %v531_v20, 5  ;;  %v507_v54 = vshll.u32 %v3400_v26, 16  ;;  %v487_v55 = vrot.slane %v486_v30, 4  ;;  %v515_v25 = vrot.slane %v513_v32, 5 }
  0x3b   : > { %v519_v59 = vrot.slane %v517_v35, 4  ;;  %v3430_v60 = vsel %vm3272_vm2, %v497_v36, %v501_v40  ;;  %v537_v62 = vshll.u32 %v3415_v43, 16  ;;  %5242 = vst [vmem:[#allocation20_spill] sm:$0xff] %v3436_v63  ;;  %v473_v3 = vrot.slane %v472_v44, 4 }
  0x3c   : > { %5241 = vst [vmem:[#allocation19_spill] sm:$0xff] %v3430_v60  ;;  %v477_v5 = vrot.slane %v475_v45, 5  ;;  %v506_v8 = vrot.slane %v504_v48, 4  ;;  %v509_v9 = vrot.slane %v507_v54, 5  ;;  %v534_v12 = vor.u32 %v533_v50, %v530_v49  ;;  %v3457_v48 = vld [vmem:[%s3236_s30 + $0x74] sm:$0x1] }
  0x3d   : > { %v523_v13 = vshll.u32 %v3422_v52, 16  ;;  %v561_v18 = vshll.u32 %v3426_v61, 16  ;;  %v565_v20 = vshrl.u32 %v3426_v61, 16  ;;  %v3443_v21 = vsel %vm3272_vm2, %v487_v55, %v491_v51  ;;  %5250 = vst [vmem:[#allocation28_spill] sm:$0xff] %v3511_v58 }
  0x3e   : > { %5243 = vst [vmem:[#allocation21_spill] sm:$0xff] %v3443_v21  ;;  %v520_v30 = vor.u32 %v519_v59, %v515_v25  ;;  %v552_v32 = vshrl.u32 %v3436_v63, 16  ;;  %v555_v35 = vshll.u32 %v3436_v63, 16  ;;  %v3451_v36 = vsel %vm3272_vm2, %v473_v3, %v477_v5  ;;  %v3460_v3 = vld [vmem:[%s3236_s30 + $0x84] sm:$0xf] }
  0x3f   : > { %739 = vrot.lane.b32.xlu1 %v3395_v15, %s3146_s4  ;;  %5244 = vst [vmem:[#allocation22_spill] sm:$0xff] %v3451_v36  ;;  %v510_v40 = vor.u32 %v509_v9, %v506_v8  ;;  %v541_v44 = vshrl.u32 %v3415_v43, 16  ;;  %v535_v51 = vrot.slane %v534_v12, 4  ;;  %v539_v45 = vrot.slane %v537_v62, 5  ;;  %v3465_v5 = vld [vmem:[%s3236_s30 + $0x7c] sm:$0xf] }
  0x40   : > { %737 = vrot.lane.b32.xlu0 %v3404_v28, %s3146_s4  ;;  %735 = vrot.lane.b32.xlu2 %v3412_v41, %s3146_s4  ;;  %v563_v49 = vrot.slane %v561_v18, 5  ;;  %v567_v50 = vrot.slane %v565_v20, 4  ;;  %v521_v54 = vrot.slane %v520_v30, 4  ;;  %v525_v55 = vrot.slane %v523_v13, 5  ;;  %v3469_v62 = vld [vmem:[%s3236_s30 + $0x68] sm:$0x1] }
  0x41   : > { %v554_v59 = vrot.slane %v552_v32, 4  ;;  %v571_v8 = vshll.u32 %v3457_v48, 16  ;;  %v511_v9 = vrot.slane %v510_v40, 4  ;;  %v543_v12 = vrot.slane %v541_v44, 4  ;;  %v3478_v32 = vld [vmem:[%s3236_s30 + $0x78] sm:$0xf] }
  0x42   : > { %v3473_v18 = vsel %vm3272_vm2, %v535_v51, %v539_v45  ;;  %v568_v13 = vor.u32 %v567_v50, %v563_v49  ;;  %v600_v20 = vshrl.u32 %v3460_v3, 16  ;;  %v603_v30 = vshll.u32 %v3460_v3, 16 }
  0x43   : > { %5245 = vst [vmem:[#allocation23_spill] sm:$0xff] %v3473_v18  ;;  %v585_v15 = vshll.u32 %v3465_v5, 16  ;;  %v589_v44 = vshrl.u32 %v3465_v5, 16  ;;  %v547_v51 = vshll.u32 %v3469_v62, 16  ;;  %v3491_v50 = vsel %vm3272_vm2, %v511_v9, %v515_v25  ;;  %v3504_v25 = vld [vmem:[%s3236_s30 + $0x80] sm:$0x1] }
  0x44   : > { %5247 = vst [vmem:[#allocation25_spill] sm:$0xff] %v3491_v50  ;;  %v544_v34 = vor.u32 %v543_v12, %v539_v45  ;;  %v605_v23 = vrot.slane %v603_v30, 5 }
  0x45   : > { %5249 = vst [vmem:[#allocation27_spill] sm:$0xff] %v3504_v25  ;;  %v587_v45 = vrot.slane %v585_v15, 5  ;;  %v591_v9 = vrot.slane %v589_v44, 4  ;;  %v595_v44 = vshll.u32 %v3504_v25, 16 }
  0x47   : > { %745 = vrot.lane.b32.xlu1 %v3430_v60, %s3146_s4  ;;  %v557_v60 = vrot.slane %v555_v35, 5  ;;  %v3482_v35 = vsel %vm3272_vm2, %v521_v54, %v525_v55  ;;  %v579_v54 = vshll.u32 %v3478_v32, 16  ;;  %v569_v55 = vrot.slane %v568_v13, 4 }
  0x48   : > { %743 = vrot.lane.b32.xlu0 %v3443_v21, %s3146_s4  ;;  %741 = vrot.lane.b32.xlu2 %v3451_v36, %s3146_s4  ;;  %5246 = vst [vmem:[#allocation24_spill] sm:$0xff] %v3482_v35  ;;  %v3494_v36 = vld [vmem:[%s3236_s30 + $0x94] sm:$0xf]  ;;  %v3501_v21 = vld [vmem:[%s3236_s30 + $0x88] sm:$0xf]  ;;  %v545_v13 = vrot.slane %v544_v34, 4  ;;  %v592_v47 = vor.u32 %v591_v9, %v587_v45 }
  0x49   : > { %v558_v40 = vor.u32 %v557_v60, %v554_v59  ;;  %5248 = vst [vmem:[#allocation26_spill] sm:$0xff] %v3494_v36  ;;  %v576_v60 = vshrl.u32 %v3478_v32, 16  ;;  %v573_v59 = vrot.slane %v571_v8, 5  ;;  %v633_v12 = vshll.u32 %v3494_v36, 16 }
  0x4a   : > { %v637_v28 = vshrl.u32 %v3494_v36, 16  ;;  %v549_v8 = vrot.slane %v547_v51, 5  ;;  %v624_v34 = vshrl.u32 %v3511_v58, 16  ;;  %v627_v51 = vshll.u32 %v3511_v58, 16 }
  0x4b   : > { %v559_v41 = vrot.slane %v558_v40, 4  ;;  %v3515_v30 = vsel %vm3272_vm2, %v569_v55, %v573_v59  ;;  %v609_v40 = vshll.u32 %v3501_v21, 16  ;;  %v597_v9 = vrot.slane %v595_v44, 5 }
  0x4c   : > { %5251 = vst [vmem:[#allocation29_spill] sm:$0xff] %v3515_v30  ;;  %v675_v44 = vshll.u32 %v3538_v38, 16 }
  0x4d   : > { %v611_v59 = vrot.slane %v609_v40, 5  ;;  %v672_v40 = vshrl.u32 %v3538_v38, 16 }
  0x4f   : > { %751 = vrot.lane.b32.xlu1 %v3473_v18, %s3146_s4  ;;  %v602_v18 = vrot.slane %v600_v20, 4  ;;  %v581_v20 = vrot.slane %v579_v54, 5  ;;  %v639_v54 = vrot.slane %v637_v28, 4  ;;  %v593_v28 = vrot.slane %v592_v47, 4 }
  0x50   : > { %749 = vrot.lane.b32.xlu0 %v3482_v35, %s3146_s4  ;;  %747 = vrot.lane.b32.xlu2 %v3491_v50, %s3146_s4  ;;  %v578_v35 = vrot.slane %v576_v60, 4  ;;  %v3521_v50 = vsel %vm3272_vm2, %v559_v41, %v563_v49  ;;  %v635_v60 = vrot.slane %v633_v12, 5  ;;  %v613_v49 = vshrl.u32 %v3501_v21, 16 }
  0x51   : > { %v606_v15 = vor.u32 %v605_v23, %v602_v18  ;;  %5252 = vst [vmem:[#allocation30_spill] sm:$0xff] %v3521_v50  ;;  %v3529_v23 = vsel %vm3272_vm2, %v545_v13, %v549_v8  ;;  %v3532_v18 = vld [vmem:[%s3236_s30 + $0x98] sm:$0x1]  ;;  %v626_v12 = vrot.slane %v624_v34, 4  ;;  %v3544_v8 = vld [vmem:[%s3236_s30 + $0xa0] sm:$0xf] }
  0x52   : > { %5253 = vst [vmem:[#allocation31_spill] sm:$0xff] %v3529_v23  ;;  %v582_v41 = vor.u32 %v581_v20, %v578_v35  ;;  %v640_v13 = vor.u32 %v639_v54, %v635_v60  ;;  %v643_v35 = vshll.u32 %v3532_v18, 16  ;;  %v3556_v34 = vld [vmem:[%s3236_s30 + $0x9c] sm:$0xf] }
  0x53   : > { %5254 = vst [vmem:[#allocation32_spill] sm:$0xff] %v3532_v18  ;;  %v607_v55 = vrot.slane %v606_v15, 4  ;;  %v615_v15 = vrot.slane %v613_v49, 4  ;;  %v661_v49 = vshrl.u32 %v3544_v8, 16  ;;  %v3579_v18 = vld [vmem:[%s3236_s30 + $0xa4] sm:$0x1] }
  0x54   : > { %5256 = vst [vmem:[#allocation34_spill] sm:$0xff] %v3544_v8  ;;  %v583_v20 = vrot.slane %v582_v41, 4  ;;  %v657_v41 = vshll.u32 %v3544_v8, 16 }
  0x55   : > { %v3551_v47 = vsel %vm3272_vm2, %v607_v55, %v611_v59  ;;  %5258 = vst [vmem:[#allocation36_spill] sm:$0xff] %v3556_v34  ;;  %v645_v55 = vrot.slane %v643_v35, 5  ;;  %v677_v35 = vrot.slane %v675_v44, 5  ;;  %v663_v8 = vrot.slane %v661_v49, 4 }
  0x56   : > { %5257 = vst [vmem:[#allocation35_spill] sm:$0xff] %v3551_v47  ;;  %v3569_v25 = vsel %vm3272_vm2, %v583_v20, %v587_v45  ;;  %v659_v38 = vrot.slane %v657_v41, 5  ;;  %v3582_v45 = vld [vmem:[%s3236_s30 + $0xb8] sm:$0xf]  ;;  %v667_v41 = vshll.u32 %v3579_v18, 16 }
  0x57   : > { %757 = vrot.lane.b32.xlu1 %v3515_v30, %s3146_s4  ;;  %v629_v30 = vrot.slane %v627_v51, 5  ;;  %v3560_v51 = vsel %vm3272_vm2, %v593_v28, %v597_v9  ;;  %5260 = vst [vmem:[#allocation38_spill] sm:$0xff] %v3569_v25  ;;  %v3572_v28 = vld [vmem:[%s3236_s30 + $0xac] sm:$0xf]  ;;  %v648_v9 = vshrl.u32 %v3556_v34, 16  ;;  %v705_v49 = vshll.u32 %v3582_v45, 16 }
  0x58   : > { %755 = vrot.lane.b32.xlu0 %v3521_v50, %s3146_s4  ;;  %753 = vrot.lane.b32.xlu2 %v3529_v23, %s3146_s4  ;;  %v3547_v50 = vld [vmem:[%s3236_s30 + $0x8c] sm:$0x1]  ;;  %5259 = vst [vmem:[#allocation37_spill] sm:$0xff] %v3560_v51  ;;  %v641_v23 = vrot.slane %v640_v13, 4  ;;  %v674_v13 = vrot.slane %v672_v40, 4  ;;  %v709_v36 = vshrl.u32 %v3582_v45, 16 }
  0x59   : > { %v630_v54 = vor.u32 %v629_v30, %v626_v12  ;;  %v619_v57 = vshll.u32 %v3547_v50, 16  ;;  %v616_v30 = vor.u32 %v615_v15, %v611_v59  ;;  %v651_v12 = vshll.u32 %v3556_v34, 16  ;;  %5261 = vst [vmem:[#allocation39_spill] sm:$0xff] %v3579_v18  ;;  %v3592_v15 = vld [vmem:[%s3236_s30 + $0xb4] sm:$0xf] }
  0x5a   : > { %5262 = vst [vmem:[#allocation40_spill] sm:$0xff] %v3582_v45  ;;  %v3586_v20 = vsel %vm3272_vm2, %v641_v23, %v645_v55  ;;  %v681_v59 = vshll.u32 %v3572_v28, 16  ;;  %v664_v55 = vor.u32 %v663_v8, %v659_v38  ;;  %v669_v18 = vrot.slane %v667_v41, 5  ;;  %v3613_v45 = vld [vmem:[%s3236_s30 + $0xbc] sm:$0x1] }
  0x5b   : > { %5263 = vst [vmem:[#allocation41_spill] sm:$0xff] %v3586_v20  ;;  %v617_v40 = vrot.slane %v616_v30, 4  ;;  %v621_v44 = vrot.slane %v619_v57, 5  ;;  %v653_v34 = vrot.slane %v651_v12, 5  ;;  %v699_v30 = vshll.u32 %v3592_v15, 16 }
  0x5c   : > { %5264 = vst [vmem:[#allocation42_spill] sm:$0xff] %v3592_v15  ;;  %v685_v12 = vshrl.u32 %v3572_v28, 16  ;;  %v683_v8 = vrot.slane %v681_v59, 5  ;;  %v715_v59 = vshll.u32 %v3613_v45, 16 }
  0x5d   : > { %v3607_v57 = vsel %vm3272_vm2, %v617_v40, %v621_v44 }
  0x5f   : > { %763 = vrot.lane.b32.xlu1 %v3551_v47, %s3146_s4  ;;  %v631_v47 = vrot.slane %v630_v54, 4  ;;  %v678_v54 = vor.u32 %v677_v35, %v674_v13  ;;  %v711_v13 = vrot.slane %v709_v36, 4  ;;  %v665_v35 = vrot.slane %v664_v55, 4 }
  0x60   : > { %761 = vrot.lane.b32.xlu0 %v3560_v51, %s3146_s4  ;;  %759 = vrot.lane.b32.xlu2 %v3569_v25, %s3146_s4  ;;  %v650_v51 = vrot.slane %v648_v9, 4  ;;  %v696_v25 = vshrl.u32 %v3592_v15, 16  ;;  %v701_v15 = vrot.slane %v699_v30, 5 }
  0x61   : > { %v3599_v23 = vsel %vm3272_vm2, %v631_v47, %v635_v60  ;;  %v679_v60 = vrot.slane %v678_v54, 4  ;;  %v707_v47 = vrot.slane %v705_v49, 5  ;;  %v3623_v54 = vld [vmem:[%s3236_s30 + $0xb0] sm:$0x1]  ;;  %v3627_v36 = vsel %vm3272_vm2, %v665_v35, %v669_v18 }
  0x62   : > { %5265 = vst [vmem:[#allocation43_spill] sm:$0xff] %v3599_v23  ;;  %v654_v9 = vor.u32 %v653_v34, %v650_v51  ;;  %v687_v51 = vrot.slane %v685_v12, 4  ;;  %v691_v55 = vshll.u32 %v3623_v54, 16  ;;  %v908_v35 = vrot.slane %v3242_v1, 5 }
  0x63   : > { %v3619_v40 = vsel %vm3272_vm2, %v679_v60, %v683_v8  ;;  %v712_v44 = vor.u32 %v711_v13, %v707_v47  ;;  %5267 = vst [vmem:[#allocation45_spill] sm:$0xff] %v3627_v36  ;;  %v901_v60 = vrot.slane %v3251_v6, 5  ;;  %v2697_v13 = vrot.slane %v3239_v0, 9 }
  0x64   : > { %v655_v34 = vrot.slane %v654_v9, 4  ;;  %5266 = vst [vmem:[#allocation44_spill] sm:$0xff] %v3619_v40  ;;  %v688_v49 = vor.u32 %v687_v51, %v683_v8  ;;  %v717_v9 = vrot.slane %v715_v59, 5  ;;  %v904_v51 = vrot.slane %v3262_v17, 5 }
  0x65   : > { %v713_v30 = vrot.slane %v712_v44, 4  ;;  %v3147_v44 = vmov 0   ;;  %v2696_v59 = vrot.slane %v3245_v2, 9  ;;  %v915_v17 = vrot.slane %v3292_v42, 5 }
  0x66   : > { %v3633_v41 = vsel %vm3272_vm2, %v655_v34, %v659_v38  ;;  %v689_v18 = vrot.slane %v688_v49, 4  ;;  %v903_v34 = vrot.slane %v901_v60, 4  ;;  %271 = vst.msk [vmem:[#allocation2 + $0x10] sm:$0xf] %vm266_vm5, %v3147_v44 }
  0x67   : > { %769 = vrot.lane.b32.xlu1 %v3586_v20, %s3146_s4  ;;  %v698_v20 = vrot.slane %v696_v25, 4  ;;  %5268 = vst [vmem:[#allocation46_spill] sm:$0xff] %v3633_v41 }
  0x68   : > { %767 = vrot.lane.b32.xlu0 %v3599_v23, %s3146_s4  ;;  %765 = vrot.lane.b32.xlu2 %v3607_v57, %s3146_s4  ;;  %304 = vst.msk [vmem:[#allocation2 + $0x10] sm:$0xf] %vm299_vm7, %v3281_v37  ;;  %v905_v49 = vsel %vm3659_vm6, %v903_v34, %v904_v51  ;;  %v929_v34 = vrot.slane %v3310_v56, 5 }
  0x69   : > { %v702_v25 = vor.u32 %v701_v15, %v698_v20  ;;  %v693_v20 = vrot.slane %v691_v55, 5  ;;  %v3642_v15 = vsel %vm3272_vm2, %v713_v30, %v717_v9  ;;  %267 = vst.msk [vmem:[#allocation2] sm:$0xf] %vm266_vm5, %v3147_v44  ;;  %v902_v55 = vsel %vm3659_vm6, %v2696_v59, %v901_v60 }
  0x6a   : > { %5269 = vst [vmem:[#allocation47_spill] sm:$0xff] %v3642_v15  ;;  %v917_v30 = vrot.slane %v915_v17, 4  ;;  %v918_v9 = vrot.slane %v3322_v4, 5  ;;  %v925_v59 = vrot.slane %v3299_v46, 5 }
  0x6b   : > { %v703_v12 = vrot.slane %v702_v25, 4  ;;  %v3653_v8 = vsel %vm3272_vm2, %v689_v18, %v693_v20  ;;  %v3675_v25 = vsel %vm3659_vm6, %v2697_v13, %v908_v35  ;;  %268 = vst.msk [vmem:[#allocation2 + $0x4] sm:$0xf] %vm266_vm5, %v3147_v44  ;;  %v910_v18 = vrot.slane %v908_v35, 4 }
  0x6c   : > { %5273 = vst [vmem:[#allocation49_spill] sm:$0xff] %v3675_v25  ;;  %v911_v20 = vrot.slane %v3257_v10, 5  ;;  %v3707_v4 = vsel %vm3659_vm6, %v917_v30, %v918_v9  ;;  %v922_v13 = vrot.slane %v3266_v22, 5  ;;  %v2700_v35 = vrot.slane %v3345_v29, 9 }
  0x6d   : > { %v3646_v38 = vsel %vm3272_vm2, %v703_v12, %v707_v47  ;;  %v5270_v47 = vmov 0  ;;  %269 = vst.msk [vmem:[#allocation2 + $0x8] sm:$0xf] %vm266_vm5, %v3147_v44  ;;  %v2698_v12 = vrot.slane %v3281_v37, 9  ;;  %v939_v9 = vrot.slane %v3391_v14, 5 }
  0x6e   : > { %v5271_v47 = vsel %vm3659_vm6, 4294967295, %v5270_v47  ;;  %270 = vst.msk [vmem:[#allocation2 + $0xc] sm:$0xf] %vm266_vm5, %v3147_v44  ;;  %v3724_v10 = vsel %vm3659_vm6, %v910_v18, %v911_v20  ;;  %v924_v51 = vrot.slane %v922_v13, 4 }
  0x6f   : > { %775 = vrot.lane.b32.xlu1 %v3619_v40, %s3146_s4  ;;  %5272 = vst [vmem:[#allocation48_spill] sm:$0xff] %v5271_v47  ;;  %v3713_v60 = vsel %vm3659_vm6, %v2698_v12, %v915_v17  ;;  %v3745_v17 = vsel %vm3659_vm6, %v2700_v35, %v929_v34  ;;  %v2701_v12 = vrot.slane %v3306_v53, 9  ;;  %v999_v40 = vrot.slane %v3572_v28, 5 }
  0x70   : > { %773 = vrot.lane.b32.xlu0 %v3627_v36, %s3146_s4  ;;  %771 = vrot.lane.b32.xlu2 %v3633_v41, %s3146_s4  ;;  %272 = vst.msk [vmem:[#allocation2 + $0x14] sm:$0xf] %vm266_vm5, %v3147_v44 }
  0x71   : > { %273 = vst.msk [vmem:[#allocation2 + $0x18] sm:$0xf] %vm266_vm5, %v3147_v44 }
  0x72   : > { %274 = vst.msk [vmem:[#allocation2 + $0x1c] sm:$0xf] %vm266_vm5, %v3147_v44 }
  0x73   : > { %275 = vst.msk [vmem:[#allocation2 + $0x20] sm:$0xf] %vm266_vm5, %v3147_v44 }
  0x74   : > { %276 = vst.msk [vmem:[#allocation2 + $0x24] sm:$0xf] %vm266_vm5, %v3147_v44 }
  0x75   : > { %5274 = vst [vmem:[#allocation50_spill] sm:$0xff] %v3707_v4 }
  0x76   : > { %277 = vst.msk [vmem:[#allocation2 + $0x28] sm:$0xf] %vm266_vm5, %v3147_v44 }
  0x77   : > { %781 = vrot.lane.b32.xlu1 %v3642_v15, %s3146_s4  ;;  %5275 = vst [vmem:[#allocation51_spill] sm:$0xff] %v3713_v60 }
  0x78   : > { %779 = vrot.lane.b32.xlu0 %v3646_v38, %s3146_s4  ;;  %777 = vrot.lane.b32.xlu2 %v3653_v8, %s3146_s4  ;;  %278 = vst.msk [vmem:[#allocation2 + $0x2c] sm:$0xf] %vm266_vm5, %v3147_v44 }
  0x79   : > { %279 = vst.msk [vmem:[#allocation2 + $0x30] sm:$0xf] %vm266_vm5, %v3147_v44 }
  0x7a   : > { %5276 = vst [vmem:[#allocation52_spill] sm:$0xff] %v3724_v10 }
  0x7b   : > { %280 = vst.msk [vmem:[#allocation2 + $0x34] sm:$0xf] %vm266_vm5, %v3147_v44 }
  0x7c   : > { %281 = vst.msk [vmem:[#allocation2 + $0x38] sm:$0xf] %vm266_vm5, %v3147_v44 }
  0x7d   : > { %282 = vst.msk [vmem:[#allocation2 + $0x3c] sm:$0xf] %vm266_vm5, %v3147_v44 }
  0x7e   : > { %283 = vst.msk [vmem:[#allocation2 + $0x40] sm:$0xf] %vm266_vm5, %v3147_v44 }
  0x7f   : > { %1015 = vrot.lane.b32.xlu1 %v3675_v25, %s3148_s5  ;;  %284 = vst.msk [vmem:[#allocation2 + $0x44] sm:$0xf] %vm266_vm5, %v3147_v44 }
  0x80   : > { %1013 = vrot.lane.b32.xlu0 %v905_v49, %s3148_s5  ;;  %1011 = vrot.lane.b32.xlu2 %v902_v55, %s3148_s5  ;;  %5277 = vst [vmem:[#allocation53_spill] sm:$0xff] %v3745_v17  ;;  %v936_v49 = vrot.slane %v3335_v19, 5  ;;  %v3752_v55 = vsel %vm3659_vm6, %v924_v51, %v925_v59  ;;  %v2703_v51 = vrot.slane %v3400_v26, 9  ;;  %v950_v59 = vrot.slane %v3387_v11, 5 }
  0x81   : > { %285 = vst.msk [vmem:[#allocation2 + $0x48] sm:$0xf] %vm266_vm5, %v3147_v44 }
  0x82   : > { %5278 = vst [vmem:[#allocation54_spill] sm:$0xff] %v3752_v55  ;;  %v938_v30 = vrot.slane %v936_v49, 4  ;;  %v3781_v14 = vsel %vm3659_vm6, %v2701_v12, %v936_v49  ;;  %v2699_v49 = vrot.slane %v3278_v31, 9 }
  0x83   : > { %286 = vst.msk [vmem:[#allocation2 + $0x4c] sm:$0xf] %vm266_vm5, %v3147_v44 }
  0x84   : > { %287 = vst.msk [vmem:[#allocation2 + $0x50] sm:$0xf] %vm266_vm5, %v3147_v44  ;;  %v3775_v18 = vsel %vm3659_vm6, %v938_v30, %v939_v9  ;;  %v946_v9 = vrot.slane %v3376_v39, 5  ;;  %v3819_v12 = vsel %vm3659_vm6, %v2699_v49, %v922_v13  ;;  %v957_v39 = vrot.slane %v3415_v43, 5 }
  0x85   : > { %288 = vst.msk [vmem:[#allocation2 + $0x54] sm:$0xf] %vm266_vm5, %v3147_v44  ;;  %v931_v13 = vrot.slane %v929_v34, 4 }
  0x86   : > { %289 = vst.msk [vmem:[#allocation2 + $0x58] sm:$0xf] %vm266_vm5, %v3147_v44 }
  0x87   : > { %1021 = vrot.lane.b32.xlu1 %v3707_v4, %s3148_s5  ;;  %290 = vst.msk [vmem:[#allocation2 + $0x5c] sm:$0xf] %vm266_vm5, %v3147_v44  ;;  %v5299_v4 = vld [vmem:[#allocation32_spill] sm:$0xff] }
  0x88   : > { %1019 = vrot.lane.b32.xlu0 %v3713_v60, %s3148_s5  ;;  %1017 = vrot.lane.b32.xlu2 %v3724_v10, %s3148_s5  ;;  %291 = vst.msk [vmem:[#allocation2 + $0x60] sm:$0xf] %vm266_vm5, %v3147_v44  ;;  %v988_v60 = vrot.slane %v5299_v4, 5 }
  0x89   : > { %5279 = vst [vmem:[#allocation55_spill] sm:$0xff] %v3775_v18 }
  0x8a   : > { %v728_v46 = vpop.permute.xlu2 %727  ;;  %292 = vst.msk [vmem:[#allocation2 + $0x64] sm:$0xf] %vm266_vm5, %v3147_v44 }
  0x8b   : > { %820 = vst.msk [vmem:[#allocation2 + $0x10] sm:$0xf] %vm815_vm8, %v728_v46  ;;  %v943_v46 = vrot.slane %v3331_v16, 5 }
  0x8c   : > { %5280 = vst [vmem:[#allocation56_spill] sm:$0xff] %v3781_v14 }
  0x8d   : > { %293 = vst.msk [vmem:[#allocation2 + $0x68] sm:$0xf] %vm266_vm5, %v3147_v44 }
  0x8e   : > { %294 = vst.msk [vmem:[#allocation2 + $0x6c] sm:$0xf] %vm266_vm5, %v3147_v44 }
  0x8f   : > { %1027 = vrot.lane.b32.xlu1 %v3745_v17, %s3148_s5  ;;  %295 = vst.msk [vmem:[#allocation2 + $0x70] sm:$0xf] %vm266_vm5, %v3147_v44  ;;  %v945_v17 = vrot.slane %v943_v46, 4 }
  0x90   : > { %1025 = vrot.lane.b32.xlu0 %v3752_v55, %s3148_s5  ;;  %296 = vst.msk [vmem:[#allocation2 + $0x74] sm:$0xf] %vm266_vm5, %v3147_v44  ;;  %1023 = vrot.lane.b32.xlu2 %v3819_v12, %s3148_s5  ;;  %v5175_v55 = vrot.slane %v3426_v61, 5 }
  0x91   : > { %297 = vst.msk [vmem:[#allocation2 + $0x78] sm:$0xf] %vm266_vm5, %v3147_v44 }
  0x92   : > { %298 = vst.msk [vmem:[#allocation2 + $0x7c] sm:$0xf] %vm266_vm5, %v3147_v44  ;;  %v3807_v30 = vpop.permute.xlu2 %729  ;;  %v3815_v44 = vsel %vm3659_vm6, %v2703_v51, %v950_v59  ;;  %v960_v51 = vrot.slane %v3469_v62, 5 }
  0x93   : > { %302 = vst.msk [vmem:[#allocation2 + $0x8] sm:$0xf] %vm299_vm7, %v3239_v0 }
  0x94   : > { %300 = vst.msk [vmem:[#allocation2] sm:$0xf] %vm299_vm7, %v3245_v2  ;;  %v3832_v2 = vsel %vm3659_vm6, %v945_v17, %v946_v9  ;;  %v2704_v17 = vrot.slane %v3381_v7, 9 }
  0x95   : > { %5281 = vst [vmem:[#allocation57_spill] sm:$0xff] %v3815_v44 }
  0x96   : > { %5282 = vst [vmem:[#allocation58_spill] sm:$0xff] %v3819_v12 }
  0x97   : > { %1033 = vrot.lane.b32.xlu1 %v3775_v18, %s3148_s5  ;;  %301 = vst.msk [vmem:[#allocation2 + $0x4] sm:$0xf] %vm299_vm7, %v3251_v6  ;;  %v959_v6 = vrot.slane %v957_v39, 4  ;;  %v5296_v18 = vld [vmem:[#allocation34_spill] sm:$0xff] }
  0x98   : > { %1031 = vrot.lane.b32.xlu0 %v3781_v14, %s3148_s5  ;;  %303 = vst.msk [vmem:[#allocation2 + $0xc] sm:$0xf] %vm299_vm7, %v3242_v1 }
  0x99   : > { %v724_v20 = vpop.permute.xlu1 %723  ;;  %5283 = vst [vmem:[#allocation59_spill] sm:$0xff] %v3832_v2  ;;  %v3861_v9 = vsel %vm3659_vm6, %v959_v6, %v960_v51  ;;  %v966_v51 = vrot.slane %v5175_v55, 4  ;;  %v5288_v55 = vrot.slane %v3465_v5, 5 }
  0x9a   : > { %v3799_v35 = vpop.permute.xlu0 %719  ;;  %818 = vst.msk [vmem:[#allocation2 + $0x8] sm:$0xf] %vm815_vm8, %v724_v20  ;;  %v932_v20 = vrot.slane %v3342_v24, 5  ;;  %v3855_v62 = vpop.permute.xlu2 %735 }
  0x9b   : > { %305 = vst.msk [vmem:[#allocation2 + $0x14] sm:$0xf] %vm299_vm7, %v3292_v42 }
  0x9c   : > { %306 = vst.msk [vmem:[#allocation2 + $0x18] sm:$0xf] %vm299_vm7, %v3278_v31  ;;  %v3853_v34 = vsel %vm3659_vm6, %v931_v13, %v932_v20  ;;  %v2702_v13 = vrot.slane %v3352_v33, 9 }
  0x9d   : > { %307 = vst.msk [vmem:[#allocation2 + $0x1c] sm:$0xf] %vm299_vm7, %v3266_v22  ;;  %1029 = vrot.lane.b32.xlu2 %v3853_v34, %s3148_s5 }
  0x9e   : > { %308 = vst.msk [vmem:[#allocation2 + $0x20] sm:$0xf] %vm299_vm7, %v3345_v29  ;;  %v3900_v20 = vsel %vm3659_vm6, %v2702_v13, %v943_v46  ;;  %v953_v13 = vrot.slane %v3422_v52, 5 }
  0x9f   : > { %1039 = vrot.lane.b32.xlu1 %v3815_v44, %s3148_s5  ;;  %5284 = vst [vmem:[#allocation60_spill] sm:$0xff] %v3853_v34  ;;  %v3867_v44 = vsel %vm3659_vm6, %v2704_v17, %v957_v39  ;;  %v2706_v39 = vrot.slane %v3478_v32, 9  ;;  %v967_v17 = vrot.slane %v3457_v48, 5  ;;  %v978_v34 = vrot.slane %v3501_v21, 5 }
  0xa0   : > { %1037 = vrot.lane.b32.xlu0 %v3832_v2, %s3148_s5  ;;  %309 = vst.msk [vmem:[#allocation2 + $0x24] sm:$0xf] %vm299_vm7, %v3310_v56  ;;  %v5294_v2 = vld [vmem:[#allocation36_spill] sm:$0xff] }
  0xa1   : > { %v3842_v49 = vpop.permute.xlu1 %725  ;;  %5285 = vst [vmem:[#allocation61_spill] sm:$0xff] %v3861_v9  ;;  %v3910_v48 = vsel %vm3659_vm6, %v2706_v39, %v5288_v55  ;;  %v3917_v46 = vsel %vm3659_vm6, %v966_v51, %v967_v17  ;;  %v952_v55 = vrot.slane %v950_v59, 4  ;;  %v980_v39 = vrot.slane %v978_v34, 4 }
  0xa2   : > { %v3847_v24 = vpop.permute.xlu0 %721  ;;  %310 = vst.msk [vmem:[#allocation2 + $0x28] sm:$0xf] %vm299_vm7, %v3306_v53  ;;  %v981_v51 = vrot.slane %v3547_v50, 5 }
  0xa3   : > { %5286 = vst [vmem:[#allocation62_spill] sm:$0xff] %v3867_v44  ;;  %v3942_v52 = vsel %vm3659_vm6, %v952_v55, %v953_v13  ;;  %v5297_v55 = vld [vmem:[#allocation33_spill] sm:$0xff]  ;;  %v2705_v13 = vrot.slane %v3436_v63, 9 }
  0xa4   : > { %311 = vst.msk [vmem:[#allocation2 + $0x2c] sm:$0xf] %vm299_vm7, %v3335_v19  ;;  %v3948_v50 = vsel %vm3659_vm6, %v980_v39, %v981_v51  ;;  %v5298_v39 = vld [vmem:[#allocation42_spill] sm:$0xff] }
  0xa5   : > { %312 = vst.msk [vmem:[#allocation2 + $0x30] sm:$0xf] %vm299_vm7, %v3352_v33  ;;  %1035 = vrot.lane.b32.xlu2 %v3900_v20, %s3148_s5 }
  0xa6   : > { %313 = vst.msk [vmem:[#allocation2 + $0x34] sm:$0xf] %vm299_vm7, %v3331_v16 }
  0xa7   : > { %1045 = vrot.lane.b32.xlu1 %v3861_v9, %s3148_s5  ;;  %314 = vst.msk [vmem:[#allocation2 + $0x38] sm:$0xf] %vm299_vm7, %v3400_v26 }
  0xa8   : > { %1043 = vrot.lane.b32.xlu0 %v3867_v44, %s3148_s5  ;;  %315 = vst.msk [vmem:[#allocation2 + $0x3c] sm:$0xf] %vm299_vm7, %v3387_v11  ;;  %v3902_v44 = vpop.permute.xlu2 %741 }
  0xa9   : > { %v3887_v6 = vpop.permute.xlu1 %733  ;;  %316 = vst.msk [vmem:[#allocation2 + $0x40] sm:$0xf] %vm299_vm7, %v3381_v7 }
  0xaa   : > { %v3894_v9 = vpop.permute.xlu0 %731  ;;  %5287 = vst [vmem:[#allocation63_spill] sm:$0xff] %v3900_v20  ;;  %v2707_v20 = vrot.slane %v3460_v3, 9 }
  0xab   : > { %317 = vst.msk [vmem:[#allocation2 + $0x44] sm:$0xf] %vm299_vm7, %v3415_v43 }
  0xac   : > { %5289 = vst [vmem:[#allocation64_spill] sm:$0xff] %v3910_v48  ;;  %v3954_v12 = vsel %vm3659_vm6, %v2707_v20, %v978_v34  ;;  %v2709_v34 = vrot.slane %v5294_v2, 9  ;;  %v992_v20 = vrot.slane %v5296_v18, 5 }
  0xad   : > { %318 = vst.msk [vmem:[#allocation2 + $0x48] sm:$0xf] %vm299_vm7, %v3436_v63  ;;  %1041 = vrot.lane.b32.xlu2 %v3942_v52, %s3148_s5 }
  0xae   : > { %5290 = vst [vmem:[#allocation65_spill] sm:$0xff] %v3917_v46  ;;  %v3989_v4 = vsel %vm3659_vm6, %v2709_v34, %v992_v20 }
  0xaf   : > { %319 = vst.msk [vmem:[#allocation2 + $0x4c] sm:$0xf] %vm299_vm7, %v3426_v61  ;;  %1051 = vrot.lane.b32.xlu1 %v3910_v48, %s3148_s5 }
  0xb0   : > { %320 = vst.msk [vmem:[#allocation2 + $0x50] sm:$0xf] %vm299_vm7, %v3478_v32  ;;  %1049 = vrot.lane.b32.xlu0 %v3917_v46, %s3148_s5  ;;  %v748_v48 = vpop.permute.xlu2 %747  ;;  %v5292_v46 = vld [vmem:[#allocation26_spill] sm:$0xff] }
  0xb1   : > { %321 = vst.msk [vmem:[#allocation2 + $0x54] sm:$0xf] %vm299_vm7, %v3465_v5  ;;  %v740_v17 = vpop.permute.xlu1 %739  ;;  %v985_v14 = vrot.slane %v5292_v46, 5 }
  0xb2   : > { %322 = vst.msk [vmem:[#allocation2 + $0x58] sm:$0xf] %vm299_vm7, %v3460_v3  ;;  %v738_v59 = vpop.permute.xlu0 %737 }
  0xb3   : > { %323 = vst.msk [vmem:[#allocation2 + $0x5c] sm:$0xf] %vm299_vm7, %v3501_v21 }
  0xb4   : > { %324 = vst.msk [vmem:[#allocation2 + $0x60] sm:$0xf] %vm299_vm7, %v3511_v58 }
  0xb5   : > { %5291 = vst [vmem:[#allocation66_spill] sm:$0xff] %v3942_v52  ;;  %v987_v52 = vrot.slane %v985_v14, 4 }
  0xb6   : > { %325 = vst.msk [vmem:[#allocation2 + $0x64] sm:$0xf] %vm299_vm7, %v5292_v46 }
  0xb7   : > { %5293 = vst [vmem:[#allocation26_spill] sm:$0xff] %v3948_v50  ;;  %1057 = vrot.lane.b32.xlu1 %v3948_v50, %s3148_s5  ;;  %v5300_v50 = vld [vmem:[#allocation40_spill] sm:$0xff] }
  0xb8   : > { %326 = vst.msk [vmem:[#allocation2 + $0x68] sm:$0xf] %vm299_vm7, %v5294_v2  ;;  %1055 = vrot.lane.b32.xlu0 %v3954_v12, %s3148_s5  ;;  %v754_v10 = vpop.permute.xlu2 %753 }
  0xb9   : > { %5295 = vst [vmem:[#allocation67_spill] sm:$0xff] %v3954_v12  ;;  %v746_v51 = vpop.permute.xlu1 %745  ;;  %v5301_v12 = vrot.slane %v3426_v61, 5 }
  0xba   : > { %327 = vst.msk [vmem:[#allocation2 + $0x6c] sm:$0xf] %vm299_vm7, %v5296_v18  ;;  %v744_v25 = vpop.permute.xlu0 %743 }
  0xbb   : > { %328 = vst.msk [vmem:[#allocation2 + $0x70] sm:$0xf] %vm299_vm7, %v5297_v55  ;;  %v3983_v15 = vsel %vm3659_vm6, %v2705_v13, %v5301_v12 }
  0xbc   : > { %329 = vst.msk [vmem:[#allocation2 + $0x74] sm:$0xf] %vm299_vm7, %v3572_v28  ;;  %1047 = vrot.lane.b32.xlu2 %v3983_v15, %s3148_s5 }
  0xbd   : > { %330 = vst.msk [vmem:[#allocation2 + $0x78] sm:$0xf] %vm299_vm7, %v5298_v39 }
  0xbe   : > { %331 = vst.msk [vmem:[#allocation2 + $0x7c] sm:$0xf] %vm299_vm7, %v5300_v50 }
  0xbf   : > { %816 = vst.msk [vmem:[#allocation2] sm:$0xf] %vm815_vm8, %v3799_v35  ;;  %v3996_v35 = vsel %vm3659_vm6, %v987_v52, %v988_v60  ;;  %1063 = vrot.lane.b32.xlu1 %v3989_v4, %s3148_s5  ;;  %v1001_v60 = vrot.slane %v999_v40, 4  ;;  %v2710_v52 = vrot.slane %v5297_v55, 9 }
  0xc0   : > { %821 = vst.msk [vmem:[#allocation2 + $0x14] sm:$0xf] %vm815_vm8, %v3807_v30  ;;  %v5303_v30 = vrot.slane %v3465_v5, 5  ;;  %1061 = vrot.lane.b32.xlu0 %v3996_v35, %s3148_s5 }
  0xc1   : > { %819 = vst.msk [vmem:[#allocation2 + $0xc] sm:$0xf] %vm815_vm8, %v3842_v49  ;;  %v5304_v49 = vld [vmem:[#allocation27_spill] sm:$0xff] }
  0xc2   : > { %5302 = vst [vmem:[#allocation33_spill] sm:$0xff] %v3996_v35  ;;  %v973_v12 = vrot.slane %v5303_v30, 4  ;;  %v974_v13 = vrot.slane %v5304_v49, 5  ;;  %v750_v34 = vpop.permute.xlu0 %749  ;;  %v760_v30 = vpop.permute.xlu2 %759 }
  0xc3   : > { %817 = vst.msk [vmem:[#allocation2 + $0x4] sm:$0xf] %vm815_vm8, %v3847_v24  ;;  %v1002_v24 = vrot.slane %v3623_v54, 5 }
  0xc4   : > { %824 = vst.msk [vmem:[#allocation2 + $0x20] sm:$0xf] %vm815_vm8, %v3855_v62  ;;  %v752_v62 = vpop.permute.xlu1 %751 }
  0xc5   : > { %823 = vst.msk [vmem:[#allocation2 + $0x1c] sm:$0xf] %vm815_vm8, %v3887_v6  ;;  %v4022_v6 = vsel %vm3659_vm6, %v973_v12, %v974_v13  ;;  %v4027_v54 = vsel %vm3659_vm6, %v1001_v60, %v1002_v24 }
  0xc6   : > { %822 = vst.msk [vmem:[#allocation2 + $0x18] sm:$0xf] %vm815_vm8, %v3894_v9  ;;  %v4032_v9 = vsel %vm3659_vm6, %v2710_v52, %v999_v40  ;;  %1053 = vrot.lane.b32.xlu2 %v4022_v6, %s3148_s5 }
  0xc7   : > { %827 = vst.msk [vmem:[#allocation2 + $0x2c] sm:$0xf] %vm815_vm8, %v3902_v44  ;;  %v1006_v44 = vrot.slane %v5300_v50, 5  ;;  %1069 = vrot.lane.b32.xlu1 %v4027_v54, %s3148_s5 }
  0xc8   : > { %826 = vst.msk [vmem:[#allocation2 + $0x28] sm:$0xf] %vm815_vm8, %v740_v17  ;;  %v2708_v17 = vrot.slane %v3511_v58, 9  ;;  %1067 = vrot.lane.b32.xlu0 %v4032_v9, %s3148_s5 }
  0xc9   : > { %825 = vst.msk [vmem:[#allocation2 + $0x24] sm:$0xf] %vm815_vm8, %v738_v59  ;;  %v1009_v59 = vrot.slane %v3613_v45, 5  ;;  %v994_v45 = vrot.slane %v992_v20, 4 }
  0xca   : > { %830 = vst.msk [vmem:[#allocation2 + $0x38] sm:$0xf] %vm815_vm8, %v748_v48  ;;  %v1008_v48 = vrot.slane %v1006_v44, 4  ;;  %v766_v12 = vpop.permute.xlu2 %765 }
  0xcb   : > { %829 = vst.msk [vmem:[#allocation2 + $0x34] sm:$0xf] %vm815_vm8, %v746_v51  ;;  %v756_v51 = vpop.permute.xlu0 %755 }
  0xcc   : > { %828 = vst.msk [vmem:[#allocation2 + $0x30] sm:$0xf] %vm815_vm8, %v744_v25  ;;  %v758_v40 = vpop.permute.xlu1 %757  ;;  %v4051_v25 = vsel %vm3659_vm6, %v2708_v17, %v985_v14  ;;  %v5307_v14 = vld [vmem:[#allocation39_spill] sm:$0xff] }
  0xcd   : > { %833 = vst.msk [vmem:[#allocation2 + $0x44] sm:$0xf] %vm815_vm8, %v754_v10  ;;  %v4057_v10 = vsel %vm3659_vm6, %v1008_v48, %v1009_v59  ;;  %v995_v49 = vrot.slane %v5307_v14, 5 }
  0xce   : > { %832 = vst.msk [vmem:[#allocation2 + $0x40] sm:$0xf] %vm815_vm8, %v752_v62  ;;  %1059 = vrot.lane.b32.xlu2 %v4051_v25, %s3148_s5 }
  0xcf   : > { %831 = vst.msk [vmem:[#allocation2 + $0x3c] sm:$0xf] %vm815_vm8, %v750_v34  ;;  %1142 = vrot.lane.b32.xlu1 %v3239_v0, %s3149_s6  ;;  %v4071_v24 = vsel %vm3659_vm6, %v994_v45, %v995_v49  ;;  %v2711_v0 = vrot.slane %v5298_v39, 9 }
  0xd0   : > { %836 = vst.msk [vmem:[#allocation2 + $0x50] sm:$0xf] %vm815_vm8, %v760_v30  ;;  %1073 = vrot.lane.b32.xlu0 %v4057_v10, %s3148_s5 }
  0xd1   : > { %5305 = vst [vmem:[#allocation42_spill] sm:$0xff] %v4051_v25  ;;  %v4085_v34 = vsel %vm3659_vm6, %v2711_v0, %v1006_v44 }
  0xd2   : > { %835 = vst.msk [vmem:[#allocation2 + $0x4c] sm:$0xf] %vm815_vm8, %v758_v40  ;;  %v772_v62 = vpop.permute.xlu2 %771 }
  0xd3   : > { %834 = vst.msk [vmem:[#allocation2 + $0x48] sm:$0xf] %vm815_vm8, %v756_v51  ;;  %v762_v60 = vpop.permute.xlu0 %761 }
  0xd4   : > { %5306 = vst [vmem:[#allocation32_spill] sm:$0xff] %v4057_v10  ;;  %v764_v13 = vpop.permute.xlu1 %763  ;;  %v5328_v10 = vld [vmem:[#allocation29_spill] sm:$0xff] }
  0xd5   : > { %839 = vst.msk [vmem:[#allocation2 + $0x5c] sm:$0xf] %vm815_vm8, %v766_v12 }
  0xd6   : > { %838 = vst.msk [vmem:[#allocation2 + $0x58] sm:$0xf] %vm815_vm8, %v764_v13  ;;  %1065 = vrot.lane.b32.xlu2 %v4071_v24, %s3148_s5 }
  0xd7   : > { %837 = vst.msk [vmem:[#allocation2 + $0x54] sm:$0xf] %vm815_vm8, %v762_v60  ;;  %1148 = vrot.lane.b32.xlu1 %v3292_v42, %s3149_s6 }
  0xd8   : > { %842 = vst.msk [vmem:[#allocation2 + $0x68] sm:$0xf] %vm815_vm8, %v772_v62  ;;  %1146 = vrot.lane.b32.xlu0 %v3281_v37, %s3149_s6 }
  0xd9   : > { %5308 = vst [vmem:[#allocation27_spill] sm:$0xff] %v4085_v34 }
  0xda   : > { %v778_v30 = vpop.permute.xlu2 %777 }
  0xdb   : > { %v768_v52 = vpop.permute.xlu0 %767  ;;  %845 = vst.msk [vmem:[#allocation2 + $0x74] sm:$0xf] %vm815_vm8, %v778_v30 }
  0xdc   : > { %v770_v20 = vpop.permute.xlu1 %769  ;;  %840 = vst.msk [vmem:[#allocation2 + $0x60] sm:$0xf] %vm815_vm8, %v768_v52 }
  0xdd   : > { %841 = vst.msk [vmem:[#allocation2 + $0x64] sm:$0xf] %vm815_vm8, %v770_v20 }
  0xde   : > { %1071 = vrot.lane.b32.xlu2 %v4085_v34, %s3148_s5  ;;  %s2534_s5 = scalar_lea.sflag [#allocation4], %s4620_s26 }
  0xdf   : > { %1154 = vrot.lane.b32.xlu1 %v3345_v29, %s3149_s6 }
  0xe0   : > { %1152 = vrot.lane.b32.xlu0 %v3266_v22, %s3149_s6 }
  0xe2   : > { %v1012_v44 = vpop.permute.xlu2 %1011 }
  0xe3   : > { %v774_v40 = vpop.permute.xlu0 %773  ;;  %1108 = vst.msk [vmem:[#allocation2] sm:$0xf] %vm1107_vm9, %v1012_v44 }
  0xe4   : > { %v776_v17 = vpop.permute.xlu1 %775  ;;  %843 = vst.msk [vmem:[#allocation2 + $0x6c] sm:$0xf] %vm815_vm8, %v774_v40 }
  0xe5   : > { %844 = vst.msk [vmem:[#allocation2 + $0x70] sm:$0xf] %vm815_vm8, %v776_v17 }
  0xe6   : > { %1144 = vrot.lane.b32.xlu2 %v3242_v1, %s3149_s6 }
  0xe7   : > { %1160 = vrot.lane.b32.xlu1 %v3335_v19, %s3149_s6 }
  0xe8   : > { %1158 = vrot.lane.b32.xlu0 %v3306_v53, %s3149_s6 }
  0xea   : > { %v1018_v51 = vpop.permute.xlu2 %1017 }
  0xeb   : > { %v780_v59 = vpop.permute.xlu0 %779  ;;  %1111 = vst.msk [vmem:[#allocation2 + $0xc] sm:$0xf] %vm1107_vm9, %v1018_v51  ;;  %v4160_v51 = vld [vmem:[%s3236_s30 + $0xc0] sm:$0xf] }
  0xec   : > { %v782_v48 = vpop.permute.xlu1 %781  ;;  %846 = vst.msk [vmem:[#allocation2 + $0x78] sm:$0xf] %vm815_vm8, %v780_v59  ;;  %v1275_v34 = vshll.u32 %v4160_v51, 16 }
  0xed   : > { %847 = vst.msk [vmem:[#allocation2 + $0x7c] sm:$0xf] %vm815_vm8, %v782_v48 }
  0xee   : > { %1150 = vrot.lane.b32.xlu2 %v3278_v31, %s3149_s6 }
  0xef   : > { %1166 = vrot.lane.b32.xlu1 %v3400_v26, %s3149_s6 }
  0xf0   : > { %1164 = vrot.lane.b32.xlu0 %v3331_v16, %s3149_s6 }
  0xf2   : > { %v1024_v45 = vpop.permute.xlu2 %1023 }
  0xf3   : > { %v1014_v12 = vpop.permute.xlu0 %1013  ;;  %1114 = vst.msk [vmem:[#allocation2 + $0x18] sm:$0xf] %vm1107_vm9, %v1024_v45 }
  0xf4   : > { %v1016_v1 = vpop.permute.xlu1 %1015  ;;  %1109 = vst.msk [vmem:[#allocation2 + $0x4] sm:$0xf] %vm1107_vm9, %v1014_v12 }
  0xf5   : > { %1110 = vst.msk [vmem:[#allocation2 + $0x8] sm:$0xf] %vm1107_vm9, %v1016_v1 }
  0xf6   : > { %1156 = vrot.lane.b32.xlu2 %v3310_v56, %s3149_s6 }
  0xf7   : > { %1172 = vrot.lane.b32.xlu1 %v3415_v43, %s3149_s6 }
  0xf8   : > { %1170 = vrot.lane.b32.xlu0 %v3381_v7, %s3149_s6 }
  0xfa   : > { %v1030_v13 = vpop.permute.xlu2 %1029 }
  0xfb   : > { %v1020_v49 = vpop.permute.xlu0 %1019  ;;  %1117 = vst.msk [vmem:[#allocation2 + $0x24] sm:$0xf] %vm1107_vm9, %v1030_v13 }
  0xfc   : > { %v1022_v14 = vpop.permute.xlu1 %1021  ;;  %1112 = vst.msk [vmem:[#allocation2 + $0x10] sm:$0xf] %vm1107_vm9, %v1020_v49  ;;  %v5310_v49 = vld [vmem:[#allocation9_spill] sm:$0xff] }
  0xfd   : > { %1113 = vst.msk [vmem:[#allocation2 + $0x14] sm:$0xf] %vm1107_vm9, %v1022_v14  ;;  %v5309_v14 = vld [vmem:[#allocation10_spill] sm:$0xff] }
  0xfe   : > { %1162 = vrot.lane.b32.xlu2 %v3352_v33, %s3149_s6 }
  0xff   : > { %1178 = vrot.lane.b32.xlu1 %v3478_v32, %s3149_s6 }
 0x100   : > { %1176 = vrot.lane.b32.xlu0 %v3426_v61, %s3149_s6 }
 0x102   : > { %v1036_v0 = vpop.permute.xlu2 %1035 }
 0x103   : > { %v1026_v62 = vpop.permute.xlu0 %1025  ;;  %1120 = vst.msk [vmem:[#allocation2 + $0x30] sm:$0xf] %vm1107_vm9, %v1036_v0  ;;  %v5311_v0 = vld [vmem:[#allocation13_spill] sm:$0xff] }
 0x104   : > { %v1028_v60 = vpop.permute.xlu1 %1027  ;;  %1115 = vst.msk [vmem:[#allocation2 + $0x1c] sm:$0xf] %vm1107_vm9, %v1026_v62 }
 0x105   : > { %1116 = vst.msk [vmem:[#allocation2 + $0x20] sm:$0xf] %vm1107_vm9, %v1028_v60 }
 0x106   : > { %1168 = vrot.lane.b32.xlu2 %v3387_v11, %s3149_s6 }
 0x107   : > { %1184 = vrot.lane.b32.xlu1 %v3501_v21, %s3149_s6 }
 0x108   : > { %1182 = vrot.lane.b32.xlu0 %v3460_v3, %s3149_s6 }
 0x10a   : > { %v1042_v30 = vpop.permute.xlu2 %1041 }
 0x10b   : > { %v1032_v52 = vpop.permute.xlu0 %1031  ;;  %1123 = vst.msk [vmem:[#allocation2 + $0x3c] sm:$0xf] %vm1107_vm9, %v1042_v30 }
 0x10c   : > { %v1034_v20 = vpop.permute.xlu1 %1033  ;;  %1118 = vst.msk [vmem:[#allocation2 + $0x28] sm:$0xf] %vm1107_vm9, %v1032_v52 }
 0x10d   : > { %1119 = vst.msk [vmem:[#allocation2 + $0x2c] sm:$0xf] %vm1107_vm9, %v1034_v20  ;;  %v5312_v20 = vld [vmem:[#allocation14_spill] sm:$0xff] }
 0x10e   : > { %1174 = vrot.lane.b32.xlu2 %v3436_v63, %s3149_s6  ;;  %v1272_v63 = vshrl.u32 %v4160_v51, 16 }
 0x10f   : > { %1190 = vrot.lane.b32.xlu1 %v5294_v2, %s3149_s6 }
 0x110   : > { %1188 = vrot.lane.b32.xlu0 %v5292_v46, %s3149_s6  ;;  %v1274_v25 = vrot.slane %v1272_v63, 4 }
 0x113   : > { %v1038_v40 = vpop.permute.xlu0 %1037 }
 0x114   : > { %v1040_v17 = vpop.permute.xlu1 %1039  ;;  %1121 = vst.msk [vmem:[#allocation2 + $0x34] sm:$0xf] %vm1107_vm9, %v1038_v40  ;;  %v4190_v40 = vld [vmem:[%s3236_s30 + $0xc4] sm:$0xf] }
 0x115   : > { %1122 = vst.msk [vmem:[#allocation2 + $0x38] sm:$0xf] %vm1107_vm9, %v1040_v17 }
 0x116   : > { %1180 = vrot.lane.b32.xlu2 %v3465_v5, %s3149_s6  ;;  %v1048_v44 = vpop.permute.xlu2 %1047 }
 0x117   : > { %1196 = vrot.lane.b32.xlu1 %v3572_v28, %s3149_s6  ;;  %1126 = vst.msk [vmem:[#allocation2 + $0x48] sm:$0xf] %vm1107_vm9, %v1048_v44  ;;  %v5313_v44 = vld [vmem:[#allocation16_spill] sm:$0xff] }
 0x118   : > { %1194 = vrot.lane.b32.xlu0 %v5297_v55, %s3149_s6 }
 0x11b   : > { %v1044_v59 = vpop.permute.xlu0 %1043 }
 0x11c   : > { %v1046_v48 = vpop.permute.xlu1 %1045  ;;  %1124 = vst.msk [vmem:[#allocation2 + $0x40] sm:$0xf] %vm1107_vm9, %v1044_v59 }
 0x11d   : > { %1125 = vst.msk [vmem:[#allocation2 + $0x44] sm:$0xf] %vm1107_vm9, %v1046_v48  ;;  %v5314_v48 = vld [vmem:[#allocation17_spill] sm:$0xff] }
 0x11e   : > { %1186 = vrot.lane.b32.xlu2 %v3511_v58, %s3149_s6  ;;  %v1277_v58 = vrot.slane %v1275_v34, 5 }
 0x11f   : > { %1202 = vrot.lane.b32.xlu1 %v4160_v51, %s3149_s6 }
 0x120   : > { %1200 = vrot.lane.b32.xlu0 %v5300_v50, %s3149_s6  ;;  %v1054_v1 = vpop.permute.xlu2 %1053 }
 0x121   : > { %1129 = vst.msk [vmem:[#allocation2 + $0x54] sm:$0xf] %vm1107_vm9, %v1054_v1 }
 0x123   : > { %v1050_v45 = vpop.permute.xlu0 %1049 }
 0x124   : > { %v1052_v12 = vpop.permute.xlu1 %1051  ;;  %1127 = vst.msk [vmem:[#allocation2 + $0x4c] sm:$0xf] %vm1107_vm9, %v1050_v45  ;;  %v5315_v45 = vld [vmem:[#allocation11_spill] sm:$0xff] }
 0x125   : > { %1128 = vst.msk [vmem:[#allocation2 + $0x50] sm:$0xf] %vm1107_vm9, %v1052_v12 }
 0x126   : > { %1192 = vrot.lane.b32.xlu2 %v5296_v18, %s3149_s6  ;;  %v5326_v18 = vld [vmem:[#allocation38_spill] sm:$0xff] }
 0x127   : > { %1297 = vrot.lane.b32.xlu1 %v5309_v14, %s3150_s7  ;;  %v5316_v14 = vld [vmem:[#allocation21_spill] sm:$0xff] }
 0x128   : > { %1295 = vrot.lane.b32.xlu0 %v5310_v49, %s3150_s7  ;;  %v1060_v13 = vpop.permute.xlu2 %1059  ;;  %v5317_v49 = vld [vmem:[#allocation22_spill] sm:$0xff] }
 0x129   : > { %1132 = vst.msk [vmem:[#allocation2 + $0x60] sm:$0xf] %vm1107_vm9, %v1060_v13 }
 0x12b   : > { %v1056_v62 = vpop.permute.xlu0 %1055 }
 0x12c   : > { %v1058_v60 = vpop.permute.xlu1 %1057  ;;  %1130 = vst.msk [vmem:[#allocation2 + $0x58] sm:$0xf] %vm1107_vm9, %v1056_v62 }
 0x12d   : > { %1131 = vst.msk [vmem:[#allocation2 + $0x5c] sm:$0xf] %vm1107_vm9, %v1058_v60 }
 0x12e   : > { %1198 = vrot.lane.b32.xlu2 %v5298_v39, %s3149_s6 }
 0x12f   : > { %1303 = vrot.lane.b32.xlu1 %v5311_v0, %s3150_s7 }
 0x130   : > { %1301 = vrot.lane.b32.xlu0 %v5312_v20, %s3150_s7  ;;  %v1066_v52 = vpop.permute.xlu2 %1065 }
 0x131   : > { %1135 = vst.msk [vmem:[#allocation2 + $0x6c] sm:$0xf] %vm1107_vm9, %v1066_v52  ;;  %v5318_v52 = vld [vmem:[#allocation12_spill] sm:$0xff] }
 0x133   : > { %v1062_v17 = vpop.permute.xlu0 %1061 }
 0x134   : > { %v1064_v30 = vpop.permute.xlu1 %1063  ;;  %1133 = vst.msk [vmem:[#allocation2 + $0x64] sm:$0xf] %vm1107_vm9, %v1062_v17  ;;  %v5320_v17 = vld [vmem:[#allocation25_spill] sm:$0xff] }
 0x135   : > { %1134 = vst.msk [vmem:[#allocation2 + $0x68] sm:$0xf] %vm1107_vm9, %v1064_v30  ;;  %v5319_v30 = vld [vmem:[#allocation24_spill] sm:$0xff] }
 0x136   : > { %1204 = vrot.lane.b32.xlu2 %v4190_v40, %s3149_s6 }
 0x137   : > { %1309 = vrot.lane.b32.xlu1 %v5313_v44, %s3150_s7 }
 0x138   : > { %1307 = vrot.lane.b32.xlu0 %v5314_v48, %s3150_s7  ;;  %v1072_v59 = vpop.permute.xlu2 %1071 }
 0x139   : > { %1138 = vst.msk [vmem:[#allocation2 + $0x78] sm:$0xf] %vm1107_vm9, %v1072_v59 }
 0x13b   : > { %v1068_v12 = vpop.permute.xlu0 %1067 }
 0x13c   : > { %v1070_v1 = vpop.permute.xlu1 %1069  ;;  %1136 = vst.msk [vmem:[#allocation2 + $0x70] sm:$0xf] %vm1107_vm9, %v1068_v12 }
 0x13d   : > { %1137 = vst.msk [vmem:[#allocation2 + $0x74] sm:$0xf] %vm1107_vm9, %v1070_v1 }
 0x13e   : > { %1299 = vrot.lane.b32.xlu2 %v5315_v45, %s3150_s7 }
 0x13f   : > { %1315 = vrot.lane.b32.xlu1 %v5316_v14, %s3150_s7 }
 0x140   : > { %1313 = vrot.lane.b32.xlu0 %v5317_v49, %s3150_s7  ;;  %v1145_v13 = vpop.permute.xlu2 %1144 }
 0x141   : > { %1240 = vst.msk [vmem:[#allocation2 + $0x4] sm:$0xf] %vm1238_vm10, %v1145_v13  ;;  %v5321_v13 = vld [vmem:[#allocation15_spill] sm:$0xff] }
 0x143   : > { %v1074_v62 = vpop.permute.xlu0 %1073 }
 0x144   : > { %v1143_v60 = vpop.permute.xlu1 %1142  ;;  %1139 = vst.msk [vmem:[#allocation2 + $0x7c] sm:$0xf] %vm1107_vm9, %v1074_v62  ;;  %v5323_v62 = vld [vmem:[#allocation31_spill] sm:$0xff] }
 0x145   : > { %1239 = vst.msk [vmem:[#allocation2] sm:$0xf] %vm1238_vm10, %v1143_v60  ;;  %v5322_v60 = vld [vmem:[#allocation30_spill] sm:$0xff] }
 0x146   : > { %1305 = vrot.lane.b32.xlu2 %v5318_v52, %s3150_s7 }
 0x147   : > { %1321 = vrot.lane.b32.xlu1 %v5319_v30, %s3150_s7 }
 0x148   : > { %1319 = vrot.lane.b32.xlu0 %v5320_v17, %s3150_s7  ;;  %v1151_v59 = vpop.permute.xlu2 %1150 }
 0x149   : > { %1243 = vst.msk [vmem:[#allocation2 + $0x10] sm:$0xf] %vm1238_vm10, %v1151_v59 }
 0x14b   : > { %v1147_v12 = vpop.permute.xlu0 %1146 }
 0x14c   : > { %v1149_v1 = vpop.permute.xlu1 %1148  ;;  %1241 = vst.msk [vmem:[#allocation2 + $0x8] sm:$0xf] %vm1238_vm10, %v1147_v12  ;;  %v5325_v12 = vld [vmem:[#allocation37_spill] sm:$0xff] }
 0x14d   : > { %1242 = vst.msk [vmem:[#allocation2 + $0xc] sm:$0xf] %vm1238_vm10, %v1149_v1  ;;  %v5324_v1 = vld [vmem:[#allocation19_spill] sm:$0xff] }
 0x14e   : > { %1311 = vrot.lane.b32.xlu2 %v5321_v13, %s3150_s7 }
 0x14f   : > { %1327 = vrot.lane.b32.xlu1 %v5322_v60, %s3150_s7 }
 0x150   : > { %1325 = vrot.lane.b32.xlu0 %v5323_v62, %s3150_s7  ;;  %v1157_v47 = vpop.permute.xlu2 %1156 }
 0x151   : > { %1246 = vst.msk [vmem:[#allocation2 + $0x1c] sm:$0xf] %vm1238_vm10, %v1157_v47 }
 0x153   : > { %v1153_v59 = vpop.permute.xlu0 %1152 }
 0x154   : > { %v1155_v2 = vpop.permute.xlu1 %1154  ;;  %1244 = vst.msk [vmem:[#allocation2 + $0x14] sm:$0xf] %vm1238_vm10, %v1153_v59 }
 0x155   : > { %1245 = vst.msk [vmem:[#allocation2 + $0x18] sm:$0xf] %vm1238_vm10, %v1155_v2  ;;  %v5327_v2 = vld [vmem:[#allocation23_spill] sm:$0xff] }
 0x156   : > { %1317 = vrot.lane.b32.xlu2 %v5324_v1, %s3150_s7 }
 0x157   : > { %1333 = vrot.lane.b32.xlu1 %v5325_v12, %s3150_s7 }
 0x158   : > { %1331 = vrot.lane.b32.xlu0 %v5326_v18, %s3150_s7  ;;  %v1163_v61 = vpop.permute.xlu2 %1162 }
 0x159   : > { %1249 = vst.msk [vmem:[#allocation2 + $0x28] sm:$0xf] %vm1238_vm10, %v1163_v61 }
 0x15b   : > { %v1159_v47 = vpop.permute.xlu0 %1158 }
 0x15c   : > { %v1161_v60 = vpop.permute.xlu1 %1160  ;;  %1247 = vst.msk [vmem:[#allocation2 + $0x20] sm:$0xf] %vm1238_vm10, %v1159_v47  ;;  %v1285_v47 = vshrl.u32 %v4190_v40, 16 }
 0x15d   : > { %1248 = vst.msk [vmem:[#allocation2 + $0x24] sm:$0xf] %vm1238_vm10, %v1161_v60  ;;  %v1281_v60 = vshll.u32 %v4190_v40, 16  ;;  %v4258_v40 = vld [vmem:[%s3236_s30 + $0xc8] sm:$0x1] }
 0x15e   : > { %1323 = vrot.lane.b32.xlu2 %v5327_v2, %s3150_s7 }
 0x15f   : > { %1339 = vrot.lane.b32.xlu1 %v3599_v23, %s3150_s7  ;;  %v1278_v23 = vor.u32 %v1277_v58, %v1274_v25 }
 0x160   : > { %1337 = vrot.lane.b32.xlu0 %v3607_v57, %s3150_s7  ;;  %v1169_v59 = vpop.permute.xlu2 %1168 }
 0x161   : > { %1252 = vst.msk [vmem:[#allocation2 + $0x34] sm:$0xf] %vm1238_vm10, %v1169_v59  ;;  %v1283_v59 = vrot.slane %v1281_v60, 5 }
 0x163   : > { %v1165_v61 = vpop.permute.xlu0 %1164 }
 0x164   : > { %v1167_v35 = vpop.permute.xlu1 %1166  ;;  %1250 = vst.msk [vmem:[#allocation2 + $0x2c] sm:$0xf] %vm1238_vm10, %v1165_v61  ;;  %v1287_v61 = vrot.slane %v1285_v47, 4  ;;  %v1279_v47 = vrot.slane %v1278_v23, 4 }
 0x165   : > { %1251 = vst.msk [vmem:[#allocation2 + $0x30] sm:$0xf] %vm1238_vm10, %v1167_v35 }
 0x166   : > { %1329 = vrot.lane.b32.xlu2 %v5328_v10, %s3150_s7  ;;  %v1288_v10 = vor.u32 %v1287_v61, %v1283_v59  ;;  %v4278_v25 = vsel %vm3272_vm2, %v1279_v47, %v1283_v59  ;;  %v5331_v59 = vld [vmem:[#allocation44_spill] sm:$0xff] }
 0x167   : > { %1345 = vrot.lane.b32.xlu1 %v3627_v36, %s3150_s7  ;;  %v1291_v36 = vshll.u32 %v4258_v40, 16 }
 0x168   : > { %1343 = vrot.lane.b32.xlu0 %v3633_v41, %s3150_s7  ;;  %v1175_v35 = vpop.permute.xlu2 %1174  ;;  %v5329_v41 = vld [vmem:[#allocation35_spill] sm:$0xff]  ;;  %v1289_v34 = vrot.slane %v1288_v10, 4  ;;  %v5330_v10 = vld [vmem:[#allocation41_spill] sm:$0xff] }
 0x169   : > { %1255 = vst.msk [vmem:[#allocation2 + $0x40] sm:$0xf] %vm1238_vm10, %v1175_v35  ;;  %v1293_v60 = vrot.slane %v1291_v36, 5 }
 0x16b   : > { %v1171_v51 = vpop.permute.xlu0 %1170  ;;  %v4274_v58 = vsel %vm3272_vm2, %v1289_v34, %v1293_v60 }
 0x16c   : > { %v1173_v50 = vpop.permute.xlu1 %1172  ;;  %1253 = vst.msk [vmem:[#allocation2 + $0x38] sm:$0xf] %vm1238_vm10, %v1171_v51  ;;  %v5332_v51 = vld [vmem:[#allocation52_spill] sm:$0xff] }
 0x16d   : > { %1254 = vst.msk [vmem:[#allocation2 + $0x3c] sm:$0xf] %vm1238_vm10, %v1173_v50 }
 0x16e   : > { %1335 = vrot.lane.b32.xlu2 %v5329_v41, %s3150_s7 }
 0x16f   : > { %1351 = vrot.lane.b32.xlu1 %v3646_v38, %s3150_s7 }
 0x170   : > { %1349 = vrot.lane.b32.xlu0 %v3653_v8, %s3150_s7  ;;  %v1181_v63 = vpop.permute.xlu2 %1180 }
 0x171   : > { %1258 = vst.msk [vmem:[#allocation2 + $0x4c] sm:$0xf] %vm1238_vm10, %v1181_v63 }
 0x173   : > { %v1177_v35 = vpop.permute.xlu0 %1176 }
 0x174   : > { %v1179_v50 = vpop.permute.xlu1 %1178  ;;  %1256 = vst.msk [vmem:[#allocation2 + $0x44] sm:$0xf] %vm1238_vm10, %v1177_v35 }
 0x175   : > { %1257 = vst.msk [vmem:[#allocation2 + $0x48] sm:$0xf] %vm1238_vm10, %v1179_v50  ;;  %v5333_v50 = vld [vmem:[#allocation47_spill] sm:$0xff] }
 0x176   : > { %1341 = vrot.lane.b32.xlu2 %v5330_v10, %s3150_s7 }
 0x177   : > { %1357 = vrot.lane.b32.xlu1 %v4274_v58, %s3150_s7 }
 0x178   : > { %1355 = vrot.lane.b32.xlu0 %v4278_v25, %s3150_s7  ;;  %v1187_v23 = vpop.permute.xlu2 %1186 }
 0x179   : > { %1261 = vst.msk [vmem:[#allocation2 + $0x58] sm:$0xf] %vm1238_vm10, %v1187_v23  ;;  %v5334_v23 = vld [vmem:[#allocation49_spill] sm:$0xff] }
 0x17b   : > { %v1183_v61 = vpop.permute.xlu0 %1182 }
 0x17c   : > { %v1185_v36 = vpop.permute.xlu1 %1184  ;;  %1259 = vst.msk [vmem:[#allocation2 + $0x50] sm:$0xf] %vm1238_vm10, %v1183_v61 }
 0x17d   : > { %1260 = vst.msk [vmem:[#allocation2 + $0x54] sm:$0xf] %vm1238_vm10, %v1185_v36  ;;  %v5335_v36 = vld [vmem:[#allocation51_spill] sm:$0xff] }
 0x17e   : > { %1347 = vrot.lane.b32.xlu2 %v5331_v59, %s3150_s7 }
 0x17f   : > { %1563 = vrot.lane.b32.xlu1 %v3281_v37, %s3151_s8 }
 0x180   : > { %1434 = vrot.lane.b32.xlu0 %v5332_v51, %s3152_s9  ;;  %v1193_v63 = vpop.permute.xlu2 %1192 }
 0x181   : > { %1264 = vst.msk [vmem:[#allocation2 + $0x64] sm:$0xf] %vm1238_vm10, %v1193_v63  ;;  %v5337_v63 = vld [vmem:[#allocation55_spill] sm:$0xff] }
 0x183   : > { %v1189_v60 = vpop.permute.xlu0 %1188 }
 0x184   : > { %v1191_v34 = vpop.permute.xlu1 %1190  ;;  %1262 = vst.msk [vmem:[#allocation2 + $0x5c] sm:$0xf] %vm1238_vm10, %v1189_v60 }
 0x185   : > { %1263 = vst.msk [vmem:[#allocation2 + $0x60] sm:$0xf] %vm1238_vm10, %v1191_v34  ;;  %v5338_v34 = vld [vmem:[#allocation56_spill] sm:$0xff] }
 0x186   : > { %1353 = vrot.lane.b32.xlu2 %v5333_v50, %s3150_s7 }
 0x187   : > { %1718 = vrot.lane.b32.xlu1 %v5312_v20, %s3153_s10  ;;  %v5336_v20 = vld [vmem:[#allocation50_spill] sm:$0xff] }
 0x188   : > { %1716 = vrot.lane.b32.xlu0 %v5315_v45, %s3153_s10  ;;  %v1199_v37 = vpop.permute.xlu2 %1198 }
 0x189   : > { %1267 = vst.msk [vmem:[#allocation2 + $0x70] sm:$0xf] %vm1238_vm10, %v1199_v37 }
 0x18b   : > { %v1195_v35 = vpop.permute.xlu0 %1194 }
 0x18c   : > { %v1197_v47 = vpop.permute.xlu1 %1196  ;;  %1265 = vst.msk [vmem:[#allocation2 + $0x68] sm:$0xf] %vm1238_vm10, %v1195_v35 }
 0x18d   : > { %1266 = vst.msk [vmem:[#allocation2 + $0x6c] sm:$0xf] %vm1238_vm10, %v1197_v47 }
 0x18e   : > { %1432 = vrot.lane.b32.xlu2 %v5334_v23, %s3152_s9 }
 0x18f   : > { %1436 = vrot.lane.b32.xlu1 %v5335_v36, %s3152_s9 }
 0x190   : > { %1855 = vrot.lane.b32.xlu0 %v5336_v20, %s3154_s11  ;;  %v1205_v45 = vpop.permute.xlu2 %1204 }
 0x191   : > { %1270 = vst.msk [vmem:[#allocation2 + $0x7c] sm:$0xf] %vm1238_vm10, %v1205_v45 }
 0x193   : > { %v1201_v51 = vpop.permute.xlu0 %1200 }
 0x194   : > { %v1203_v61 = vpop.permute.xlu1 %1202  ;;  %1268 = vst.msk [vmem:[#allocation2 + $0x74] sm:$0xf] %vm1238_vm10, %v1201_v51 }
 0x195   : > { %1269 = vst.msk [vmem:[#allocation2 + $0x78] sm:$0xf] %vm1238_vm10, %v1203_v61  ;;  %v5341_v61 = vld [vmem:[#allocation63_spill] sm:$0xff] }
 0x196   : > { %1565 = vrot.lane.b32.xlu2 %v3292_v42, %s3151_s8 }
 0x197   : > { %1450 = vrot.lane.b32.xlu1 %v5337_v63, %s3152_s9 }
 0x198   : > { %1448 = vrot.lane.b32.xlu0 %v5338_v34, %s3152_s9  ;;  %v1300_v60 = vpop.permute.xlu2 %1299 }
 0x199   : > { %1394 = vst.msk [vmem:[#allocation2 + $0x8] sm:$0xf] %vm1391_vm11, %v1300_v60 }
 0x19b   : > { %v1296_v47 = vpop.permute.xlu0 %1295 }
 0x19c   : > { %v1298_v37 = vpop.permute.xlu1 %1297  ;;  %1392 = vst.msk [vmem:[#allocation2] sm:$0xf] %vm1391_vm11, %v1296_v47 }
 0x19d   : > { %1393 = vst.msk [vmem:[#allocation2 + $0x4] sm:$0xf] %vm1391_vm11, %v1298_v37 }
 0x19e   : > { %1853 = vrot.lane.b32.xlu2 %v5335_v36, %s3154_s11 }
 0x19f   : > { %1579 = vrot.lane.b32.xlu1 %v3352_v33, %s3151_s8 }
 0x1a0   : > { %1569 = vrot.lane.b32.xlu0 %v3266_v22, %s3151_s8  ;;  %v1306_v42 = vpop.permute.xlu2 %1305 }
 0x1a1   : > { %1397 = vst.msk [vmem:[#allocation2 + $0x14] sm:$0xf] %vm1391_vm11, %v1306_v42 }
 0x1a3   : > { %v1302_v23 = vpop.permute.xlu0 %1301 }
 0x1a4   : > { %v1304_v35 = vpop.permute.xlu1 %1303  ;;  %1395 = vst.msk [vmem:[#allocation2 + $0xc] sm:$0xf] %vm1391_vm11, %v1302_v23 }
 0x1a5   : > { %1396 = vst.msk [vmem:[#allocation2 + $0x10] sm:$0xf] %vm1391_vm11, %v1304_v35  ;;  %v5343_v35 = vld [vmem:[#allocation54_spill] sm:$0xff] }
 0x1a6   : > { %1438 = vrot.lane.b32.xlu2 %v5336_v20, %s3152_s9  ;;  %v5339_v20 = vld [vmem:[#allocation58_spill] sm:$0xff] }
 0x1a7   : > { %1722 = vrot.lane.b32.xlu1 %v5318_v52, %s3153_s10 }
 0x1a8   : > { %1720 = vrot.lane.b32.xlu0 %v5311_v0, %s3153_s10  ;;  %v1312_v33 = vpop.permute.xlu2 %1311 }
 0x1a9   : > { %1400 = vst.msk [vmem:[#allocation2 + $0x20] sm:$0xf] %vm1391_vm11, %v1312_v33  ;;  %v2840_v33 = vld [vmem:[%s5105_s1 + $0x38] sm:$0xff] }
 0x1aa   : > { %2174 = vmatpush.bf16.msra.mxu0 %v2840_v33  ;;  %2937 = vmatpush.bf16.msra.mxu1 %v2840_v33 }
 0x1ab   : > { %v1308_v36 = vpop.permute.xlu0 %1307  ;;  %2938 = vmatpush.bf16.msra.mxu2 %v2840_v33  ;;  %2939 = vmatpush.bf16.msra.mxu3 %v2840_v33 }
 0x1ac   : > { %v1310_v22 = vpop.permute.xlu1 %1309  ;;  %1398 = vst.msk [vmem:[#allocation2 + $0x18] sm:$0xf] %vm1391_vm11, %v1308_v36 }
 0x1ad   : > { %1399 = vst.msk [vmem:[#allocation2 + $0x1c] sm:$0xf] %vm1391_vm11, %v1310_v22 }
 0x1ae   : > { %1567 = vrot.lane.b32.xlu2 %v3278_v31, %s3151_s8  ;;  %v5340_v31 = vld [vmem:[#allocation59_spill] sm:$0xff] }
 0x1af   : > { %1857 = vrot.lane.b32.xlu1 %v5339_v20, %s3154_s11 }
 0x1b0   : > { %1734 = vrot.lane.b32.xlu0 %v5324_v1, %s3153_s10  ;;  %v1318_v52 = vpop.permute.xlu2 %1317 }
 0x1b1   : > { %1403 = vst.msk [vmem:[#allocation2 + $0x2c] sm:$0xf] %vm1391_vm11, %v1318_v52 }
 0x1b3   : > { %v1314_v45 = vpop.permute.xlu0 %1313 }
 0x1b4   : > { %v1316_v0 = vpop.permute.xlu1 %1315  ;;  %1401 = vst.msk [vmem:[#allocation2 + $0x24] sm:$0xf] %vm1391_vm11, %v1314_v45 }
 0x1b5   : > { %1402 = vst.msk [vmem:[#allocation2 + $0x28] sm:$0xf] %vm1391_vm11, %v1316_v0  ;;  %v2837_v0 = vld [vmem:[%s5105_s1 + $0x20] sm:$0xff] }
 0x1b6   : > { %1581 = vrot.lane.b32.xlu2 %v3331_v16, %s3151_s8  ;;  %v5342_v16 = vld [vmem:[#allocation65_spill] sm:$0xff] }
 0x1b7   : > { %1871 = vrot.lane.b32.xlu1 %v5340_v31, %s3154_s11 }
 0x1b8   : > { %1869 = vrot.lane.b32.xlu0 %v5341_v61, %s3154_s11  ;;  %v1324_v51 = vpop.permute.xlu2 %1323 }
 0x1b9   : > { %1406 = vst.msk [vmem:[#allocation2 + $0x38] sm:$0xf] %vm1391_vm11, %v1324_v51 }
 0x1bb   : > { %v1320_v60 = vpop.permute.xlu0 %1319 }
 0x1bc   : > { %v1322_v1 = vpop.permute.xlu1 %1321  ;;  %1404 = vst.msk [vmem:[#allocation2 + $0x30] sm:$0xf] %vm1391_vm11, %v1320_v60 }
 0x1bd   : > { %1405 = vst.msk [vmem:[#allocation2 + $0x34] sm:$0xf] %vm1391_vm11, %v1322_v1  ;;  %v2835_v1 = vld [vmem:[%s5105_s1 + $0x10] sm:$0xff] }
 0x1be   : > { %1732 = vrot.lane.b32.xlu2 %v5316_v14, %s3153_s10 }
 0x1bf   : > { %1595 = vrot.lane.b32.xlu1 %v3478_v32, %s3151_s8 }
 0x1c0   : > { %1466 = vrot.lane.b32.xlu0 %v5342_v16, %s3152_s9  ;;  %v1330_v37 = vpop.permute.xlu2 %1329 }
 0x1c1   : > { %1409 = vst.msk [vmem:[#allocation2 + $0x44] sm:$0xf] %vm1391_vm11, %v1330_v37 }
 0x1c3   : > { %v1326_v42 = vpop.permute.xlu0 %1325 }
 0x1c4   : > { %v1328_v47 = vpop.permute.xlu1 %1327  ;;  %1407 = vst.msk [vmem:[#allocation2 + $0x3c] sm:$0xf] %vm1391_vm11, %v1326_v42 }
 0x1c5   : > { %1408 = vst.msk [vmem:[#allocation2 + $0x40] sm:$0xf] %vm1391_vm11, %v1328_v47  ;;  %v2833_v47 = vld [vmem:[%s5105_s1] sm:$0xff] }
 0x1c6   : > { %1859 = vrot.lane.b32.xlu2 %v5343_v35, %s3154_s11 }
 0x1c7   : > { %1750 = vrot.lane.b32.xlu1 %v5325_v12, %s3153_s10  ;;  %v2839_v12 = vld [vmem:[%s5105_s1 + $0x30] sm:$0xff] }
 0x1c8   : > { %1748 = vrot.lane.b32.xlu0 %v5326_v18, %s3153_s10  ;;  %v1336_v32 = vpop.permute.xlu2 %1335  ;;  %2175 = vmatpush.bf16.msra.mxu0 %v2839_v12 }
 0x1c9   : > { %1412 = vst.msk [vmem:[#allocation2 + $0x50] sm:$0xf] %vm1391_vm11, %v1336_v32  ;;  %2940 = vmatpush.bf16.msra.mxu1 %v2839_v12  ;;  %2941 = vmatpush.bf16.msra.mxu2 %v2839_v12 }
 0x1ca   : > { %2942 = vmatpush.bf16.msra.mxu3 %v2839_v12 }
 0x1cb   : > { %v1332_v23 = vpop.permute.xlu0 %1331 }
 0x1cc   : > { %v1334_v14 = vpop.permute.xlu1 %1333  ;;  %1410 = vst.msk [vmem:[#allocation2 + $0x48] sm:$0xf] %vm1391_vm11, %v1332_v23  ;;  %v5347_v23 = vld [vmem:[#allocation57_spill] sm:$0xff] }
 0x1cd   : > { %1411 = vst.msk [vmem:[#allocation2 + $0x4c] sm:$0xf] %vm1391_vm11, %v1334_v14 }
 0x1ce   : > { %1464 = vrot.lane.b32.xlu2 %v3983_v15, %s3152_s9 }
 0x1cf   : > { %1440 = vrot.lane.b32.xlu1 %v5339_v20, %s3152_s9  ;;  %v2838_v20 = vld [vmem:[%s5105_s1 + $0x28] sm:$0xff] }
 0x1d0   : > { %1887 = vrot.lane.b32.xlu0 %v4022_v6, %s3154_s11  ;;  %v1342_v18 = vpop.permute.xlu2 %1341  ;;  %2176 = vmatpush.bf16.msra.mxu0 %v2838_v20 }
 0x1d1   : > { %1415 = vst.msk [vmem:[#allocation2 + $0x5c] sm:$0xf] %vm1391_vm11, %v1342_v18  ;;  %2943 = vmatpush.bf16.msra.mxu1 %v2838_v20  ;;  %2944 = vmatpush.bf16.msra.mxu2 %v2838_v20 }
 0x1d2   : > { %2945 = vmatpush.bf16.msra.mxu3 %v2838_v20 }
 0x1d3   : > { %v1338_v36 = vpop.permute.xlu0 %1337 }
 0x1d4   : > { %v1340_v22 = vpop.permute.xlu1 %1339  ;;  %1413 = vst.msk [vmem:[#allocation2 + $0x54] sm:$0xf] %vm1391_vm11, %v1338_v36  ;;  %2177 = vmatpush.bf16.msra.mxu0 %v2837_v0  ;;  %v5348_v36 = vld [vmem:[#allocation60_spill] sm:$0xff] }
 0x1d5   : > { %1414 = vst.msk [vmem:[#allocation2 + $0x58] sm:$0xf] %vm1391_vm11, %v1340_v22  ;;  %2946 = vmatpush.bf16.msra.mxu1 %v2837_v0  ;;  %2947 = vmatpush.bf16.msra.mxu2 %v2837_v0 }
 0x1d6   : > { %1597 = vrot.lane.b32.xlu2 %v3465_v5, %s3151_s8  ;;  %2948 = vmatpush.bf16.msra.mxu3 %v2837_v0 }
 0x1d7   : > { %1454 = vrot.lane.b32.xlu1 %v5340_v31, %s3152_s9  ;;  %v2836_v31 = vld [vmem:[%s5105_s1 + $0x18] sm:$0xff] }
 0x1d8   : > { %1452 = vrot.lane.b32.xlu0 %v5341_v61, %s3152_s9  ;;  %v1348_v52 = vpop.permute.xlu2 %1347  ;;  %v5344_v61 = vld [vmem:[#allocation64_spill] sm:$0xff]  ;;  %2178 = vmatpush.bf16.msra.mxu0 %v2836_v31 }
 0x1d9   : > { %1418 = vst.msk [vmem:[#allocation2 + $0x68] sm:$0xf] %vm1391_vm11, %v1348_v52  ;;  %2949 = vmatpush.bf16.msra.mxu1 %v2836_v31  ;;  %2950 = vmatpush.bf16.msra.mxu2 %v2836_v31 }
 0x1da   : > { %2951 = vmatpush.bf16.msra.mxu3 %v2836_v31 }
 0x1db   : > { %v1344_v5 = vpop.permute.xlu0 %1343 }
 0x1dc   : > { %v1346_v45 = vpop.permute.xlu1 %1345  ;;  %1416 = vst.msk [vmem:[#allocation2 + $0x60] sm:$0xf] %vm1391_vm11, %v1344_v5  ;;  %2179 = vmatpush.bf16.msra.mxu0 %v2835_v1 }
 0x1dd   : > { %1417 = vst.msk [vmem:[#allocation2 + $0x64] sm:$0xf] %vm1391_vm11, %v1346_v45  ;;  %2952 = vmatpush.bf16.msra.mxu1 %v2835_v1  ;;  %2953 = vmatpush.bf16.msra.mxu2 %v2835_v1 }
 0x1de   : > { %1885 = vrot.lane.b32.xlu2 %v5344_v61, %s3154_s11  ;;  %2954 = vmatpush.bf16.msra.mxu3 %v2835_v1 }
 0x1df   : > { %1583 = vrot.lane.b32.xlu1 %v3400_v26, %s3151_s8 }
 0x1e0   : > { %1573 = vrot.lane.b32.xlu0 %v3310_v56, %s3151_s8  ;;  %v1354_v51 = vpop.permute.xlu2 %1353  ;;  %v2834_v56 = vld [vmem:[%s5105_s1 + $0x8] sm:$0xff] }
 0x1e1   : > { %1421 = vst.msk [vmem:[#allocation2 + $0x74] sm:$0xf] %vm1391_vm11, %v1354_v51  ;;  %2180 = vmatpush.bf16.msra.mxu0 %v2834_v56  ;;  %2955 = vmatpush.bf16.msra.mxu1 %v2834_v56 }
 0x1e2   : > { %2956 = vmatpush.bf16.msra.mxu2 %v2834_v56  ;;  %2957 = vmatpush.bf16.msra.mxu3 %v2834_v56 }
 0x1e3   : > { %v1350_v37 = vpop.permute.xlu0 %1349 }
 0x1e4   : > { %v1352_v60 = vpop.permute.xlu1 %1351  ;;  %1419 = vst.msk [vmem:[#allocation2 + $0x6c] sm:$0xf] %vm1391_vm11, %v1350_v37 }
 0x1e5   : > { %1420 = vst.msk [vmem:[#allocation2 + $0x70] sm:$0xf] %vm1391_vm11, %v1352_v60  ;;  %2181 = vmatpush.bf16.msra.mxu0 %v2833_v47  ;;  %2958 = vmatpush.bf16.msra.mxu1 %v2833_v47  ;;  %v5350_v60 = vld [vmem:[#allocation67_spill] sm:$0xff] }
 0x1e6   : > { %1442 = vrot.lane.b32.xlu2 %v5343_v35, %s3152_s9  ;;  %2959 = vmatpush.bf16.msra.mxu2 %v2833_v47 }
 0x1e7   : > { %1726 = vrot.lane.b32.xlu1 %v5313_v44, %s3153_s10  ;;  %2960 = vmatpush.bf16.msra.mxu3 %v2833_v47  ;;  %v5345_v44 = vld [vmem:[#allocation53_spill] sm:$0xff] }
 0x1e8   : > { %1724 = vrot.lane.b32.xlu0 %v5314_v48, %s3153_s10  ;;  %v1433_v26 = vpop.permute.xlu2 %1432 }
 0x1e9   : > { %1529 = vst.msk [vmem:[#allocation2] sm:$0xf] %vm1528_vm12, %v1433_v26 }
 0x1eb   : > { %v1356_v35 = vpop.permute.xlu0 %1355 }
 0x1ec   : > { %v1358_v42 = vpop.permute.xlu1 %1357  ;;  %1422 = vst.msk [vmem:[#allocation2 + $0x78] sm:$0xf] %vm1391_vm11, %v1356_v35 }
 0x1ed   : > { %1423 = vst.msk [vmem:[#allocation2 + $0x7c] sm:$0xf] %vm1391_vm11, %v1358_v42 }
 0x1ee   : > { %1571 = vrot.lane.b32.xlu2 %v3345_v29, %s3151_s8  ;;  %v5346_v29 = vld [vmem:[#allocation66_spill] sm:$0xff] }
 0x1ef   : > { %1861 = vrot.lane.b32.xlu1 %v5345_v44, %s3154_s11 }
 0x1f0   : > { %1738 = vrot.lane.b32.xlu0 %v5319_v30, %s3153_s10  ;;  %v1566_v48 = vpop.permute.xlu2 %1565 }
 0x1f3   : > { %v1435_v14 = vpop.permute.xlu0 %1434 }
 0x1f4   : > { %v1564_v32 = vpop.permute.xlu1 %1563  ;;  %1530 = vst.msk [vmem:[#allocation2 + $0x4] sm:$0xf] %vm1528_vm12, %v1435_v14 }
 0x1f5   : > { %1660 = vst.msk [vmem:[#allocation2] sm:$0xf] %vm1659_vm13, %v1564_v32 }
 0x1f6   : > { %1661 = vst.msk [vmem:[#allocation2 + $0x4] sm:$0xf] %vm1659_vm13, %v1566_v48  ;;  %1585 = vrot.lane.b32.xlu2 %v3387_v11, %s3151_s8 }
 0x1f7   : > { %1875 = vrot.lane.b32.xlu1 %v5346_v29, %s3154_s11 }
 0x1f8   : > { %1873 = vrot.lane.b32.xlu0 %v5347_v23, %s3154_s11  ;;  %v1854_v30 = vpop.permute.xlu2 %1853 }
 0x1fb   : > { %v1717_v18 = vpop.permute.xlu0 %1716 }
 0x1fc   : > { %v1719_v33 = vpop.permute.xlu1 %1718  ;;  %1813 = vst.msk [vmem:[#allocation2] sm:$0xf] %vm1812_vm14, %v1717_v18 }
 0x1fd   : > { %1814 = vst.msk [vmem:[#allocation2 + $0x4] sm:$0xf] %vm1812_vm14, %v1719_v33 }
 0x1fe   : > { %1950 = vst.msk [vmem:[#allocation2] sm:$0xf] %vm1949_vm15, %v1854_v30  ;;  %1736 = vrot.lane.b32.xlu2 %v5320_v17, %s3153_s10 }
 0x1ff   : > { %1480 = vrot.lane.b32.xlu1 %v3989_v4, %s3152_s9 }
 0x200   : > { %1470 = vrot.lane.b32.xlu0 %v4022_v6, %s3152_s9  ;;  %v1439_v11 = vpop.permute.xlu2 %1438 }
 0x201   : > { %1532 = vst.msk [vmem:[#allocation2 + $0xc] sm:$0xf] %vm1528_vm12, %v1439_v11  ;;  %v5354_v11 = vld [vmem:[#allocation28_spill] sm:$0xff] }
 0x203   : > { %v1856_v22 = vpop.permute.xlu0 %1855 }
 0x204   : > { %v1437_v12 = vpop.permute.xlu1 %1436  ;;  %1951 = vst.msk [vmem:[#allocation2 + $0x4] sm:$0xf] %vm1949_vm15, %v1856_v22 }
 0x205   : > { %1531 = vst.msk [vmem:[#allocation2 + $0x8] sm:$0xf] %vm1528_vm12, %v1437_v12  ;;  %v5355_v12 = vld [vmem:[#allocation42_spill] sm:$0xff] }
 0x206   : > { %1863 = vrot.lane.b32.xlu2 %v5348_v36, %s3154_s11 }
 0x207   : > { %1601 = vrot.lane.b32.xlu1 %v3501_v21, %s3151_s8 }
 0x208   : > { %1599 = vrot.lane.b32.xlu0 %v3460_v3, %s3151_s8  ;;  %v1568_v17 = vpop.permute.xlu2 %1567 }
 0x209   : > { %1662 = vst.msk [vmem:[#allocation2 + $0x8] sm:$0xf] %vm1659_vm13, %v1568_v17 }
 0x20b   : > { %v1449_v20 = vpop.permute.xlu0 %1448  ;;  %v2817_v52 = vld [vmem:[#allocation2] sm:$0xff] }
 0x20c   : > { %v1451_v6 = vpop.permute.xlu1 %1450  ;;  %1537 = vst.msk [vmem:[#allocation2 + $0x20] sm:$0xf] %vm1528_vm12, %v1449_v20  ;;  %2182 = vmatmul.bf16.vlgmr.msra.gmra.mxu0 %v2817_v52  ;;  %v5357_v20 = vld [vmem:[#allocation32_spill] sm:$0xff]  ;;  %v5358_v52 = vld [vmem:[#allocation27_spill] sm:$0xff] }
 0x20d   : > { %1538 = vst.msk [vmem:[#allocation2 + $0x24] sm:$0xf] %vm1528_vm12, %v1451_v6  ;;  %v5356_v6 = vld [vmem:[#allocation40_spill] sm:$0xff] }
 0x20e   : > { %1468 = vrot.lane.b32.xlu2 %v5344_v61, %s3152_s9 }
 0x20f   : > { %1752 = vrot.lane.b32.xlu1 %v5329_v41, %s3153_s10 }
 0x210   : > { %1613 = vrot.lane.b32.xlu0 %v3572_v28, %s3151_s8  ;;  %v1582_v21 = vpop.permute.xlu2 %1581 }
 0x211   : > { %1669 = vst.msk [vmem:[#allocation2 + $0x24] sm:$0xf] %vm1659_vm13, %v1582_v21 }
 0x213   : > { %v1570_v0 = vpop.permute.xlu0 %1569 }
 0x214   : > { %v1580_v3 = vpop.permute.xlu1 %1579  ;;  %1663 = vst.msk [vmem:[#allocation2 + $0xc] sm:$0xf] %vm1659_vm13, %v1570_v0  ;;  %v5359_v0 = vld [vmem:[#allocation20_spill] sm:$0xff] }
 0x215   : > { %1668 = vst.msk [vmem:[#allocation2 + $0x20] sm:$0xf] %vm1659_vm13, %v1580_v3 }
 0x216   : > { %1482 = vrot.lane.b32.xlu2 %v4071_v24, %s3152_s9 }
 0x217   : > { %1766 = vrot.lane.b32.xlu1 %v3653_v8, %s3153_s10  ;;  %v5349_v8 = vld [vmem:[#allocation26_spill] sm:$0xff] }
 0x218   : > { %1764 = vrot.lane.b32.xlu0 %v5331_v59, %s3153_s10  ;;  %v1733_v41 = vpop.permute.xlu2 %1732 }
 0x219   : > { %1821 = vst.msk [vmem:[#allocation2 + $0x20] sm:$0xf] %vm1812_vm14, %v1733_v41 }
 0x21b   : > { %v1721_v45 = vpop.permute.xlu0 %1720 }
 0x21c   : > { %v1723_v28 = vpop.permute.xlu1 %1722  ;;  %1815 = vst.msk [vmem:[#allocation2 + $0x8] sm:$0xf] %vm1812_vm14, %v1721_v45 }
 0x21d   : > { %1816 = vst.msk [vmem:[#allocation2 + $0xc] sm:$0xf] %vm1812_vm14, %v1723_v28 }
 0x21e   : > { %1611 = vrot.lane.b32.xlu2 %v5297_v55, %s3151_s8 }
 0x21f   : > { %1901 = vrot.lane.b32.xlu1 %v4032_v9, %s3154_s11 }
 0x220   : > { %1891 = vrot.lane.b32.xlu0 %v5349_v8, %s3154_s11  ;;  %v1860_v5 = vpop.permute.xlu2 %1859 }
 0x221   : > { %1953 = vst.msk [vmem:[#allocation2 + $0xc] sm:$0xf] %vm1949_vm15, %v1860_v5  ;;  %v5362_v5 = vld [vmem:[#allocation30_spill] sm:$0xff] }
 0x223   : > { %v1735_v31 = vpop.permute.xlu0 %1734 }
 0x224   : > { %v1858_v59 = vpop.permute.xlu1 %1857  ;;  %1822 = vst.msk [vmem:[#allocation2 + $0x24] sm:$0xf] %vm1812_vm14, %v1735_v31 }
 0x225   : > { %1952 = vst.msk [vmem:[#allocation2 + $0x8] sm:$0xf] %vm1949_vm15, %v1858_v59 }
 0x226   : > { %1754 = vrot.lane.b32.xlu2 %v3607_v57, %s3153_s10 }
 0x227   : > { %1446 = vrot.lane.b32.xlu1 %v5348_v36, %s3152_s9 }
 0x228   : > { %1444 = vrot.lane.b32.xlu0 %v5345_v44, %s3152_s9  ;;  %v1465_v55 = vpop.permute.xlu2 %1464 }
 0x229   : > { %1545 = vst.msk [vmem:[#allocation2 + $0x40] sm:$0xf] %vm1528_vm12, %v1465_v55 }
 0x22b   : > { %v1870_v1 = vpop.permute.xlu0 %1869 }
 0x22c   : > { %v1872_v61 = vpop.permute.xlu1 %1871  ;;  %v2818_v51 = vld [vmem:[#allocation2 + $0x8] sm:$0xff]  ;;  %1958 = vst.msk [vmem:[#allocation2 + $0x20] sm:$0xf] %vm1949_vm15, %v1870_v1 }
 0x22d   : > { %1959 = vst.msk [vmem:[#allocation2 + $0x24] sm:$0xf] %vm1949_vm15, %v1872_v61  ;;  %2187 = vmatmul.bf16.gmra.mxu0 %v2818_v51 }
 0x22e   : > { %1889 = vrot.lane.b32.xlu2 %v5350_v60, %s3154_s11 }
 0x22f   : > { %1575 = vrot.lane.b32.xlu1 %v3306_v53, %s3151_s8 }
 0x230   : > { %1458 = vrot.lane.b32.xlu0 %v5346_v29, %s3152_s9  ;;  %v1598_v57 = vpop.permute.xlu2 %1597 }
 0x233   : > { %v1467_v56 = vpop.permute.xlu0 %1466 }
 0x234   : > { %v1596_v37 = vpop.permute.xlu1 %1595  ;;  %v2821_v26 = vld [vmem:[#allocation2 + $0x20] sm:$0xff]  ;;  %1546 = vst.msk [vmem:[#allocation2 + $0x44] sm:$0xf] %vm1528_vm12, %v1467_v56 }
 0x235   : > { %1676 = vst.msk [vmem:[#allocation2 + $0x40] sm:$0xf] %vm1659_vm13, %v1596_v37  ;;  %2202 = vmatmul.bf16.vlgmr.msra.gmra.mxu1 %v2821_v26 }
 0x236   : > { %1677 = vst.msk [vmem:[#allocation2 + $0x44] sm:$0xf] %vm1659_vm13, %v1598_v57  ;;  %1903 = vrot.lane.b32.xlu2 %v4027_v54, %s3154_s11 }
 0x237   : > { %1589 = vrot.lane.b32.xlu1 %v3415_v43, %s3151_s8 }
 0x238   : > { %1587 = vrot.lane.b32.xlu0 %v3381_v7, %s3151_s8  ;;  %v1886_v53 = vpop.permute.xlu2 %1885 }
 0x23b   : > { %v1749_v42 = vpop.permute.xlu0 %1748 }
 0x23c   : > { %v1751_v47 = vpop.permute.xlu1 %1750  ;;  %1829 = vst.msk [vmem:[#allocation2 + $0x40] sm:$0xf] %vm1812_vm14, %v1749_v42 }
 0x23d   : > { %1830 = vst.msk [vmem:[#allocation2 + $0x44] sm:$0xf] %vm1812_vm14, %v1751_v47 }
 0x23e   : > { %1966 = vst.msk [vmem:[#allocation2 + $0x40] sm:$0xf] %vm1949_vm15, %v1886_v53  ;;  %1456 = vrot.lane.b32.xlu2 %v5347_v23, %s3152_s9  ;;  %v5352_v23 = vld [vmem:[#allocation62_spill] sm:$0xff] }
 0x23f   : > { %1740 = vrot.lane.b32.xlu1 %v5327_v2, %s3153_s10 }
 0x240   : > { %1730 = vrot.lane.b32.xlu0 %v5317_v49, %s3153_s10  ;;  %v1443_v43 = vpop.permute.xlu2 %1442 }
 0x241   : > { %1534 = vst.msk [vmem:[#allocation2 + $0x14] sm:$0xf] %vm1528_vm12, %v1443_v43 }
 0x243   : > { %v1888_v35 = vpop.permute.xlu0 %1887 }
 0x244   : > { %v1441_v7 = vpop.permute.xlu1 %1440  ;;  %1967 = vst.msk [vmem:[#allocation2 + $0x44] sm:$0xf] %vm1949_vm15, %v1888_v35  ;;  %v3032_v35 = vld [vmem:[%s3236_s30 + $0xc0] sm:$0xf] }
 0x245   : > { %1533 = vst.msk [vmem:[#allocation2 + $0x10] sm:$0xf] %vm1528_vm12, %v1441_v7 }
 0x246   : > { %1577 = vrot.lane.b32.xlu2 %v3335_v19, %s3151_s8  ;;  %v5351_v19 = vld [vmem:[#allocation61_spill] sm:$0xff] }
 0x247   : > { %1867 = vrot.lane.b32.xlu1 %v5337_v63, %s3154_s11 }
 0x248   : > { %1865 = vrot.lane.b32.xlu0 %v5338_v34, %s3154_s11  ;;  %v1572_v2 = vpop.permute.xlu2 %1571 }
 0x249   : > { %1664 = vst.msk [vmem:[#allocation2 + $0x10] sm:$0xf] %vm1659_vm13, %v1572_v2  ;;  %v5364_v2 = vld [vmem:[#allocation34_spill] sm:$0xff] }
 0x24b   : > { %v1453_v44 = vpop.permute.xlu0 %1452  ;;  %v2825_v48 = vld [vmem:[#allocation2 + $0x40] sm:$0xff] }
 0x24c   : > { %v1455_v49 = vpop.permute.xlu1 %1454  ;;  %1539 = vst.msk [vmem:[#allocation2 + $0x28] sm:$0xf] %vm1528_vm12, %v1453_v44  ;;  %2222 = vmatmul.bf16.vlgmr.msra.gmra.mxu2 %v2825_v48 }
 0x24d   : > { %1540 = vst.msk [vmem:[#allocation2 + $0x2c] sm:$0xf] %vm1528_vm12, %v1455_v49 }
 0x24e   : > { %1728 = vrot.lane.b32.xlu2 %v5321_v13, %s3153_s10 }
 0x24f   : > { %1472 = vrot.lane.b32.xlu1 %v5350_v60, %s3152_s9 }
 0x250   : > { %1879 = vrot.lane.b32.xlu0 %v5351_v19, %s3154_s11  ;;  %v1586_v63 = vpop.permute.xlu2 %1585 }
 0x251   : > { %1671 = vst.msk [vmem:[#allocation2 + $0x2c] sm:$0xf] %vm1659_vm13, %v1586_v63 }
 0x253   : > { %v1574_v32 = vpop.permute.xlu0 %1573 }
 0x254   : > { %v1584_v34 = vpop.permute.xlu1 %1583  ;;  %1665 = vst.msk [vmem:[#allocation2 + $0x14] sm:$0xf] %vm1659_vm13, %v1574_v32 }
 0x255   : > { %1670 = vst.msk [vmem:[#allocation2 + $0x28] sm:$0xf] %vm1659_vm13, %v1584_v34 }
 0x256   : > { %1742 = vrot.lane.b32.xlu2 %v5323_v62, %s3153_s10 }
 0x257   : > { %1486 = vrot.lane.b32.xlu1 %v4027_v54, %s3152_s9 }
 0x258   : > { %1484 = vrot.lane.b32.xlu0 %v4032_v9, %s3152_s9  ;;  %v1737_v13 = vpop.permute.xlu2 %1736 }
 0x259   : > { %1823 = vst.msk [vmem:[#allocation2 + $0x28] sm:$0xf] %vm1812_vm14, %v1737_v13 }
 0x25b   : > { %v1725_v29 = vpop.permute.xlu0 %1724 }
 0x25c   : > { %v1727_v14 = vpop.permute.xlu1 %1726  ;;  %1817 = vst.msk [vmem:[#allocation2 + $0x10] sm:$0xf] %vm1812_vm14, %v1725_v29 }
 0x25d   : > { %1818 = vst.msk [vmem:[#allocation2 + $0x14] sm:$0xf] %vm1812_vm14, %v1727_v14  ;;  %v3033_v14 = vld [vmem:[%s3236_s30 + $0xc4] sm:$0xf] }
 0x25e   : > { %1877 = vrot.lane.b32.xlu2 %v5352_v23, %s3154_s11  ;;  %v1427_v29 = vrot.slane %v3033_v14, 5 }
 0x25f   : > { %1615 = vrot.lane.b32.xlu1 %v5298_v39, %s3151_s8  ;;  %v5353_v39 = vld [vmem:[#allocation43_spill] sm:$0xff] }
 0x260   : > { %1605 = vrot.lane.b32.xlu0 %v5292_v46, %s3151_s8  ;;  %v1864_v54 = vpop.permute.xlu2 %1863 }
 0x261   : > { %1955 = vst.msk [vmem:[#allocation2 + $0x14] sm:$0xf] %vm1949_vm15, %v1864_v54 }
 0x263   : > { %v1739_v62 = vpop.permute.xlu0 %1738 }
 0x264   : > { %v1862_v9 = vpop.permute.xlu1 %1861  ;;  %1824 = vst.msk [vmem:[#allocation2 + $0x2c] sm:$0xf] %vm1812_vm14, %v1739_v62  ;;  %v1429_v62 = vrot.slane %v1427_v29, 4 }
 0x265   : > { %1954 = vst.msk [vmem:[#allocation2 + $0x10] sm:$0xf] %vm1949_vm15, %v1862_v9 }
 0x266   : > { %1474 = vrot.lane.b32.xlu2 %v5349_v8, %s3152_s9  ;;  %v5360_v8 = vld [vmem:[#allocation33_spill] sm:$0xff] }
 0x267   : > { %1758 = vrot.lane.b32.xlu1 %v5330_v10, %s3153_s10 }
 0x268   : > { %1756 = vrot.lane.b32.xlu0 %v5353_v39, %s3153_s10  ;;  %v1469_v30 = vpop.permute.xlu2 %1468  ;;  %v1430_v39 = vrot.slane %v4258_v40, 5  ;;  %v4689_v40 = vld [vmem:[%s3236_s30 + $0xd0] sm:$0xf] }
 0x269   : > { %1547 = vst.msk [vmem:[#allocation2 + $0x48] sm:$0xf] %vm1528_vm12, %v1469_v30 }
 0x26b   : > { %v1874_v18 = vpop.permute.xlu0 %1873 }
 0x26c   : > { %v1876_v46 = vpop.permute.xlu1 %1875  ;;  %v2819_v33 = vld [vmem:[#allocation2 + $0x10] sm:$0xff]  ;;  %1960 = vst.msk [vmem:[#allocation2 + $0x28] sm:$0xf] %vm1949_vm15, %v1874_v18 }
 0x26d   : > { %1961 = vst.msk [vmem:[#allocation2 + $0x2c] sm:$0xf] %vm1949_vm15, %v1876_v46  ;;  %2192 = vmatmul.bf16.gmra.mxu0 %v2819_v33 }
 0x26e   : > { %1603 = vrot.lane.b32.xlu2 %v5354_v11, %s3151_s8  ;;  %v2712_v11 = vrot.slane %v3032_v35, 9 }
 0x26f   : > { %1893 = vrot.lane.b32.xlu1 %v5355_v12, %s3154_s11 }
 0x270   : > { %1770 = vrot.lane.b32.xlu0 %v5333_v50, %s3153_s10  ;;  %v1483_v10 = vpop.permute.xlu2 %1482 }
 0x271   : > { %1554 = vst.msk [vmem:[#allocation2 + $0x64] sm:$0xf] %vm1528_vm12, %v1483_v10 }
 0x273   : > { %v1471_v36 = vpop.permute.xlu0 %1470 }
 0x274   : > { %v1481_v22 = vpop.permute.xlu1 %1480  ;;  %v2822_v17 = vld [vmem:[#allocation2 + $0x28] sm:$0xff]  ;;  %1548 = vst.msk [vmem:[#allocation2 + $0x4c] sm:$0xf] %vm1528_vm12, %v1471_v36  ;;  %v1706_v36 = vshrl.u32 %v4689_v40, 16 }
 0x275   : > { %1553 = vst.msk [vmem:[#allocation2 + $0x60] sm:$0xf] %vm1528_vm12, %v1481_v22  ;;  %2207 = vmatmul.bf16.gmra.mxu1 %v2822_v17  ;;  %v1431_v22 = vsel %vm3659_vm6, %v1429_v62, %v1430_v39  ;;  %v1428_v17 = vsel %vm3659_vm6, %v2712_v11, %v1427_v29 }
 0x276   : > { %1617 = vrot.lane.b32.xlu2 %v5356_v6, %s3151_s8 }
 0x277   : > { %1907 = vrot.lane.b32.xlu1 %v5357_v20, %s3154_s11 }
 0x278   : > { %1905 = vrot.lane.b32.xlu0 %v5358_v52, %s3154_s11  ;;  %v1612_v50 = vpop.permute.xlu2 %1611 }
 0x279   : > { %1684 = vst.msk [vmem:[#allocation2 + $0x60] sm:$0xf] %vm1659_vm13, %v1612_v50 }
 0x27b   : > { %v1600_v3 = vpop.permute.xlu0 %1599 }
 0x27c   : > { %v1602_v21 = vpop.permute.xlu1 %1601  ;;  %1678 = vst.msk [vmem:[#allocation2 + $0x48] sm:$0xf] %vm1659_vm13, %v1600_v3 }
 0x27d   : > { %1679 = vst.msk [vmem:[#allocation2 + $0x4c] sm:$0xf] %vm1659_vm13, %v1602_v21  ;;  %v1708_v21 = vrot.slane %v1706_v36, 4 }
 0x27e   : > { %1768 = vrot.lane.b32.xlu2 %v3646_v38, %s3153_s10  ;;  %v5361_v38 = vld [vmem:[#allocation29_spill] sm:$0xff] }
 0x27f   : > { %1591 = vrot.lane.b32.xlu1 %v5359_v0, %s3151_s8 }
 0x280   : > { %1462 = vrot.lane.b32.xlu0 %v5351_v19, %s3152_s9  ;;  %v1755_v41 = vpop.permute.xlu2 %1754  ;;  %v5366_v19 = vld [vmem:[#allocation46_spill] sm:$0xff] }
 0x281   : > { %1832 = vst.msk [vmem:[#allocation2 + $0x4c] sm:$0xf] %vm1812_vm14, %v1755_v41 }
 0x283   : > { %v1614_v45 = vpop.permute.xlu0 %1613 }
 0x284   : > { %v1753_v28 = vpop.permute.xlu1 %1752  ;;  %1685 = vst.msk [vmem:[#allocation2 + $0x64] sm:$0xf] %vm1659_vm13, %v1614_v45  ;;  %v265_v45 = vld [vmem:[%s3236_s30 + $0xd4] sm:$0x1] }
 0x285   : > { %1831 = vst.msk [vmem:[#allocation2 + $0x48] sm:$0xf] %vm1812_vm14, %v1753_v28 }
 0x286   : > { %1895 = vrot.lane.b32.xlu2 %v5360_v8, %s3154_s11 }
 0x287   : > { %1746 = vrot.lane.b32.xlu1 %v5361_v38, %s3153_s10 }
 0x288   : > { %1744 = vrot.lane.b32.xlu0 %v5362_v5, %s3153_s10  ;;  %v1890_v59 = vpop.permute.xlu2 %1889 }
 0x289   : > { %1968 = vst.msk [vmem:[#allocation2 + $0x48] sm:$0xf] %vm1949_vm15, %v1890_v59  ;;  %v2183_v55 = vpop.f32.mrf.mxu0 }
 0x28a   : > { %v4630_v57 = vmax.f32 %v2183_v55, 0.0 }
 0x28b   : > { %v1765_v61 = vpop.permute.xlu0 %1764 }
 0x28c   : > { %v1767_v31 = vpop.permute.xlu1 %1766  ;;  %1837 = vst.msk [vmem:[#allocation2 + $0x60] sm:$0xf] %vm1812_vm14, %v1765_v61  ;;  %v1712_v61 = vshll.u32 %v265_v45, 16 }
 0x28d   : > { %1838 = vst.msk [vmem:[#allocation2 + $0x64] sm:$0xf] %vm1812_vm14, %v1767_v31 }
 0x28e   : > { %1460 = vrot.lane.b32.xlu2 %v5352_v23, %s3152_s9  ;;  %v5367_v23 = vld [vmem:[#allocation36_spill] sm:$0xff] }
 0x28f   : > { %1476 = vrot.lane.b32.xlu1 %v5355_v12, %s3152_s9 }
 0x290   : > { %1883 = vrot.lane.b32.xlu0 %v5342_v16, %s3154_s11  ;;  %v1904_v51 = vpop.permute.xlu2 %1903  ;;  %v5363_v16 = vld [vmem:[#allocation18_spill] sm:$0xff] }
 0x291   : > { %1975 = vst.msk [vmem:[#allocation2 + $0x64] sm:$0xf] %vm1949_vm15, %v1904_v51  ;;  %v2185_v60 = vpop.f32.mrf.mxu0 }
 0x292   : > { %v4633_v56 = vmax.f32 %v2185_v60, 0.0 }
 0x293   : > { %v1892_v37 = vpop.permute.xlu0 %1891 }
 0x294   : > { %v1902_v1 = vpop.permute.xlu1 %1901  ;;  %1969 = vst.msk [vmem:[#allocation2 + $0x4c] sm:$0xf] %vm1949_vm15, %v1892_v37  ;;  %v2845_v26 = vpack.c.bf16 %v4633_v56, %v4630_v57  ;;  %v1714_v37 = vrot.slane %v1712_v61, 5 }
 0x295   : > { %1974 = vst.msk [vmem:[#allocation2 + $0x60] sm:$0xf] %vm1949_vm15, %v1902_v1 }
 0x296   : > { %2846 = vst [vmem:[%s4638_s28] sm:$0xff] %v2845_v26   ;;  %1593 = vrot.lane.b32.xlu2 %v5363_v16, %s3151_s8 }
 0x297   : > { %1490 = vrot.lane.b32.xlu1 %v5357_v20, %s3152_s9 }
 0x298   : > { %1488 = vrot.lane.b32.xlu0 %v5358_v52, %s3152_s9  ;;  %v1457_v53 = vpop.permute.xlu2 %1456  ;;  %v1702_v52 = vshll.u32 %v4689_v40, 16 }
 0x299   : > { %1541 = vst.msk [vmem:[#allocation2 + $0x30] sm:$0xf] %vm1528_vm12, %v1457_v53 }
 0x29a   : > { %v1704_v59 = vrot.slane %v1702_v52, 5 }
 0x29b   : > { %v1445_v43 = vpop.permute.xlu0 %1444  ;;  %v2826_v7 = vld [vmem:[#allocation2 + $0x48] sm:$0xff] }
 0x29c   : > { %v1447_v47 = vpop.permute.xlu1 %1446  ;;  %v2829_v42 = vld [vmem:[#allocation2 + $0x60] sm:$0xff]  ;;  %1535 = vst.msk [vmem:[#allocation2 + $0x18] sm:$0xf] %vm1528_vm12, %v1445_v43  ;;  %2227 = vmatmul.bf16.gmra.mxu2 %v2826_v7  ;;  %v1709_v55 = vor.u32 %v1708_v21, %v1704_v59  ;;  %v1848_v43 = vrot.slane %v4689_v40, 5 }
 0x29d   : > { %1536 = vst.msk [vmem:[#allocation2 + $0x1c] sm:$0xf] %vm1528_vm12, %v1447_v47  ;;  %2242 = vmatmul.bf16.vlgmr.msra.gmra.mxu3 %v2829_v42 }
 0x29e   : > { %1881 = vrot.lane.b32.xlu2 %v3983_v15, %s3154_s11  ;;  %v5365_v15 = vld [vmem:[#allocation45_spill] sm:$0xff]  ;;  %v1710_v60 = vrot.slane %v1709_v55, 4 }
 0x29f   : > { %1619 = vrot.lane.b32.xlu1 %v3032_v35, %s3151_s8 }
 0x2a0   : > { %1609 = vrot.lane.b32.xlu0 %v5364_v2, %s3151_s8  ;;  %v1578_v49 = vpop.permute.xlu2 %1577  ;;  %v1850_v2 = vrot.slane %v1848_v43, 4 }
 0x2a1   : > { %1667 = vst.msk [vmem:[#allocation2 + $0x1c] sm:$0xf] %vm1659_vm13, %v1578_v49  ;;  %v1851_v49 = vrot.slane %v265_v45, 5 }
 0x2a3   : > { %v1459_v48 = vpop.permute.xlu0 %1458 }
 0x2a4   : > { %v1576_v44 = vpop.permute.xlu1 %1575  ;;  %1542 = vst.msk [vmem:[#allocation2 + $0x34] sm:$0xf] %vm1528_vm12, %v1459_v48 }
 0x2a5   : > { %1666 = vst.msk [vmem:[#allocation2 + $0x18] sm:$0xf] %vm1659_vm13, %v1576_v44 }
 0x2a6   : > { %1478 = vrot.lane.b32.xlu2 %v5360_v8, %s3152_s9 }
 0x2a7   : > { %1762 = vrot.lane.b32.xlu1 %v5365_v15, %s3153_s10 }
 0x2a8   : > { %1760 = vrot.lane.b32.xlu0 %v5366_v19, %s3153_s10  ;;  %v1729_v63 = vpop.permute.xlu2 %1728 }
 0x2a9   : > { %1819 = vst.msk [vmem:[#allocation2 + $0x18] sm:$0xf] %vm1812_vm14, %v1729_v63 }
 0x2aa   : > { %v2188_v34 = vpop.f32.mrf.mxu0 }
 0x2ab   : > { %v1588_v13 = vpop.permute.xlu0 %1587  ;;  %v4676_v30 = vmax.f32 %v2188_v34, 0.0 }
 0x2ac   : > { %v1590_v32 = vpop.permute.xlu1 %1589  ;;  %1672 = vst.msk [vmem:[#allocation2 + $0x30] sm:$0xf] %vm1659_vm13, %v1588_v13 }
 0x2ad   : > { %1673 = vst.msk [vmem:[#allocation2 + $0x34] sm:$0xf] %vm1659_vm13, %v1590_v32 }
 0x2ae   : > { %1607 = vrot.lane.b32.xlu2 %v5367_v23, %s3151_s8 }
 0x2af   : > { %1897 = vrot.lane.b32.xlu1 %v3989_v4, %s3154_s11 }
 0x2b0   : > { %1774 = vrot.lane.b32.xlu0 %v4274_v58, %s3153_s10  ;;  %v1743_v54 = vpop.permute.xlu2 %1742  ;;  %v4683_v58 = vld [vmem:[%s3236_s30 + $0xcc] sm:$0xf]  ;;  %s2841_s30 = sshll.u32 %s3136_s15, 7 }
 0x2b1   : > { %1826 = vst.msk [vmem:[#allocation2 + $0x34] sm:$0xf] %vm1812_vm14, %v1743_v54  ;;  %v1693_v6 = vshrl.u32 %v4683_v58, 16  ;;  %v1696_v20 = vshll.u32 %v4683_v58, 16  ;;  %v2713_v34 = vrot.slane %v4683_v58, 9 }
 0x2b2   : > { %v2190_v9 = vpop.f32.mrf.mxu0  ;;  %v2203_v33 = vpop.f32.mrf.mxu1 }
 0x2b3   : > { %v4679_v18 = vmax.f32 %v2190_v9, 0.0  ;;  %v1731_v4 = vpop.permute.xlu0 %1730  ;;  %v1695_v41 = vrot.slane %v1693_v6, 4  ;;  %v1698_v28 = vrot.slane %v1696_v20, 5  ;;  %v4705_v8 = vmax.f32 %v2203_v33, 0.0 }
 0x2b4   : > { %v1741_v46 = vpop.permute.xlu1 %1740  ;;  %1820 = vst.msk [vmem:[#allocation2 + $0x1c] sm:$0xf] %vm1812_vm14, %v1731_v4  ;;  %v1849_v62 = vsel %vm3659_vm6, %v2713_v34, %v1848_v43 }
 0x2b5   : > { %1825 = vst.msk [vmem:[#allocation2 + $0x30] sm:$0xf] %vm1812_vm14, %v1741_v46  ;;  %v2850_v12 = vpack.c.bf16 %v4679_v18, %v4676_v30  ;;  %v1699_v51 = vor.u32 %v1698_v28, %v1695_v41 }
 0x2b6   : > { %1621 = vrot.lane.b32.xlu2 %v3033_v14, %s3151_s8 }
 0x2b7   : > { %2922 = vst [vmem:[%s4638_s28 + $0x8] sm:$0xff] %v2850_v12   ;;  %1911 = vrot.lane.b32.xlu1 %v1431_v22, %s3154_s11  ;;  %v1700_v16 = vrot.slane %v1699_v51, 4 }
 0x2b8   : > { %1909 = vrot.lane.b32.xlu0 %v1428_v17, %s3154_s11  ;;  %v1878_v50 = vpop.permute.xlu2 %1877 }
 0x2b9   : > { %1962 = vst.msk [vmem:[#allocation2 + $0x30] sm:$0xf] %vm1949_vm15, %v1878_v50  ;;  %v1705_v42 = vsel %vm3272_vm2, %v1700_v16, %v1704_v59 }
 0x2ba   : > { %v2205_v0 = vpop.f32.mrf.mxu1 }
 0x2bb   : > { %v4708_v38 = vmax.f32 %v2205_v0, 0.0  ;;  %v1866_v5 = vpop.permute.xlu0 %1865 }
 0x2bc   : > { %v1868_v3 = vpop.permute.xlu1 %1867  ;;  %1956 = vst.msk [vmem:[#allocation2 + $0x18] sm:$0xf] %vm1949_vm15, %v1866_v5 }
 0x2bd   : > { %1957 = vst.msk [vmem:[#allocation2 + $0x1c] sm:$0xf] %vm1949_vm15, %v1868_v3  ;;  %v2865_v31 = vpack.c.bf16 %v4708_v38, %v4705_v8 }
 0x2be   : > { %1772 = vrot.lane.b32.xlu2 %v4278_v25, %s3153_s10  ;;  %v1715_v25 = vsel %vm3272_vm2, %v1710_v60, %v1714_v37 }
 0x2bf   : > { %2925 = vst [vmem:[%s4638_s28 + $0x20] sm:$0xff] %v2865_v31   ;;  %1623 = vrot.lane.b32.xlu1 %v4683_v58, %s3151_s8 }
 0x2c0   : > { %1494 = vrot.lane.b32.xlu0 %v1431_v22, %s3152_s9  ;;  %v1475_v1 = vpop.permute.xlu2 %1474 }
 0x2c1   : > { %1550 = vst.msk [vmem:[#allocation2 + $0x54] sm:$0xf] %vm1528_vm12, %v1475_v1 }
 0x2c3   : > { %v1880_v53 = vpop.permute.xlu0 %1879 }
 0x2c4   : > { %v1473_v26 = vpop.permute.xlu1 %1472  ;;  %v2820_v47 = vld [vmem:[#allocation2 + $0x18] sm:$0xff]  ;;  %1963 = vst.msk [vmem:[#allocation2 + $0x34] sm:$0xf] %vm1949_vm15, %v1880_v53 }
 0x2c5   : > { %1549 = vst.msk [vmem:[#allocation2 + $0x50] sm:$0xf] %vm1528_vm12, %v1473_v26  ;;  %2197 = vmatmul.bf16.gmra.mxu0 %v2820_v47 }
 0x2c6   : > { %1899 = vrot.lane.b32.xlu2 %v4071_v24, %s3154_s11  ;;  %v1852_v24 = vsel %vm3659_vm6, %v1850_v2, %v1851_v49 }
 0x2c7   : > { %1778 = vrot.lane.b32.xlu1 %v1715_v25, %s3153_s10 }
 0x2c8   : > { %1776 = vrot.lane.b32.xlu0 %v1705_v42, %s3153_s10  ;;  %v1604_v7 = vpop.permute.xlu2 %1603  ;;  %s2553_s10 = scalar_lea.hbm %s5106_s2, %s2841_s30 }
 0x2c9   : > { %1680 = vst.msk [vmem:[#allocation2 + $0x50] sm:$0xf] %vm1659_vm13, %v1604_v7  ;;  %s2556_s4 = sshll.u32 %s2553_s10, 4  ;;  %s2557_s4 = int_to_ptr.hbm [resolvable:$true] %s2556_s4 }
 0x2ca   : > { %s3048_s6 = sshra.s32 %s2557_s4, 4  ;;  %s3049_s6 = int_to_ptr.hbm [resolvable:$true] %s3048_s6 }
 0x2cb   : > { %v1485_v44 = vpop.permute.xlu0 %1484  ;;  %v2823_v27 = vld [vmem:[#allocation2 + $0x30] sm:$0xff]  ;;  %s3050_s7 = scalar_lea.hbm %s3049_s6, 128  ;;  %p3055_p1 = scmp.lt.s32.totalorder %s3049_s6, %s5106_s2 }
 0x2cc   : > { %v1487_v35 = vpop.permute.xlu1 %1486  ;;  %1555 = vst.msk [vmem:[#allocation2 + $0x68] sm:$0xf] %vm1528_vm12, %v1485_v44  ;;  %2212 = vmatmul.bf16.gmra.mxu1 %v2823_v27  ;;  %p3051_p12 = scmp.ne.s32.totalorder %s3049_s6, %s3050_s7  ;;  %p3056_p2 = scmp.lt.s32.totalorder %s3054_s21, %s3050_s7 }
 0x2cd   : > { %1556 = vst.msk [vmem:[#allocation2 + $0x6c] sm:$0xf] %vm1528_vm12, %v1487_v35 }
 0x2ce   : > { %1492 = vrot.lane.b32.xlu2 %v1428_v17, %s3152_s9  ;;  %p3052_p13 = pnand %p3051_p12, %p3216_p4  ;;  %p3057_p3 = por %p3056_p2, %p3055_p1 }
 0x2cf   : > { %v2223_v48 = vpop.f32.mrf.mxu2 }
 0x2d0   : > { %1915 = vrot.lane.b32.xlu0 %v1852_v24, %s3154_s11  ;;  %v1618_v15 = vpop.permute.xlu2 %1617  ;;  %v4744_v13 = vmax.f32 %v2223_v48, 0.0  ;;  %p3053_p0 = pneg %p3052_p13 }
 0x2d1   : > { %1687 = vst.msk [vmem:[#allocation2 + $0x6c] sm:$0xf] %vm1659_vm13, %v1618_v15 }
 0x2d2   : > { %p3058_p5 = pnand %p3057_p3, %p3053_p0 }
 0x2d3   : > { %v1606_v63 = vpop.permute.xlu0 %1605 }
 0x2d4   : > { %v1616_v19 = vpop.permute.xlu1 %1615  ;;  %1681 = vst.msk [vmem:[#allocation2 + $0x54] sm:$0xf] %vm1659_vm13, %v1606_v63 }
 0x2d5   : > { %1686 = vst.msk [vmem:[#allocation2 + $0x68] sm:$0xf] %vm1659_vm13, %v1616_v19 }
 0x2d6   : > { %1625 = vrot.lane.b32.xlu2 %v4689_v40, %s3151_s8 }
 0x2d7   : > { %v2225_v32 = vpop.f32.mrf.mxu2 }
 0x2d8   : > { %v4746_v14 = vmax.f32 %v2225_v32, 0.0  ;;  %v1769_v29 = vpop.permute.xlu2 %1768 }
 0x2d9   : > { %1839 = vst.msk [vmem:[#allocation2 + $0x68] sm:$0xf] %vm1812_vm14, %v1769_v29 }
 0x2da   : > { %v2885_v54 = vpack.c.bf16 %v4746_v14, %v4744_v13 }
 0x2db   : > { %v1757_v9 = vpop.permute.xlu0 %1756 }
 0x2dc   : > { %v1759_v23 = vpop.permute.xlu1 %1758  ;;  %1833 = vst.msk [vmem:[#allocation2 + $0x50] sm:$0xf] %vm1812_vm14, %v1757_v9 }
 0x2dd   : > { %1834 = vst.msk [vmem:[#allocation2 + $0x54] sm:$0xf] %vm1812_vm14, %v1759_v23 }
 0x2de   : > { %2929 = vst [vmem:[%s4638_s28 + $0x40] sm:$0xff] %v2885_v54   ;;  %1913 = vrot.lane.b32.xlu2 %v1849_v62, %s3154_s11 }
 0x2e0   : > { %v1896_v39 = vpop.permute.xlu2 %1895 }
 0x2e1   : > { %1971 = vst.msk [vmem:[#allocation2 + $0x54] sm:$0xf] %vm1949_vm15, %v1896_v39 }
 0x2e3   : > { %v1771_v33 = vpop.permute.xlu0 %1770 }
 0x2e4   : > { %v1894_v46 = vpop.permute.xlu1 %1893  ;;  %1840 = vst.msk [vmem:[#allocation2 + $0x6c] sm:$0xf] %vm1812_vm14, %v1771_v33 }
 0x2e5   : > { %1970 = vst.msk [vmem:[#allocation2 + $0x50] sm:$0xf] %vm1949_vm15, %v1894_v46 }
 0x2e8   : > { %v1461_v11 = vpop.permute.xlu2 %1460 }
 0x2e9   : > { %1543 = vst.msk [vmem:[#allocation2 + $0x38] sm:$0xf] %vm1528_vm12, %v1461_v11 }
 0x2ea   : > { %v2193_v4 = vpop.f32.mrf.mxu0 }
 0x2eb   : > { %v1906_v40 = vpop.permute.xlu0 %1905  ;;  %v4763_v36 = vmax.f32 %v2193_v4, 0.0 }
 0x2ec   : > { %v1908_v58 = vpop.permute.xlu1 %1907  ;;  %v2827_v12 = vld [vmem:[#allocation2 + $0x50] sm:$0xff]  ;;  %1976 = vst.msk [vmem:[#allocation2 + $0x68] sm:$0xf] %vm1949_vm15, %v1906_v40 }
 0x2ed   : > { %1977 = vst.msk [vmem:[#allocation2 + $0x6c] sm:$0xf] %vm1949_vm15, %v1908_v58  ;;  %2232 = vmatmul.bf16.gmra.mxu2 %v2827_v12 }
 0x2f0   : > { %v1594_v10 = vpop.permute.xlu2 %1593 }
 0x2f2   : > { %v2195_v22 = vpop.f32.mrf.mxu0  ;;  %v2208_v6 = vpop.f32.mrf.mxu1 }
 0x2f3   : > { %v4765_v20 = vmax.f32 %v2195_v22, 0.0  ;;  %v1463_v52 = vpop.permute.xlu0 %1462  ;;  %v4773_v28 = vmax.f32 %v2208_v6, 0.0 }
 0x2f4   : > { %v1592_v17 = vpop.permute.xlu1 %1591  ;;  %v2830_v50 = vld [vmem:[#allocation2 + $0x68] sm:$0xff]  ;;  %1544 = vst.msk [vmem:[#allocation2 + $0x3c] sm:$0xf] %vm1528_vm12, %v1463_v52 }
 0x2f5   : > { %1674 = vst.msk [vmem:[#allocation2 + $0x38] sm:$0xf] %vm1659_vm13, %v1592_v17  ;;  %v2855_v21 = vpack.c.bf16 %v4765_v20, %v4763_v36  ;;  %2247 = vmatmul.bf16.gmra.mxu3 %v2830_v50 }
 0x2f6   : > { %1675 = vst.msk [vmem:[#allocation2 + $0x3c] sm:$0xf] %vm1659_vm13, %v1594_v10 }
 0x2f7   : > { %2923 = vst [vmem:[%s4638_s28 + $0x10] sm:$0xff] %v2855_v21  }
 0x2f8   : > { %v1882_v3 = vpop.permute.xlu2 %1881 }
 0x2fa   : > { %v2210_v41 = vpop.f32.mrf.mxu1 }
 0x2fb   : > { %v4776_v45 = vmax.f32 %v2210_v41, 0.0  ;;  %v1745_v5 = vpop.permute.xlu0 %1744 }
 0x2fc   : > { %v1747_v0 = vpop.permute.xlu1 %1746  ;;  %1827 = vst.msk [vmem:[#allocation2 + $0x38] sm:$0xf] %vm1812_vm14, %v1745_v5  ;;  %v2296_v5 = vpack.c.bf16 %v4633_v56, %v4633_v56  ;;  %v2299_v56 = vpack.c.bf16 %v4763_v36, %v4763_v36 }
 0x2fd   : > { %1828 = vst.msk [vmem:[#allocation2 + $0x3c] sm:$0xf] %vm1812_vm14, %v1747_v0  ;;  %v2870_v59 = vpack.c.bf16 %v4776_v45, %v4773_v28 }
 0x2fe   : > { %1964 = vst.msk [vmem:[#allocation2 + $0x38] sm:$0xf] %vm1949_vm15, %v1882_v3 }
 0x2ff   : > { %2926 = vst [vmem:[%s4638_s28 + $0x28] sm:$0xff] %v2870_v59   ;;  %v2295_v59 = vpack.c.bf16 %v4630_v57, %v4630_v57 }
 0x300   : > { %v1479_v31 = vpop.permute.xlu2 %1478 }
 0x301   : > { %1552 = vst.msk [vmem:[#allocation2 + $0x5c] sm:$0xf] %vm1528_vm12, %v1479_v31  ;;  %v2297_v31 = vpack.c.bf16 %v4676_v30, %v4676_v30 }
 0x303   : > { %v1884_v61 = vpop.permute.xlu0 %1883 }
 0x304   : > { %v1477_v55 = vpop.permute.xlu1 %1476  ;;  %1965 = vst.msk [vmem:[#allocation2 + $0x3c] sm:$0xf] %vm1949_vm15, %v1884_v61  ;;  %v2298_v61 = vpack.c.bf16 %v4679_v18, %v4679_v18  ;;  %v2300_v18 = vpack.c.bf16 %v4765_v20, %v4765_v20 }
 0x305   : > { %1551 = vst.msk [vmem:[#allocation2 + $0x58] sm:$0xf] %vm1528_vm12, %v1477_v55  ;;  %v4830_v55 = vunpack.c.l.bf16 %v2296_v5 }
 0x308   : > { %v1608_v51 = vpop.permute.xlu2 %1607 }
 0x309   : > { %1682 = vst.msk [vmem:[#allocation2 + $0x58] sm:$0xf] %vm1659_vm13, %v1608_v51 }
 0x30b   : > { %v1489_v60 = vpop.permute.xlu0 %1488  ;;  %v2824_v37 = vld [vmem:[#allocation2 + $0x38] sm:$0xff] }
 0x30c   : > { %v1491_v1 = vpop.permute.xlu1 %1490  ;;  %1557 = vst.msk [vmem:[#allocation2 + $0x70] sm:$0xf] %vm1528_vm12, %v1489_v60  ;;  %2217 = vmatmul.bf16.gmra.mxu1 %v2824_v37  ;;  %v4836_v60 = vunpack.c.l.bf16 %v2295_v59  ;;  %v4838_v37 = vunpack.c.l.bf16 %v2297_v31 }
 0x30d   : > { %1558 = vst.msk [vmem:[#allocation2 + $0x74] sm:$0xf] %vm1528_vm12, %v1491_v1 }
 0x30e   : > { %v2391_v30 = vadd.f32 %v4830_v55, %v4836_v60 }
 0x310   : > { %v1622_v26 = vpop.permute.xlu2 %1621 }
 0x311   : > { %1689 = vst.msk [vmem:[#allocation2 + $0x74] sm:$0xf] %vm1659_vm13, %v1622_v26 }
 0x313   : > { %v1610_v53 = vpop.permute.xlu0 %1609 }
 0x314   : > { %v1620_v16 = vpop.permute.xlu1 %1619  ;;  %1683 = vst.msk [vmem:[#allocation2 + $0x5c] sm:$0xf] %vm1659_vm13, %v1610_v53 }
 0x315   : > { %1688 = vst.msk [vmem:[#allocation2 + $0x70] sm:$0xf] %vm1659_vm13, %v1620_v16  ;;  %v4846_v16 = vunpack.c.l.bf16 %v2298_v61 }
 0x318   : > { %v1773_v47 = vpop.permute.xlu2 %1772 }
 0x319   : > { %1841 = vst.msk [vmem:[#allocation2 + $0x70] sm:$0xf] %vm1812_vm14, %v1773_v47  ;;  %v2392_v47 = vadd.f32 %v2391_v30, %v4838_v37 }
 0x31b   : > { %v1761_v42 = vpop.permute.xlu0 %1760 }
 0x31c   : > { %v1763_v25 = vpop.permute.xlu1 %1762  ;;  %1835 = vst.msk [vmem:[#allocation2 + $0x58] sm:$0xf] %vm1812_vm14, %v1761_v42  ;;  %v2393_v42 = vadd.f32 %v2392_v47, %v4846_v16 }
 0x31d   : > { %1836 = vst.msk [vmem:[#allocation2 + $0x5c] sm:$0xf] %vm1812_vm14, %v1763_v25  ;;  %v4853_v25 = vunpack.c.l.bf16 %v2299_v56  ;;  %v2312_v56 = vpack.c.bf16 %v4746_v14, %v4746_v14 }
 0x31f   : > { %v2228_v7 = vpop.f32.mrf.mxu2  ;;  %v4914_v30 = vunpack.c.l.bf16 %v2312_v56 }
 0x320   : > { %v2243_v43 = vpop.f32.mrf.mxu3  ;;  %v1900_v35 = vpop.permute.xlu2 %1899  ;;  %v4802_v15 = vmax.f32 %v2228_v7, 0.0 }
 0x321   : > { %1973 = vst.msk [vmem:[#allocation2 + $0x5c] sm:$0xf] %vm1949_vm15, %v1900_v35  ;;  %v4798_v44 = vmax.f32 %v2243_v43, 0.0  ;;  %v4857_v43 = vunpack.c.l.bf16 %v2300_v18  ;;  %v2394_v35 = vadd.f32 %v2393_v42, %v4853_v25 }
 0x322   : > { %v2313_v18 = vpack.c.bf16 %v4802_v15, %v4802_v15 }
 0x323   : > { %v1775_v49 = vpop.permute.xlu0 %1774 }
 0x324   : > { %v1898_v2 = vpop.permute.xlu1 %1897  ;;  %1842 = vst.msk [vmem:[#allocation2 + $0x74] sm:$0xf] %vm1812_vm14, %v1775_v49  ;;  %v4919_v47 = vunpack.c.l.bf16 %v2313_v18 }
 0x325   : > { %1972 = vst.msk [vmem:[#allocation2 + $0x58] sm:$0xf] %vm1949_vm15, %v1898_v2 }
 0x327   : > { %v2230_v24 = vpop.f32.mrf.mxu2 }
 0x328   : > { %v2245_v27 = vpop.f32.mrf.mxu3  ;;  %v4804_v19 = vmax.f32 %v2230_v24, 0.0  ;;  %v1493_v63 = vpop.permute.xlu2 %1492  ;;  %v2395_v24 = vadd.f32 %v2394_v35, %v4857_v43 }
 0x329   : > { %v4800_v48 = vmax.f32 %v2245_v27, 0.0  ;;  %1559 = vst.msk [vmem:[#allocation2 + $0x78] sm:$0xf] %vm1528_vm12, %v1493_v63 }
 0x32a   : > { %v2890_v23 = vpack.c.bf16 %v4804_v19, %v4802_v15 }
 0x32b   : > { %v2905_v34 = vpack.c.bf16 %v4800_v48, %v4798_v44  ;;  %v1910_v54 = vpop.permute.xlu0 %1909 }
 0x32c   : > { %v1912_v32 = vpop.permute.xlu1 %1911  ;;  %v2828_v29 = vld [vmem:[#allocation2 + $0x58] sm:$0xff]  ;;  %2930 = vst [vmem:[%s4638_s28 + $0x48] sm:$0xff] %v2890_v23  }
 0x32d   : > { %1979 = vst.msk [vmem:[#allocation2 + $0x74] sm:$0xf] %vm1949_vm15, %v1912_v32  ;;  %2237 = vmatmul.bf16.gmra.mxu2 %v2828_v29  ;;  %v2303_v32 = vpack.c.bf16 %v4705_v8, %v4705_v8 }
 0x32e   : > { %2933 = vst [vmem:[%s4638_s28 + $0x60] sm:$0xff] %v2905_v34  }
 0x32f   : > { %1978 = vst.msk [vmem:[#allocation2 + $0x70] sm:$0xf] %vm1949_vm15, %v1910_v54  ;;  %v4876_v54 = vunpack.c.l.bf16 %v2303_v32 }
 0x330   : > { %v1626_v9 = vpop.permute.xlu2 %1625 }
 0x333   : > { %v1495_v39 = vpop.permute.xlu0 %1494 }
 0x334   : > { %v1624_v62 = vpop.permute.xlu1 %1623  ;;  %1560 = vst.msk [vmem:[#allocation2 + $0x7c] sm:$0xf] %vm1528_vm12, %v1495_v39 }
 0x335   : > { %1690 = vst.msk [vmem:[#allocation2 + $0x78] sm:$0xf] %vm1659_vm13, %v1624_v62 }
 0x336   : > { %v2831_v46 = vld [vmem:[#allocation2 + $0x70] sm:$0xff]  ;;  %1691 = vst.msk [vmem:[#allocation2 + $0x7c] sm:$0xf] %vm1659_vm13, %v1626_v9  ;;  %v2304_v9 = vpack.c.bf16 %v4708_v38, %v4708_v38 }
 0x337   : > { %2252 = vmatmul.bf16.gmra.mxu3 %v2831_v46 }
 0x338   : > { %v1914_v11 = vpop.permute.xlu2 %1913  ;;  %v4881_v46 = vunpack.c.l.bf16 %v2304_v9 }
 0x33b   : > { %v1777_v4 = vpop.permute.xlu0 %1776 }
 0x33c   : > { %v1779_v33 = vpop.permute.xlu1 %1778  ;;  %1843 = vst.msk [vmem:[#allocation2 + $0x78] sm:$0xf] %vm1812_vm14, %v1777_v4  ;;  %v2306_v4 = vpack.c.bf16 %v4776_v45, %v4776_v45 }
 0x33d   : > { %1844 = vst.msk [vmem:[#allocation2 + $0x7c] sm:$0xf] %vm1812_vm14, %v1779_v33  ;;  %v2305_v33 = vpack.c.bf16 %v4773_v28, %v4773_v28 }
 0x33e   : > { %1980 = vst.msk [vmem:[#allocation2 + $0x78] sm:$0xf] %vm1949_vm15, %v1914_v11 }
 0x33f   : > { %v4886_v11 = vunpack.c.l.bf16 %v2305_v33 }
 0x342   : > { %v2198_v58 = vpop.f32.mrf.mxu0 }
 0x343   : > { %v1916_v12 = vpop.permute.xlu0 %1915  ;;  %v2269_v22 = vmax.f32 %v2198_v58, 0.0 }
 0x344   : > { %1981 = vst.msk [vmem:[#allocation2 + $0x7c] sm:$0xf] %vm1949_vm15, %v1916_v12 }
 0x345   : > { %v2301_v36 = vpack.c.bf16 %v2269_v22, %v2269_v22 }
 0x347   : > { %v4860_v2 = vunpack.c.l.bf16 %v2301_v36 }
 0x349   : > { %v2213_v10 = vpop.f32.mrf.mxu1  ;;  %v2396_v29 = vadd.f32 %v2395_v24, %v4860_v2 }
 0x34a   : > { %v2200_v40 = vpop.f32.mrf.mxu0  ;;  %v2275_v21 = vmax.f32 %v2213_v10, 0.0  ;;  %v4891_v10 = vunpack.c.l.bf16 %v2306_v4 }
 0x34b   : > { %v2270_v17 = vmax.f32 %v2200_v40, 0.0  ;;  %v2832_v6 = vld [vmem:[#allocation2 + $0x78] sm:$0xff] }
 0x34c   : > { %2257 = vmatmul.bf16.gmra.mxu3 %v2832_v6 }
 0x34d   : > { %v2860_v52 = vpack.c.bf16 %v2270_v17, %v2269_v22  ;;  %v2302_v7 = vpack.c.bf16 %v2270_v17, %v2270_v17  ;;  %v2307_v22 = vpack.c.bf16 %v2275_v21, %v2275_v21 }
 0x34f   : > { %2924 = vst [vmem:[%s4638_s28 + $0x18] sm:$0xff] %v2860_v52   ;;  %v4867_v63 = vunpack.c.l.bf16 %v2302_v7  ;;  %v4895_v28 = vunpack.c.l.bf16 %v2307_v22 }
 0x351   : > { %v2215_v50 = vpop.f32.mrf.mxu1  ;;  %v2397_v23 = vadd.f32 %v2396_v29, %v4867_v63 }
 0x352   : > { %v2276_v3 = vmax.f32 %v2215_v50, 0.0 }
 0x353   : > { %v2398_v62 = vadd.f32 %v2397_v23, %v4876_v54 }
 0x354   : > { %v2875_v0 = vpack.c.bf16 %v2276_v3, %v2275_v21  ;;  %v2308_v52 = vpack.c.bf16 %v2276_v3, %v2276_v3  ;;  %v2311_v21 = vpack.c.bf16 %v4744_v13, %v4744_v13  ;;  %v2314_v13 = vpack.c.bf16 %v4804_v19, %v4804_v19 }
 0x355   : > { %v2399_v8 = vadd.f32 %v2398_v62, %v4881_v46 }
 0x356   : > { %2927 = vst [vmem:[%s4638_s28 + $0x30] sm:$0xff] %v2875_v0   ;;  %v4898_v45 = vunpack.c.l.bf16 %v2308_v52  ;;  %v4909_v3 = vunpack.c.l.bf16 %v2311_v21  ;;  %v4924_v7 = vunpack.c.l.bf16 %v2314_v13 }
 0x357   : > { %v2400_v58 = vadd.f32 %v2399_v8, %v4886_v11 }
 0x359   : > { %v2401_v6 = vadd.f32 %v2400_v58, %v4891_v10 }
 0x35b   : > { %v2402_v0 = vadd.f32 %v2401_v6, %v4895_v28 }
 0x35d   : > { %v2403_v59 = vadd.f32 %v2402_v0, %v4898_v45 }
 0x370   : > { %v2233_v41 = vpop.f32.mrf.mxu2 }
 0x371   : > { %v4834_v51 = vmax.f32 %v2233_v41, 0.0 }
 0x373   : > { %v2315_v14 = vpack.c.bf16 %v4834_v51, %v4834_v51 }
 0x375   : > { %v4929_v15 = vunpack.c.l.bf16 %v2315_v14 }
 0x378   : > { %v2235_v1 = vpop.f32.mrf.mxu2  ;;  %v2248_v26 = vpop.f32.mrf.mxu3 }
 0x379   : > { %v4842_v57 = vmax.f32 %v2235_v1, 0.0  ;;  %v4862_v49 = vmax.f32 %v2248_v26, 0.0 }
 0x37b   : > { %v2895_v53 = vpack.c.bf16 %v4842_v57, %v4834_v51  ;;  %v2316_v24 = vpack.c.bf16 %v4842_v57, %v4842_v57  ;;  %v2319_v51 = vpack.c.bf16 %v4798_v44, %v4798_v44  ;;  %v2320_v57 = vpack.c.bf16 %v4800_v48, %v4800_v48 }
 0x37d   : > { %2931 = vst [vmem:[%s4638_s28 + $0x50] sm:$0xff] %v2895_v53   ;;  %v4934_v29 = vunpack.c.l.bf16 %v2316_v24 }
 0x380   : > { %v2250_v20 = vpop.f32.mrf.mxu3 }
 0x381   : > { %v4864_v27 = vmax.f32 %v2250_v20, 0.0 }
 0x383   : > { %v2910_v34 = vpack.c.bf16 %v4864_v27, %v4862_v49  ;;  %v2322_v22 = vpack.c.bf16 %v4864_v27, %v4864_v27 }
 0x385   : > { %2934 = vst [vmem:[%s4638_s28 + $0x68] sm:$0xff] %v2910_v34  }
 0x389   : > { %v2218_v39 = vpop.f32.mrf.mxu1 }
 0x38a   : > { %v2277_v38 = vmax.f32 %v2218_v39, 0.0 }
 0x38c   : > { %v2309_v50 = vpack.c.bf16 %v2277_v38, %v2277_v38 }
 0x38e   : > { %v4900_v5 = vunpack.c.l.bf16 %v2309_v50 }
 0x390   : > { %v2404_v61 = vadd.f32 %v2403_v59, %v4900_v5 }
 0x391   : > { %v2220_v12 = vpop.f32.mrf.mxu1 }
 0x392   : > { %v2278_v40 = vmax.f32 %v2220_v12, 0.0  ;;  %v4947_v12 = vunpack.c.l.bf16 %v2319_v51 }
 0x394   : > { %v2880_v17 = vpack.c.bf16 %v2278_v40, %v2277_v38  ;;  %v2310_v41 = vpack.c.bf16 %v2278_v40, %v2278_v40  ;;  %v2321_v38 = vpack.c.bf16 %v4862_v49, %v4862_v49  ;;  %v4952_v40 = vunpack.c.l.bf16 %v2320_v57 }
 0x396   : > { %2928 = vst [vmem:[%s4638_s28 + $0x38] sm:$0xff] %v2880_v17   ;;  %v4903_v31 = vunpack.c.l.bf16 %v2310_v41  ;;  %v4957_v17 = vunpack.c.l.bf16 %v2321_v38  ;;  %v4960_v41 = vunpack.c.l.bf16 %v2322_v22 }
 0x398   : > { %v2405_v1 = vadd.f32 %v2404_v61, %v4903_v31 }
 0x39a   : > { %v2406_v26 = vadd.f32 %v2405_v1, %v4909_v3 }
 0x39c   : > { %v2407_v53 = vadd.f32 %v2406_v26, %v4914_v30 }
 0x39e   : > { %v2408_v36 = vadd.f32 %v2407_v53, %v4919_v47 }
 0x3a0   : > { %v2409_v20 = vadd.f32 %v2408_v36, %v4924_v7 }
 0x3a2   : > { %v2410_v19 = vadd.f32 %v2409_v20, %v4929_v15 }
 0x3a4   : > { %v2411_v62 = vadd.f32 %v2410_v19, %v4934_v29 }
 0x3b0   : > { %v2238_v42 = vpop.f32.mrf.mxu2 }
 0x3b1   : > { %v2285_v35 = vmax.f32 %v2238_v42, 0.0 }
 0x3b3   : > { %v2317_v34 = vpack.c.bf16 %v2285_v35, %v2285_v35 }
 0x3b5   : > { %v4936_v23 = vunpack.c.l.bf16 %v2317_v34 }
 0x3b7   : > { %v2412_v4 = vadd.f32 %v2411_v62, %v4936_v23 }
 0x3b8   : > { %v2240_v32 = vpop.f32.mrf.mxu2 }
 0x3b9   : > { %v2286_v9 = vmax.f32 %v2240_v32, 0.0 }
 0x3ba   : > { %v2253_v8 = vpop.f32.mrf.mxu3 }
 0x3bb   : > { %v2318_v39 = vpack.c.bf16 %v2286_v9, %v2286_v9  ;;  %v2900_v33 = vpack.c.bf16 %v2286_v9, %v2285_v35  ;;  %v2291_v50 = vmax.f32 %v2253_v8, 0.0 }
 0x3bd   : > { %2932 = vst [vmem:[%s4638_s28 + $0x58] sm:$0xff] %v2900_v33   ;;  %v4945_v58 = vunpack.c.l.bf16 %v2318_v39  ;;  %v2323_v27 = vpack.c.bf16 %v2291_v50, %v2291_v50 }
 0x3bf   : > { %v2413_v44 = vadd.f32 %v2412_v4, %v4945_v58  ;;  %v4966_v56 = vunpack.c.l.bf16 %v2323_v27 }
 0x3c1   : > { %v2414_v48 = vadd.f32 %v2413_v44, %v4947_v12 }
 0x3c2   : > { %v2255_v52 = vpop.f32.mrf.mxu3 }
 0x3c3   : > { %v2415_v6 = vadd.f32 %v2414_v48, %v4952_v40  ;;  %v2292_v0 = vmax.f32 %v2255_v52, 0.0 }
 0x3c5   : > { %v2416_v49 = vadd.f32 %v2415_v6, %v4957_v17  ;;  %v2915_v59 = vpack.c.bf16 %v2292_v0, %v2291_v50  ;;  %v2324_v26 = vpack.c.bf16 %v2292_v0, %v2292_v0 }
 0x3c7   : > { %v2417_v21 = vadd.f32 %v2416_v49, %v4960_v41  ;;  %2935 = vst [vmem:[%s4638_s28 + $0x70] sm:$0xff] %v2915_v59   ;;  %v4973_v36 = vunpack.c.l.bf16 %v2324_v26 }
 0x3c9   : > { %v2418_v53 = vadd.f32 %v2417_v21, %v4966_v56 }
 0x3cb   : > { %v2419_v35 = vadd.f32 %v2418_v53, %v4973_v36 }
 0x3cf   : > { %v2258_v61 = vpop.f32.mrf.mxu3 }
 0x3d0   : > { %v2293_v1 = vmax.f32 %v2258_v61, 0.0 }
 0x3d2   : > { %v2325_v18 = vpack.c.bf16 %v2293_v1, %v2293_v1 }
 0x3d4   : > { %v4975_v42 = vunpack.c.l.bf16 %v2325_v18 }
 0x3d6   : > { %v2420_v34 = vadd.f32 %v2419_v35, %v4975_v42 }
 0x3d7   : > { %v2260_v13 = vpop.f32.mrf.mxu3 }
 0x3d8   : > { %v2294_v14 = vmax.f32 %v2260_v13, 0.0 }
 0x3da   : > { %v2326_v20 = vpack.c.bf16 %v2294_v14, %v2294_v14  ;;  %v2920_v24 = vpack.c.bf16 %v2294_v14, %v2293_v1 }
 0x3dc   : > { %2936 = vst [vmem:[%s4638_s28 + $0x78] sm:$0xff] %v2920_v24   ;;  %v4980_v19 = vunpack.c.l.bf16 %v2326_v20 }
 0x3dd   : > { %3061 = shalt.err (!%p3058_p5)
}
 0x3de   : > { %s3155_s28 = smov 4   ;;  %v2421_v32 = vadd.f32 %v2420_v34, %v4980_v19  ;;  %s2814_s30 = sshll.u32 %s3136_s15, 1  ;;  %vm2530_vm0 = vcmask 1040384  }
 0x3df   : > { %2962 = dma.vmem_to_hbm [thread:$0]  (%p3216_p4), %s2555_s29, 2048, %s2557_s4, %s2534_s5, %s3154_s11, %s3154_s11, %s3155_s28  }
 0x3e0   : > { %v2422_v9 = vrot.slane %v2421_v32, 4  ;;  %s2694_s11 = sshll.u32 %s4620_s26, 1  ;;  %s2570_s10 = scalar_lea.hbm %s5107_s3, %s2814_s30 }
 0x3e1   : > { %s200_s29 = scalar_lea.vmem [#allocation5], %s2694_s11  ;;  %s2574_s5 = sshll.u32 %s2570_s10, 4  ;;  %s2575_s5 = int_to_ptr.hbm [resolvable:$true] %s2574_s5 }
 0x3e2   : > { %v2423_v51 = vadd.f32 %v2422_v9, %v2421_v32  ;;  %s2572_s4 = sshll.u32 %s200_s29, 4  ;;  %s2539_s6 = scalar_lea.sflag [#allocation6], %s4620_s26  ;;  %s2573_s4 = int_to_ptr.vmem [resolvable:$true] %s2572_s4 }
 0x3e3   : > { %s3076_s15 = sshra.s32 %s2575_s5, 4  ;;  %s3082_s21 = scalar_lea.hbm %s5107_s3, 4  ;;  %s3077_s15 = int_to_ptr.hbm [resolvable:$true] %s3076_s15 }
 0x3e4   : > { %v2424_v62 = vrot.slane %v2423_v51, 2  ;;  %s3078_s7 = scalar_lea.hbm %s3077_s15, 2  ;;  %p3083_p10 = scmp.lt.s32.totalorder %s3077_s15, %s5107_s3 }
 0x3e5   : > { %p3079_p6 = scmp.ne.s32.totalorder %s3077_s15, %s3078_s7  ;;  %p3084_p11 = scmp.lt.s32.totalorder %s3082_s21, %s3078_s7 }
 0x3e6   : > { %v2425_v39 = vadd.f32 %v2424_v62, %v2423_v51 }
 0x3e7   : > { %p3080_p7 = pnand %p3079_p6, %p3216_p4  ;;  %p3085_p12 = por %p3084_p11, %p3083_p10 }
 0x3e8   : > { %v2426_v33 = vrot.slane %v2425_v39, 1 }
 0x3e9   : > { %p3081_p9 = pneg %p3080_p7 }
 0x3ea   : > { %v4996_v8 = vadd.f32 %v2426_v33, %v2425_v39 }
 0x3eb   : > { %p3086_p13 = pnand %p3085_p12, %p3081_p9 }
 0x3ec   : > { %v4999_v57 = vmul.f32 0.00390625, %v4996_v8 }
 0x3ee   : > { %v2429_v4 = vsub.f32 %v4836_v60, %v4999_v57  ;;  %v2430_v38 = vsub.f32 %v4830_v55, %v4999_v57  ;;  %v2431_v44 = vsub.f32 %v4838_v37, %v4999_v57  ;;  %v2432_v6 = vsub.f32 %v4846_v16, %v4999_v57 }
 0x3ef   : > { %v2433_v52 = vsub.f32 %v4853_v25, %v4999_v57  ;;  %v2434_v49 = vsub.f32 %v4857_v43, %v4999_v57  ;;  %v2435_v55 = vsub.f32 %v4860_v2, %v4999_v57  ;;  %v2436_v61 = vsub.f32 %v4867_v63, %v4999_v57 }
 0x3f0   : > { %v2461_v22 = vmul.f32 %v2429_v4, %v2429_v4  ;;  %v2462_v48 = vmul.f32 %v2430_v38, %v2430_v38  ;;  %v2463_v50 = vmul.f32 %v2431_v44, %v2431_v44  ;;  %v2464_v60 = vmul.f32 %v2432_v6, %v2432_v6 }
 0x3f1   : > { %v2465_v21 = vmul.f32 %v2433_v52, %v2433_v52  ;;  %v2466_v27 = vmul.f32 %v2434_v49, %v2434_v49  ;;  %v2437_v25 = vsub.f32 %v4876_v54, %v4999_v57  ;;  %v2467_v1 = vmul.f32 %v2435_v55, %v2435_v55 }
 0x3f2   : > { %v2493_v0 = vadd.f32 %v2462_v48, %v2461_v22  ;;  %v2438_v43 = vsub.f32 %v4881_v46, %v4999_v57  ;;  %v2468_v18 = vmul.f32 %v2436_v61, %v2436_v61  ;;  %v2439_v2 = vsub.f32 %v4886_v11, %v4999_v57 }
 0x3f3   : > { %v2469_v13 = vmul.f32 %v2437_v25, %v2437_v25  ;;  %v2440_v63 = vsub.f32 %v4891_v10, %v4999_v57  ;;  %v2441_v54 = vsub.f32 %v4895_v28, %v4999_v57  ;;  %v2442_v46 = vsub.f32 %v4898_v45, %v4999_v57 }
 0x3f4   : > { %v2494_v59 = vadd.f32 %v2493_v0, %v2463_v50  ;;  %v2470_v35 = vmul.f32 %v2438_v43, %v2438_v43  ;;  %v2471_v24 = vmul.f32 %v2439_v2, %v2439_v2  ;;  %v2443_v11 = vsub.f32 %v4900_v5, %v4999_v57 }
 0x3f5   : > { %v2472_v32 = vmul.f32 %v2440_v63, %v2440_v63  ;;  %v2473_v51 = vmul.f32 %v2441_v54, %v2441_v54  ;;  %v2444_v10 = vsub.f32 %v4903_v31, %v4999_v57  ;;  %v2474_v39 = vmul.f32 %v2442_v46, %v2442_v46 }
 0x3f6   : > { %v2495_v37 = vadd.f32 %v2494_v59, %v2464_v60  ;;  %v2445_v28 = vsub.f32 %v4909_v3, %v4999_v57  ;;  %v2475_v4 = vmul.f32 %v2443_v11, %v2443_v11  ;;  %v2446_v45 = vsub.f32 %v4914_v30, %v4999_v57 }
 0x3f7   : > { %v2476_v44 = vmul.f32 %v2444_v10, %v2444_v10  ;;  %v2447_v5 = vsub.f32 %v4919_v47, %v4999_v57  ;;  %v2448_v31 = vsub.f32 %v4924_v7, %v4999_v57  ;;  %v2449_v3 = vsub.f32 %v4929_v15, %v4999_v57 }
 0x3f8   : > { %v2496_v16 = vadd.f32 %v2495_v37, %v2465_v21  ;;  %v2477_v48 = vmul.f32 %v2445_v28, %v2445_v28  ;;  %v2478_v52 = vmul.f32 %v2446_v45, %v2446_v45  ;;  %v2450_v30 = vsub.f32 %v4934_v29, %v4999_v57 }
 0x3f9   : > { %v2479_v0 = vmul.f32 %v2447_v5, %v2447_v5  ;;  %v2480_v60 = vmul.f32 %v2448_v31, %v2448_v31  ;;  %v2451_v47 = vsub.f32 %v4936_v23, %v4999_v57  ;;  %v2481_v55 = vmul.f32 %v2449_v3, %v2449_v3 }
 0x3fa   : > { %v2497_v26 = vadd.f32 %v2496_v16, %v2466_v27  ;;  %v2452_v7 = vsub.f32 %v4945_v58, %v4999_v57  ;;  %v2482_v37 = vmul.f32 %v2450_v30, %v2450_v30  ;;  %v2453_v15 = vsub.f32 %v4947_v12, %v4999_v57 }
 0x3fb   : > { %v2483_v27 = vmul.f32 %v2451_v47, %v2451_v47  ;;  %v2454_v29 = vsub.f32 %v4952_v40, %v4999_v57  ;;  %v2455_v23 = vsub.f32 %v4957_v17, %v4999_v57  ;;  %v2456_v58 = vsub.f32 %v4960_v41, %v4999_v57 }
 0x3fc   : > { %v2498_v53 = vadd.f32 %v2497_v26, %v2467_v1  ;;  %v2484_v25 = vmul.f32 %v2452_v7, %v2452_v7  ;;  %v2485_v26 = vmul.f32 %v2453_v15, %v2453_v15  ;;  %v2457_v12 = vsub.f32 %v4966_v56, %v4999_v57 }
 0x3fd   : > { %v2487_v2 = vmul.f32 %v2455_v23, %v2455_v23  ;;  %v2458_v40 = vsub.f32 %v4973_v36, %v4999_v57  ;;  %v2459_v17 = vsub.f32 %v4975_v42, %v4999_v57  ;;  %v2460_v41 = vsub.f32 %v4980_v19, %v4999_v57 }
 0x3fe   : > { %v2499_v14 = vadd.f32 %v2498_v53, %v2468_v18  ;;  %v2486_v18 = vmul.f32 %v2454_v29, %v2454_v29 }
 0x3ff   : > { %v2490_v54 = vmul.f32 %v2458_v40, %v2458_v40  ;;  %v2491_v56 = vmul.f32 %v2459_v17, %v2459_v17  ;;  %v2492_v46 = vmul.f32 %v2460_v41, %v2460_v41 }
 0x400   : > { %v2500_v20 = vadd.f32 %v2499_v14, %v2469_v13  ;;  %v2488_v14 = vmul.f32 %v2456_v58, %v2456_v58 }
 0x402   : > { %v2501_v34 = vadd.f32 %v2500_v20, %v2470_v35  ;;  %v2489_v35 = vmul.f32 %v2457_v12, %v2457_v12 }
 0x404   : > { %v2502_v9 = vadd.f32 %v2501_v34, %v2471_v24 }
 0x406   : > { %v2503_v62 = vadd.f32 %v2502_v9, %v2472_v32 }
 0x408   : > { %v2504_v33 = vadd.f32 %v2503_v62, %v2473_v51 }
 0x40a   : > { %v2505_v38 = vadd.f32 %v2504_v33, %v2474_v39 }
 0x40c   : > { %v2506_v22 = vadd.f32 %v2505_v38, %v2475_v4 }
 0x40e   : > { %v2507_v6 = vadd.f32 %v2506_v22, %v2476_v44 }
 0x410   : > { %v2508_v50 = vadd.f32 %v2507_v6, %v2477_v48 }
 0x412   : > { %v2509_v49 = vadd.f32 %v2508_v50, %v2478_v52 }
 0x414   : > { %v2510_v59 = vadd.f32 %v2509_v49, %v2479_v0 }
 0x416   : > { %v2511_v21 = vadd.f32 %v2510_v59, %v2480_v60 }
 0x418   : > { %v2512_v61 = vadd.f32 %v2511_v21, %v2481_v55 }
 0x41a   : > { %v2513_v16 = vadd.f32 %v2512_v61, %v2482_v37 }
 0x41c   : > { %v2514_v1 = vadd.f32 %v2513_v16, %v2483_v27 }
 0x41e   : > { %v2515_v43 = vadd.f32 %v2514_v1, %v2484_v25 }
 0x420   : > { %v2516_v53 = vadd.f32 %v2515_v43, %v2485_v26 }
 0x422   : > { %v2517_v13 = vadd.f32 %v2516_v53, %v2486_v18 }
 0x424   : > { %v2518_v63 = vadd.f32 %v2517_v13, %v2487_v2 }
 0x426   : > { %v2519_v20 = vadd.f32 %v2518_v63, %v2488_v14 }
 0x428   : > { %v2520_v24 = vadd.f32 %v2519_v20, %v2489_v35 }
 0x42a   : > { %v2521_v34 = vadd.f32 %v2520_v24, %v2490_v54 }
 0x42c   : > { %v2522_v32 = vadd.f32 %v2521_v34, %v2491_v56 }
 0x42e   : > { %v2523_v9 = vadd.f32 %v2522_v32, %v2492_v46 }
 0x430   : > { %v2524_v36 = vrot.slane %v2523_v9, 4 }
 0x432   : > { %v2525_v11 = vadd.f32 %v2524_v36, %v2523_v9 }
 0x434   : > { %v2526_v51 = vrot.slane %v2525_v11, 2 }
 0x436   : > { %v2527_v42 = vadd.f32 %v2526_v51, %v2525_v11 }
 0x438   : > { %v2528_v19 = vrot.slane %v2527_v42, 1 }
 0x43a   : > { %v2529_v57 = vadd.f32 %v2528_v19, %v2527_v42 }
 0x43c   : > { %v2531_v62 = vsel %vm2530_vm0, %v4996_v8, %v2529_v57 }
 0x43d   : > { %2532 = vst [vmem:[%s200_s29] sm:$0x3] %v2531_v62 }
 0x43e   : > { %3089 = shalt.err (!%p3086_p13)
}
 0x43f   : > { %2963 = dma.vmem_to_hbm [thread:$0]  (%p3216_p4), %s2573_s4, 32, %s2575_s5, %s2539_s6  }
 0x440 PF: > { %p2973_p0 = scmp.ge.s32.totalorder %s3144_s17, 2  ;;  %s2586_s26 = sand.u32 1, %s3124_s12  }
 0x441   : > { %s2587_s28 = scalar_lea.sflag [#allocation4], %s2586_s26 }
 0x442   : > { %p2967_p1 = pnand %p2973_p0, %p3223_p8 }
 0x444   : > { %p2968_p2 = pneg %p2967_p1 }
 0x446   : > { %3115 = dma.done.wait (%p2968_p2), %s2587_s28, 2048  }
 0x447   : > { %3117 = vsyncadd (%p2968_p2), %s2587_s28, 4294965248  ;;  %s2597_s11 = scalar_lea.sflag [#allocation6], %s2586_s26 }
 0x448   : > { %3119 = dma.done.wait (%p2968_p2), %s2597_s11, 32  }
 0x449   : > { %3121 = vsyncadd (%p2968_p2), %s2597_s11, 4294967264  ;;  %s20_s17 = sadd.s32 1, %s3144_s17   ;;  %s5369_s12 = smov %s3128_s13 }
 0x44a   : > { %p17_p3 = scmp.ge.s32.totalorder %s20_s17, 4   ;;  %s5370_s13 = smov %s3132_s14 }
 0x44b   : > { %s5371_s14 = smov %s3229_s25  ;;  %s5372_s15 = smov %s3140_s16 }
 0x44c   : > { %s5373_s16 = smov %s5375_s20  ;;  %19 = sbr.rel (!%p17_p3) target bundleno = 6 (0x6), region = 80 }
 0x451   :  { %2603 = vsyncpa [#allocation4], 1 }
 0x452   :  { %2605 = vsyncpa [#allocation4 + $0x1], 1 }
 0x453   :  { %2606 = vsyncpa [#allocation6], 1 }
 0x454   :  { %2608 = vsyncpa [#allocation6 + $0x1], 1 }

</bundles_post_ra>
